<compile_context>
chip_gen: v7x
topology: tpu7x:2x2x1
jax: 0.10.0
libtpu: 0.0.40
codegen_flags: <defaults>
</compile_context>

<pallas_src>
import jax
import jax.numpy as jnp
from jax.experimental import pallas as pl
from jax.experimental.pallas import tpu as pltpu

IMAGE_CHANNEL = 3      # opt.image_channel
D_BASE_CHANNEL = 8     # opt.d_base_channel
LRELU_SLOPE = 0.2
BN_EPS = 1e-5
LANE = 128             # TPU lane width: Cout (and layer-1 K) padded to this
MAX_TILE_M = 512       # M-tile row count (multiple of 8; VMEM per tile << 1 MiB)

# (cin, cout, kernel, stride, pad, apply_bn_and_lrelu)
LAYER_CFG = [
    (IMAGE_CHANNEL,      D_BASE_CHANNEL,     5, 3, 1, True),
    (D_BASE_CHANNEL,     D_BASE_CHANNEL * 2, 4, 2, 1, True),
    (D_BASE_CHANNEL * 2, D_BASE_CHANNEL * 4, 4, 2, 1, True),
    (D_BASE_CHANNEL * 4, D_BASE_CHANNEL * 8, 4, 2, 1, True),
    (D_BASE_CHANNEL * 8, 1,                  4, 1, 0, False),
]


def _round_up(x, m):
    return (x + m - 1) // m * m


def _pick_tile_m(m):
    """Largest tile <= MAX_TILE_M (multiple of 8) that divides M (M is a
    multiple of 16 for every layer of this net)."""
    for t in (MAX_TILE_M, 256, 128, 64, 32, 16, 8):
        if m % t == 0:
            return t
    return m


# ----------------------------------------------------------------------------
# Kernels
# ----------------------------------------------------------------------------
def _conv_stats_kernel(p_ref, w_ref, b_ref, y_ref, s1_ref, s2_ref):
    """Pass 1: conv-as-GEMM tile (bf16 MXU, f32 acc) + bias.

    p_ref: (TILE_M, Kp) bf16    w_ref: (Kp, 128) bf16   b_ref: (1, 128) f32
    y_ref: (TILE_M, 128) bf16   s1/s2_ref: (1, 1, 128) f32 per-tile BN partials
    """
    y = jnp.dot(p_ref[...], w_ref[...], preferred_element_type=jnp.float32)
    y = y + b_ref[...]
    y_ref[...] = y.astype(y_ref.dtype)
    s1_ref[0] = jnp.sum(y, axis=0, keepdims=True)
    s2_ref[0] = jnp.sum(y * y, axis=0, keepdims=True)


def _bn_lrelu_kernel(y_ref, scale_ref, shift_ref, o_ref):
    """Pass 2: folded BatchNorm (y*scale + shift) + LeakyReLU(0.2), f32 math."""
    t = y_ref[...].astype(jnp.float32) * scale_ref[...] + shift_ref[...]
    o_ref[...] = jnp.where(t >= 0, t, LRELU_SLOPE * t).astype(o_ref.dtype)


def _conv4_conv5_kernel(p_ref, w_ref, b_ref, g_ref, bt_ref, w5_ref, b5_ref, o_ref):
    """Layer 4 (conv+BN+LeakyReLU) fused with layer 5 (final 4x4 conv -> 1 logit).

    p_ref: (N*16, 512) bf16   w_ref: (512, 128) bf16   b/g/bt: (1, 128) f32
    w5_ref: (16, 128) f32 per-(spatial,channel) weights of the final conv
    b5_ref: (1, 1) f32        o_ref: (N, 1) f32
    """
    y = jnp.dot(p_ref[...], w_ref[...], preferred_element_type=jnp.float32)
    y = y + b_ref[...]
    # BatchNorm2d (training mode), centered two-pass statistics over all rows.
    m = jnp.float32(y.shape[0])
    mean = jnp.sum(y, axis=0, keepdims=True) / m
    d = y - mean
    var = jnp.sum(d * d, axis=0, keepdims=True) / m
    y = d * jax.lax.rsqrt(var + BN_EPS) * g_ref[...] + bt_ref[...]
    y = jnp.where(y >= 0, y, LRELU_SLOPE * y)
    # Final conv covers the whole 4x4 map with one output channel: weighted
    # reduction over (spatial, channel).  16 rows per batch element = 2 sublane
    # tiles, so the reshape is tile-aligned and cheap.
    n = o_ref.shape[0]
    z = y.reshape(n, 16, LANE) * w5_ref[...][None, :, :]
    acc = jnp.sum(z, axis=1)                                       # (N, 128)
    o_ref[...] = jnp.sum(acc, axis=1, keepdims=True) + b5_ref[...]  # (N, 1)


# ----------------------------------------------------------------------------
# Host-side glue (all inside jit)
# ----------------------------------------------------------------------------
def _im2col(x_nhwc, kh, kw, stride, pad):
    """Extract conv patches; feature order = (kh, kw, cin) to match weight layout."""
    # TODO(synk): fold this into the kernels as shifted-window GEMM accumulation
    #             to avoid the k^2 read amplification of the patch expansion.
    x = jnp.pad(x_nhwc, ((0, 0), (pad, pad), (pad, pad), (0, 0)))
    n, hp, wp, c = x.shape
    oh = (hp - kh) // stride + 1
    ow = (wp - kw) // stride + 1
    cols = []
    for i in range(kh):
        for j in range(kw):
            cols.append(x[:, i:i + stride * oh:stride, j:j + stride * ow:stride, :])
    cols = jnp.stack(cols, axis=3)                      # (N, oh, ow, kh*kw, C)
    return cols.reshape(n * oh * ow, kh * kw * c), oh, ow


_VMEM = pl.BlockSpec(memory_space=pltpu.MemorySpace.VMEM)


def _conv_bn_lrelu(x_nhwc, layer_p, k, stride, pad, cout):
    wmat, bp, gp, btp = layer_p                         # wmat: (Kp, 128) bf16
    n = x_nhwc.shape[0]
    patches, oh, ow = _im2col(x_nhwc, k, k, stride, pad)
    kk, kp = patches.shape[1], wmat.shape[0]
    if kp != kk:                                        # layer 1: K 75 -> 128
        patches = jnp.pad(patches, ((0, 0), (0, kp - kk)))
    patches = patches.astype(jnp.bfloat16)
    m = n * oh * ow
    tile_m = _pick_tile_m(m)
    g = m // tile_m

    # Pass 1: tiled GEMM + bias, bf16 conv output + per-tile BN partial sums.
    y, s1p, s2p = pl.pallas_call(
        _conv_stats_kernel,
        grid=(g,),
        in_specs=[
            pl.BlockSpec((tile_m, kp), lambda i: (i, 0)),
            pl.BlockSpec((kp, LANE), lambda i: (0, 0)),
            pl.BlockSpec((1, LANE), lambda i: (0, 0)),
        ],
        out_specs=(
            pl.BlockSpec((tile_m, LANE), lambda i: (i, 0)),
            pl.BlockSpec((1, 1, LANE), lambda i: (i, 0, 0)),
            pl.BlockSpec((1, 1, LANE), lambda i: (i, 0, 0)),
        ),
        out_shape=(
            jax.ShapeDtypeStruct((m, LANE), jnp.bfloat16),
            jax.ShapeDtypeStruct((g, 1, LANE), jnp.float32),
            jax.ShapeDtypeStruct((g, 1, LANE), jnp.float32),
        ),
        compiler_params=pltpu.CompilerParams(
            dimension_semantics=("parallel",)),
        cost_estimate=pl.CostEstimate(
            flops=2 * m * kp * LANE,
            transcendentals=0,
            bytes_accessed=(m * kp * 2 + kp * LANE * 2 + LANE * 4
                            + m * LANE * 2 + 2 * g * LANE * 4)),
    )(patches, wmat, bp)

    # Fold batch-stat BN into per-channel scale/shift (tiny f32 glue, XLA-fused).
    mf = jnp.float32(m)
    s1 = jnp.sum(s1p, axis=0)                           # (1, 128)
    s2 = jnp.sum(s2p, axis=0)                           # (1, 128)
    mean = s1 / mf
    var = jnp.maximum(s2 / mf - mean * mean, 0.0)
    scale = gp * jax.lax.rsqrt(var + BN_EPS)
    shift = btp - mean * scale

    # Pass 2: tiled elementwise BN-apply + LeakyReLU, bf16 writeback.
    act = pl.pallas_call(
        _bn_lrelu_kernel,
        grid=(g,),
        in_specs=[
            pl.BlockSpec((tile_m, LANE), lambda i: (i, 0)),
            pl.BlockSpec((1, LANE), lambda i: (0, 0)),
            pl.BlockSpec((1, LANE), lambda i: (0, 0)),
        ],
        out_specs=pl.BlockSpec((tile_m, LANE), lambda i: (i, 0)),
        out_shape=jax.ShapeDtypeStruct((m, LANE), jnp.bfloat16),
        compiler_params=pltpu.CompilerParams(
            dimension_semantics=("parallel",)),
        cost_estimate=pl.CostEstimate(
            flops=4 * m * LANE,
            transcendentals=0,
            bytes_accessed=2 * m * LANE * 2 + 2 * LANE * 4),
    )(y, scale, shift)

    # TODO(synk): write act lane-dense as (N*OH, OW*Cout) inside pass 2 to drop
    #             the padded-channel writeback and this XLA slice pass.
    return act[:, :cout].reshape(n, oh, ow, cout)


def _tail(x_nhwc, layer4_p, layer5_p):
    """Fused layer 4 (conv+BN+LReLU) + layer 5 (final conv)."""
    wmat4, b4, g4, bt4 = layer4_p
    w5_sp, b5 = layer5_p                                # (16, 128) f32, (1, 1) f32
    n = x_nhwc.shape[0]
    patches, oh, ow = _im2col(x_nhwc, 4, 4, 2, 1)       # layer-4 patches, K=512
    kk, kp = patches.shape[1], wmat4.shape[0]
    if kp != kk:
        patches = jnp.pad(patches, ((0, 0), (0, kp - kk)))
    patches = patches.astype(jnp.bfloat16)
    m4 = n * oh * ow                                    # = n * 16
    out = pl.pallas_call(
        _conv4_conv5_kernel,
        out_shape=jax.ShapeDtypeStruct((n, 1), jnp.float32),
        in_specs=[_VMEM] * 7,
        out_specs=_VMEM,
        cost_estimate=pl.CostEstimate(
            flops=2 * m4 * kp * LANE,
            transcendentals=LANE,
            bytes_accessed=m4 * kp * 2 + kp * LANE * 2 + 16 * LANE * 4 + n * 4),
    )(patches, wmat4, b4, g4, bt4, w5_sp, b5)
    return out.reshape(-1)                              # == PyTorch out.view(-1)


def discriminator_forward(x_nchw, packed):
    # NCHW (PyTorch) -> NHWC internal layout; bf16 activations (BN math in f32).
    x = jnp.transpose(x_nchw, (0, 2, 3, 1)).astype(jnp.bfloat16)
    for li in range(3):
        _, cout, k, stride, pad_, _ = LAYER_CFG[li]
        x = _conv_bn_lrelu(x, packed[li], k, stride, pad_, cout)
    return _tail(x, packed[3], packed[4])


# ----------------------------------------------------------------------------
# Parameters (PyTorch layout) + one-time TPU-friendly packing
# ----------------------------------------------------------------------------
def init_params(key):
    params = []
    for (cin, cout, k, _, _, _) in LAYER_CFG:
        key, kw_, kb_, kg_, kbt_ = jax.random.split(key, 5)
        w = 0.05 * jax.random.normal(kw_, (cout, cin, k, k), dtype=jnp.float32)
        b = 0.01 * jax.random.normal(kb_, (cout,), dtype=jnp.float32)
        gamma = 1.0 + 0.1 * jax.random.normal(kg_, (cout,), dtype=jnp.float32)
        beta = 0.1 * jax.random.normal(kbt_, (cout,), dtype=jnp.float32)
        params.append((w, b, gamma, beta))
    return params


def preprocess_params(params):
    """One-time packing: (Cout,Cin,KH,KW) -> (Kp, 128) bf16 GEMM weights, padded
    bias/gamma/beta, and per-spatial (16, 128) weights for the fused final conv."""
    packed = []
    last = len(LAYER_CFG) - 1
    for li, ((w, b, gamma, beta), (cin, cout, k, _, _, _)) in enumerate(
            zip(params, LAYER_CFG)):
        if li < last:
            kk = k * k * cin
            kp = _round_up(kk, LANE)
            wmat = jnp.transpose(w, (2, 3, 1, 0)).reshape(kk, cout)
            wmat = jnp.pad(wmat, ((0, kp - kk), (0, LANE - cout))).astype(jnp.bfloat16)
            pad_c = ((0, 0), (0, LANE - cout))
            bp = jnp.pad(b.reshape(1, cout), pad_c).astype(jnp.float32)
            gp = jnp.pad(gamma.reshape(1, cout), pad_c).astype(jnp.float32)
            btp = jnp.pad(beta.reshape(1, cout), pad_c).astype(jnp.float32)
            packed.append((wmat, bp, gp, btp))
        else:
            # Final conv (cout=1): row (h*4+w) holds w[0, :, h, w], channel-padded.
            w5_sp = jnp.transpose(w, (2, 3, 1, 0)).reshape(k * k, cin)
            w5_sp = jnp.pad(w5_sp, ((0, 0), (0, LANE - cin))).astype(jnp.float32)
            b5 = b.reshape(1, 1).astype(jnp.float32)
            packed.append((w5_sp, b5))
    return packed


if __name__ == "__main__":
    key = jax.random.PRNGKey(0)
    kx, kparam = jax.random.split(key)
    # 96x96 is the spatial size implied by the conv stack (final 4x4 conv -> 1x1).
    x = jax.random.normal(kx, (2, IMAGE_CHANNEL, 96, 96), dtype=jnp.float32)
    params = init_params(kparam)
    packed = preprocess_params(params)

    fwd = jax.jit(discriminator_forward)
    out = jax.block_until_ready(fwd(x, packed))

    assert out.shape == (2,), out.shape
    assert bool(jnp.all(jnp.isfinite(out)))
    print("KERNEL_OK")
</pallas_src>

<mosaic_0001>
module attributes {stable_mosaic.version = 11 : i64} {
  func.func @_conv_stats_kernel(%arg0: i32, %arg1: memref<512x128xbf16, #tpu.memory_space<vmem>>, %arg2: memref<128x128xbf16, #tpu.memory_space<vmem>>, %arg3: memref<1x128xf32, #tpu.memory_space<vmem>>, %arg4: memref<512x128xbf16, #tpu.memory_space<vmem>>, %arg5: memref<1x1x128xf32, #tpu.memory_space<vmem>>, %arg6: memref<1x1x128xf32, #tpu.memory_space<vmem>>) attributes {dimension_semantics = [#tpu.dimension_semantics<parallel>], iteration_bounds = array<i64: 4>, scalar_prefetch = 0 : i64, scratch_operands = 0 : i64, tpu.core_type = #tpu.core_type<tc>, window_params = [{transform_indices = @transform_0, window_bounds = array<i64: 512, 128>}, {pipeline_mode = #tpu.pipeline_mode<synchronous>, transform_indices = @transform_1, window_bounds = array<i64: 128, 128>}, {pipeline_mode = #tpu.pipeline_mode<synchronous>, transform_indices = @transform_2, window_bounds = array<i64: 1, 128>}, {transform_indices = @transform_3, window_bounds = array<i64: 512, 128>}, {transform_indices = @transform_4, window_bounds = array<i64: 1, 1, 128>}, {transform_indices = @transform_5, window_bounds = array<i64: 1, 1, 128>}]} {
    %c0 = arith.constant 0 : index
    %c0_0 = arith.constant 0 : index
    %0 = vector.load %arg1[%c0, %c0_0] : memref<512x128xbf16, #tpu.memory_space<vmem>>, vector<512x128xbf16>
    %c0_1 = arith.constant 0 : index
    %c0_2 = arith.constant 0 : index
    %1 = vector.load %arg2[%c0_1, %c0_2] : memref<128x128xbf16, #tpu.memory_space<vmem>>, vector<128x128xbf16>
    %cst = arith.constant dense<0.000000e+00> : vector<512x128xf32>
    %2 = tpu.matmul %0, %1, %cst {dimension_numbers = #tpu.dot_dimension_numbers<[1], [0], [0], [1], [0, 0, 1, 1], [], []>} : vector<512x128xbf16>, vector<128x128xbf16>, vector<512x128xf32> -> vector<512x128xf32>
    %c0_3 = arith.constant 0 : index
    %c0_4 = arith.constant 0 : index
    %3 = vector.load %arg3[%c0_3, %c0_4] : memref<1x128xf32, #tpu.memory_space<vmem>>, vector<1x128xf32>
    %4 = vector.broadcast %3 : vector<1x128xf32> to vector<512x128xf32>
    %5 = arith.addf %2, %4 : vector<512x128xf32>
    %6 = arith.truncf %5 : vector<512x128xf32> to vector<512x128xbf16>
    %c0_5 = arith.constant 0 : index
    %c0_6 = arith.constant 0 : index
    %7 = vector.load %arg4[%c0_5, %c0_6] : memref<512x128xbf16, #tpu.memory_space<vmem>>, vector<512x128xbf16>
    tpu.vector_store %arg4[%c0_5, %c0_6], %6 {strides = array<i32>} : memref<512x128xbf16, #tpu.memory_space<vmem>>, vector<512x128xbf16>,
    %cst_7 = arith.constant dense<0.000000e+00> : vector<128xf32>
    %8 = vector.multi_reduction <add>, %5, %cst_7 [0] : vector<512x128xf32> to vector<128xf32>
    %9 = vector.shape_cast %8 : vector<128xf32> to vector<1x128xf32>
    %c0_8 = arith.constant 0 : index
    %c0_9 = arith.constant 0 : index
    %c0_10 = arith.constant 0 : index
    %10 = vector.load %arg5[%c0_8, %c0_9, %c0_10] : memref<1x1x128xf32, #tpu.memory_space<vmem>>, vector<1x1x128xf32>
    %11 = vector.shape_cast %10 : vector<1x1x128xf32> to vector<1x128xf32>
    %12 = vector.shape_cast %9 : vector<1x128xf32> to vector<1x1x128xf32>
    tpu.vector_store %arg5[%c0_8, %c0_9, %c0_10], %12 {strides = array<i32>} : memref<1x1x128xf32, #tpu.memory_space<vmem>>, vector<1x1x128xf32>,
    %13 = arith.mulf %5, %5 : vector<512x128xf32>
    %cst_11 = arith.constant dense<0.000000e+00> : vector<128xf32>
    %14 = vector.multi_reduction <add>, %13, %cst_11 [0] : vector<512x128xf32> to vector<128xf32>
    %15 = vector.shape_cast %14 : vector<128xf32> to vector<1x128xf32>
    %c0_12 = arith.constant 0 : index
    %c0_13 = arith.constant 0 : index
    %c0_14 = arith.constant 0 : index
    %16 = vector.load %arg6[%c0_12, %c0_13, %c0_14] : memref<1x1x128xf32, #tpu.memory_space<vmem>>, vector<1x1x128xf32>
    %17 = vector.shape_cast %16 : vector<1x1x128xf32> to vector<1x128xf32>
    %18 = vector.shape_cast %15 : vector<1x128xf32> to vector<1x1x128xf32>
    tpu.vector_store %arg6[%c0_12, %c0_13, %c0_14], %18 {strides = array<i32>} : memref<1x1x128xf32, #tpu.memory_space<vmem>>, vector<1x1x128xf32>,
    return
  }
  func.func @transform_0(%arg0: i32) -> (i32, i32) {
    %c0_i32 = arith.constant 0 : i32
    %c0_i32_0 = arith.constant 0 : i32
    return %arg0, %c0_i32 : i32, i32
  }
  func.func @transform_1(%arg0: i32) -> (i32, i32) {
    %c0_i32 = arith.constant 0 : i32
    %c0_i32_0 = arith.constant 0 : i32
    %c0_i32_1 = arith.constant 0 : i32
    return %c0_i32, %c0_i32_0 : i32, i32
  }
  func.func @transform_2(%arg0: i32) -> (i32, i32) {
    %c0_i32 = arith.constant 0 : i32
    %c0_i32_0 = arith.constant 0 : i32
    %c0_i32_1 = arith.constant 0 : i32
    return %c0_i32, %c0_i32_0 : i32, i32
  }
  func.func @transform_3(%arg0: i32) -> (i32, i32) {
    %c0_i32 = arith.constant 0 : i32
    %c0_i32_0 = arith.constant 0 : i32
    return %arg0, %c0_i32 : i32, i32
  }
  func.func @transform_4(%arg0: i32) -> (i32, i32, i32) {
    %c0_i32 = arith.constant 0 : i32
    %c0_i32_0 = arith.constant 0 : i32
    %c0_i32_1 = arith.constant 0 : i32
    return %arg0, %c0_i32, %c0_i32_0 : i32, i32, i32
  }
  func.func @transform_5(%arg0: i32) -> (i32, i32, i32) {
    %c0_i32 = arith.constant 0 : i32
    %c0_i32_0 = arith.constant 0 : i32
    %c0_i32_1 = arith.constant 0 : i32
    return %arg0, %c0_i32, %c0_i32_0 : i32, i32, i32
  }
}

module attributes {stable_mosaic.version = 11 : i64} {
  func.func @_bn_lrelu_kernel(%arg0: i32, %arg1: memref<512x128xbf16, #tpu.memory_space<vmem>>, %arg2: memref<1x128xf32, #tpu.memory_space<vmem>>, %arg3: memref<1x128xf32, #tpu.memory_space<vmem>>, %arg4: memref<512x128xbf16, #tpu.memory_space<vmem>>) attributes {dimension_semantics = [#tpu.dimension_semantics<parallel>], iteration_bounds = array<i64: 4>, scalar_prefetch = 0 : i64, scratch_operands = 0 : i64, tpu.core_type = #tpu.core_type<tc>, window_params = [{transform_indices = @transform_0, window_bounds = array<i64: 512, 128>}, {pipeline_mode = #tpu.pipeline_mode<synchronous>, transform_indices = @transform_1, window_bounds = array<i64: 1, 128>}, {pipeline_mode = #tpu.pipeline_mode<synchronous>, transform_indices = @transform_2, window_bounds = array<i64: 1, 128>}, {transform_indices = @transform_3, window_bounds = array<i64: 512, 128>}]} {
    %c0 = arith.constant 0 : index
    %c0_0 = arith.constant 0 : index
    %0 = vector.load %arg1[%c0, %c0_0] : memref<512x128xbf16, #tpu.memory_space<vmem>>, vector<512x128xbf16>
    %1 = arith.extf %0 : vector<512x128xbf16> to vector<512x128xf32>
    %c0_1 = arith.constant 0 : index
    %c0_2 = arith.constant 0 : index
    %2 = vector.load %arg2[%c0_1, %c0_2] : memref<1x128xf32, #tpu.memory_space<vmem>>, vector<1x128xf32>
    %3 = vector.broadcast %2 : vector<1x128xf32> to vector<512x128xf32>
    %4 = arith.mulf %1, %3 : vector<512x128xf32>
    %c0_3 = arith.constant 0 : index
    %c0_4 = arith.constant 0 : index
    %5 = vector.load %arg3[%c0_3, %c0_4] : memref<1x128xf32, #tpu.memory_space<vmem>>, vector<1x128xf32>
    %6 = vector.broadcast %5 : vector<1x128xf32> to vector<512x128xf32>
    %7 = arith.addf %4, %6 : vector<512x128xf32>
    %cst = arith.constant 0.000000e+00 : f32
    %8 = vector.broadcast %cst : f32 to vector<512x128xf32>
    %9 = arith.cmpf oge, %7, %8 : vector<512x128xf32>
    %cst_5 = arith.constant 2.000000e-01 : f32
    %10 = vector.broadcast %cst_5 : f32 to vector<512x128xf32>
    %11 = arith.mulf %10, %7 : vector<512x128xf32>
    %12 = arith.select %9, %7, %11 : vector<512x128xi1>, vector<512x128xf32>
    %13 = arith.truncf %12 : vector<512x128xf32> to vector<512x128xbf16>
    %c0_6 = arith.constant 0 : index
    %c0_7 = arith.constant 0 : index
    %14 = vector.load %arg4[%c0_6, %c0_7] : memref<512x128xbf16, #tpu.memory_space<vmem>>, vector<512x128xbf16>
    tpu.vector_store %arg4[%c0_6, %c0_7], %13 {strides = array<i32>} : memref<512x128xbf16, #tpu.memory_space<vmem>>, vector<512x128xbf16>,
    return
  }
  func.func @transform_0(%arg0: i32) -> (i32, i32) {
    %c0_i32 = arith.constant 0 : i32
    %c0_i32_0 = arith.constant 0 : i32
    return %arg0, %c0_i32 : i32, i32
  }
  func.func @transform_1(%arg0: i32) -> (i32, i32) {
    %c0_i32 = arith.constant 0 : i32
    %c0_i32_0 = arith.constant 0 : i32
    %c0_i32_1 = arith.constant 0 : i32
    return %c0_i32, %c0_i32_0 : i32, i32
  }
  func.func @transform_2(%arg0: i32) -> (i32, i32) {
    %c0_i32 = arith.constant 0 : i32
    %c0_i32_0 = arith.constant 0 : i32
    %c0_i32_1 = arith.constant 0 : i32
    return %c0_i32, %c0_i32_0 : i32, i32
  }
  func.func @transform_3(%arg0: i32) -> (i32, i32) {
    %c0_i32 = arith.constant 0 : i32
    %c0_i32_0 = arith.constant 0 : i32
    return %arg0, %c0_i32 : i32, i32
  }
}

module attributes {stable_mosaic.version = 11 : i64} {
  func.func @_conv_stats_kernel(%arg0: i32, %arg1: memref<512x128xbf16, #tpu.memory_space<vmem>>, %arg2: memref<128x128xbf16, #tpu.memory_space<vmem>>, %arg3: memref<1x128xf32, #tpu.memory_space<vmem>>, %arg4: memref<512x128xbf16, #tpu.memory_space<vmem>>, %arg5: memref<1x1x128xf32, #tpu.memory_space<vmem>>, %arg6: memref<1x1x128xf32, #tpu.memory_space<vmem>>) attributes {dimension_semantics = [#tpu.dimension_semantics<parallel>], iteration_bounds = array<i64: 1>, scalar_prefetch = 0 : i64, scratch_operands = 0 : i64, tpu.core_type = #tpu.core_type<tc>, window_params = [{transform_indices = @transform_0, window_bounds = array<i64: 512, 128>}, {pipeline_mode = #tpu.pipeline_mode<synchronous>, transform_indices = @transform_1, window_bounds = array<i64: 128, 128>}, {pipeline_mode = #tpu.pipeline_mode<synchronous>, transform_indices = @transform_2, window_bounds = array<i64: 1, 128>}, {transform_indices = @transform_3, window_bounds = array<i64: 512, 128>}, {transform_indices = @transform_4, window_bounds = array<i64: 1, 1, 128>}, {transform_indices = @transform_5, window_bounds = array<i64: 1, 1, 128>}]} {
    %c0 = arith.constant 0 : index
    %c0_0 = arith.constant 0 : index
    %0 = vector.load %arg1[%c0, %c0_0] : memref<512x128xbf16, #tpu.memory_space<vmem>>, vector<512x128xbf16>
    %c0_1 = arith.constant 0 : index
    %c0_2 = arith.constant 0 : index
    %1 = vector.load %arg2[%c0_1, %c0_2] : memref<128x128xbf16, #tpu.memory_space<vmem>>, vector<128x128xbf16>
    %cst = arith.constant dense<0.000000e+00> : vector<512x128xf32>
    %2 = tpu.matmul %0, %1, %cst {dimension_numbers = #tpu.dot_dimension_numbers<[1], [0], [0], [1], [0, 0, 1, 1], [], []>} : vector<512x128xbf16>, vector<128x128xbf16>, vector<512x128xf32> -> vector<512x128xf32>
    %c0_3 = arith.constant 0 : index
    %c0_4 = arith.constant 0 : index
    %3 = vector.load %arg3[%c0_3, %c0_4] : memref<1x128xf32, #tpu.memory_space<vmem>>, vector<1x128xf32>
    %4 = vector.broadcast %3 : vector<1x128xf32> to vector<512x128xf32>
    %5 = arith.addf %2, %4 : vector<512x128xf32>
    %6 = arith.truncf %5 : vector<512x128xf32> to vector<512x128xbf16>
    %c0_5 = arith.constant 0 : index
    %c0_6 = arith.constant 0 : index
    %7 = vector.load %arg4[%c0_5, %c0_6] : memref<512x128xbf16, #tpu.memory_space<vmem>>, vector<512x128xbf16>
    tpu.vector_store %arg4[%c0_5, %c0_6], %6 {strides = array<i32>} : memref<512x128xbf16, #tpu.memory_space<vmem>>, vector<512x128xbf16>,
    %cst_7 = arith.constant dense<0.000000e+00> : vector<128xf32>
    %8 = vector.multi_reduction <add>, %5, %cst_7 [0] : vector<512x128xf32> to vector<128xf32>
    %9 = vector.shape_cast %8 : vector<128xf32> to vector<1x128xf32>
    %c0_8 = arith.constant 0 : index
    %c0_9 = arith.constant 0 : index
    %c0_10 = arith.constant 0 : index
    %10 = vector.load %arg5[%c0_8, %c0_9, %c0_10] : memref<1x1x128xf32, #tpu.memory_space<vmem>>, vector<1x1x128xf32>
    %11 = vector.shape_cast %10 : vector<1x1x128xf32> to vector<1x128xf32>
    %12 = vector.shape_cast %9 : vector<1x128xf32> to vector<1x1x128xf32>
    tpu.vector_store %arg5[%c0_8, %c0_9, %c0_10], %12 {strides = array<i32>} : memref<1x1x128xf32, #tpu.memory_space<vmem>>, vector<1x1x128xf32>,
    %13 = arith.mulf %5, %5 : vector<512x128xf32>
    %cst_11 = arith.constant dense<0.000000e+00> : vector<128xf32>
    %14 = vector.multi_reduction <add>, %13, %cst_11 [0] : vector<512x128xf32> to vector<128xf32>
    %15 = vector.shape_cast %14 : vector<128xf32> to vector<1x128xf32>
    %c0_12 = arith.constant 0 : index
    %c0_13 = arith.constant 0 : index
    %c0_14 = arith.constant 0 : index
    %16 = vector.load %arg6[%c0_12, %c0_13, %c0_14] : memref<1x1x128xf32, #tpu.memory_space<vmem>>, vector<1x1x128xf32>
    %17 = vector.shape_cast %16 : vector<1x1x128xf32> to vector<1x128xf32>
    %18 = vector.shape_cast %15 : vector<1x128xf32> to vector<1x1x128xf32>
    tpu.vector_store %arg6[%c0_12, %c0_13, %c0_14], %18 {strides = array<i32>} : memref<1x1x128xf32, #tpu.memory_space<vmem>>, vector<1x1x128xf32>,
    return
  }
  func.func @transform_0(%arg0: i32) -> (i32, i32) {
    %c0_i32 = arith.constant 0 : i32
    %c0_i32_0 = arith.constant 0 : i32
    return %arg0, %c0_i32 : i32, i32
  }
  func.func @transform_1(%arg0: i32) -> (i32, i32) {
    %c0_i32 = arith.constant 0 : i32
    %c0_i32_0 = arith.constant 0 : i32
    %c0_i32_1 = arith.constant 0 : i32
    return %c0_i32, %c0_i32_0 : i32, i32
  }
  func.func @transform_2(%arg0: i32) -> (i32, i32) {
    %c0_i32 = arith.constant 0 : i32
    %c0_i32_0 = arith.constant 0 : i32
    %c0_i32_1 = arith.constant 0 : i32
    return %c0_i32, %c0_i32_0 : i32, i32
  }
  func.func @transform_3(%arg0: i32) -> (i32, i32) {
    %c0_i32 = arith.constant 0 : i32
    %c0_i32_0 = arith.constant 0 : i32
    return %arg0, %c0_i32 : i32, i32
  }
  func.func @transform_4(%arg0: i32) -> (i32, i32, i32) {
    %c0_i32 = arith.constant 0 : i32
    %c0_i32_0 = arith.constant 0 : i32
    %c0_i32_1 = arith.constant 0 : i32
    return %arg0, %c0_i32, %c0_i32_0 : i32, i32, i32
  }
  func.func @transform_5(%arg0: i32) -> (i32, i32, i32) {
    %c0_i32 = arith.constant 0 : i32
    %c0_i32_0 = arith.constant 0 : i32
    %c0_i32_1 = arith.constant 0 : i32
    return %arg0, %c0_i32, %c0_i32_0 : i32, i32, i32
  }
}

module attributes {stable_mosaic.version = 11 : i64} {
  func.func @_bn_lrelu_kernel(%arg0: i32, %arg1: memref<512x128xbf16, #tpu.memory_space<vmem>>, %arg2: memref<1x128xf32, #tpu.memory_space<vmem>>, %arg3: memref<1x128xf32, #tpu.memory_space<vmem>>, %arg4: memref<512x128xbf16, #tpu.memory_space<vmem>>) attributes {dimension_semantics = [#tpu.dimension_semantics<parallel>], iteration_bounds = array<i64: 1>, scalar_prefetch = 0 : i64, scratch_operands = 0 : i64, tpu.core_type = #tpu.core_type<tc>, window_params = [{transform_indices = @transform_0, window_bounds = array<i64: 512, 128>}, {pipeline_mode = #tpu.pipeline_mode<synchronous>, transform_indices = @transform_1, window_bounds = array<i64: 1, 128>}, {pipeline_mode = #tpu.pipeline_mode<synchronous>, transform_indices = @transform_2, window_bounds = array<i64: 1, 128>}, {transform_indices = @transform_3, window_bounds = array<i64: 512, 128>}]} {
    %c0 = arith.constant 0 : index
    %c0_0 = arith.constant 0 : index
    %0 = vector.load %arg1[%c0, %c0_0] : memref<512x128xbf16, #tpu.memory_space<vmem>>, vector<512x128xbf16>
    %1 = arith.extf %0 : vector<512x128xbf16> to vector<512x128xf32>
    %c0_1 = arith.constant 0 : index
    %c0_2 = arith.constant 0 : index
    %2 = vector.load %arg2[%c0_1, %c0_2] : memref<1x128xf32, #tpu.memory_space<vmem>>, vector<1x128xf32>
    %3 = vector.broadcast %2 : vector<1x128xf32> to vector<512x128xf32>
    %4 = arith.mulf %1, %3 : vector<512x128xf32>
    %c0_3 = arith.constant 0 : index
    %c0_4 = arith.constant 0 : index
    %5 = vector.load %arg3[%c0_3, %c0_4] : memref<1x128xf32, #tpu.memory_space<vmem>>, vector<1x128xf32>
    %6 = vector.broadcast %5 : vector<1x128xf32> to vector<512x128xf32>
    %7 = arith.addf %4, %6 : vector<512x128xf32>
    %cst = arith.constant 0.000000e+00 : f32
    %8 = vector.broadcast %cst : f32 to vector<512x128xf32>
    %9 = arith.cmpf oge, %7, %8 : vector<512x128xf32>
    %cst_5 = arith.constant 2.000000e-01 : f32
    %10 = vector.broadcast %cst_5 : f32 to vector<512x128xf32>
    %11 = arith.mulf %10, %7 : vector<512x128xf32>
    %12 = arith.select %9, %7, %11 : vector<512x128xi1>, vector<512x128xf32>
    %13 = arith.truncf %12 : vector<512x128xf32> to vector<512x128xbf16>
    %c0_6 = arith.constant 0 : index
    %c0_7 = arith.constant 0 : index
    %14 = vector.load %arg4[%c0_6, %c0_7] : memref<512x128xbf16, #tpu.memory_space<vmem>>, vector<512x128xbf16>
    tpu.vector_store %arg4[%c0_6, %c0_7], %13 {strides = array<i32>} : memref<512x128xbf16, #tpu.memory_space<vmem>>, vector<512x128xbf16>,
    return
  }
  func.func @transform_0(%arg0: i32) -> (i32, i32) {
    %c0_i32 = arith.constant 0 : i32
    %c0_i32_0 = arith.constant 0 : i32
    return %arg0, %c0_i32 : i32, i32
  }
  func.func @transform_1(%arg0: i32) -> (i32, i32) {
    %c0_i32 = arith.constant 0 : i32
    %c0_i32_0 = arith.constant 0 : i32
    %c0_i32_1 = arith.constant 0 : i32
    return %c0_i32, %c0_i32_0 : i32, i32
  }
  func.func @transform_2(%arg0: i32) -> (i32, i32) {
    %c0_i32 = arith.constant 0 : i32
    %c0_i32_0 = arith.constant 0 : i32
    %c0_i32_1 = arith.constant 0 : i32
    return %c0_i32, %c0_i32_0 : i32, i32
  }
  func.func @transform_3(%arg0: i32) -> (i32, i32) {
    %c0_i32 = arith.constant 0 : i32
    %c0_i32_0 = arith.constant 0 : i32
    return %arg0, %c0_i32 : i32, i32
  }
}

module attributes {stable_mosaic.version = 11 : i64} {
  func.func @_conv_stats_kernel(%arg0: i32, %arg1: memref<128x256xbf16, #tpu.memory_space<vmem>>, %arg2: memref<256x128xbf16, #tpu.memory_space<vmem>>, %arg3: memref<1x128xf32, #tpu.memory_space<vmem>>, %arg4: memref<128x128xbf16, #tpu.memory_space<vmem>>, %arg5: memref<1x1x128xf32, #tpu.memory_space<vmem>>, %arg6: memref<1x1x128xf32, #tpu.memory_space<vmem>>) attributes {dimension_semantics = [#tpu.dimension_semantics<parallel>], iteration_bounds = array<i64: 1>, scalar_prefetch = 0 : i64, scratch_operands = 0 : i64, tpu.core_type = #tpu.core_type<tc>, window_params = [{transform_indices = @transform_0, window_bounds = array<i64: 128, 256>}, {pipeline_mode = #tpu.pipeline_mode<synchronous>, transform_indices = @transform_1, window_bounds = array<i64: 256, 128>}, {pipeline_mode = #tpu.pipeline_mode<synchronous>, transform_indices = @transform_2, window_bounds = array<i64: 1, 128>}, {transform_indices = @transform_3, window_bounds = array<i64: 128, 128>}, {transform_indices = @transform_4, window_bounds = array<i64: 1, 1, 128>}, {transform_indices = @transform_5, window_bounds = array<i64: 1, 1, 128>}]} {
    %c0 = arith.constant 0 : index
    %c0_0 = arith.constant 0 : index
    %0 = vector.load %arg1[%c0, %c0_0] : memref<128x256xbf16, #tpu.memory_space<vmem>>, vector<128x256xbf16>
    %c0_1 = arith.constant 0 : index
    %c0_2 = arith.constant 0 : index
    %1 = vector.load %arg2[%c0_1, %c0_2] : memref<256x128xbf16, #tpu.memory_space<vmem>>, vector<256x128xbf16>
    %cst = arith.constant dense<0.000000e+00> : vector<128x128xf32>
    %2 = tpu.matmul %0, %1, %cst {dimension_numbers = #tpu.dot_dimension_numbers<[1], [0], [0], [1], [0, 0, 1, 1], [], []>} : vector<128x256xbf16>, vector<256x128xbf16>, vector<128x128xf32> -> vector<128x128xf32>
    %c0_3 = arith.constant 0 : index
    %c0_4 = arith.constant 0 : index
    %3 = vector.load %arg3[%c0_3, %c0_4] : memref<1x128xf32, #tpu.memory_space<vmem>>, vector<1x128xf32>
    %4 = vector.broadcast %3 : vector<1x128xf32> to vector<128x128xf32>
    %5 = arith.addf %2, %4 : vector<128x128xf32>
    %6 = arith.truncf %5 : vector<128x128xf32> to vector<128x128xbf16>
    %c0_5 = arith.constant 0 : index
    %c0_6 = arith.constant 0 : index
    %7 = vector.load %arg4[%c0_5, %c0_6] : memref<128x128xbf16, #tpu.memory_space<vmem>>, vector<128x128xbf16>
    tpu.vector_store %arg4[%c0_5, %c0_6], %6 {strides = array<i32>} : memref<128x128xbf16, #tpu.memory_space<vmem>>, vector<128x128xbf16>,
    %cst_7 = arith.constant dense<0.000000e+00> : vector<128xf32>
    %8 = vector.multi_reduction <add>, %5, %cst_7 [0] : vector<128x128xf32> to vector<128xf32>
    %9 = vector.shape_cast %8 : vector<128xf32> to vector<1x128xf32>
    %c0_8 = arith.constant 0 : index
    %c0_9 = arith.constant 0 : index
    %c0_10 = arith.constant 0 : index
    %10 = vector.load %arg5[%c0_8, %c0_9, %c0_10] : memref<1x1x128xf32, #tpu.memory_space<vmem>>, vector<1x1x128xf32>
    %11 = vector.shape_cast %10 : vector<1x1x128xf32> to vector<1x128xf32>
    %12 = vector.shape_cast %9 : vector<1x128xf32> to vector<1x1x128xf32>
    tpu.vector_store %arg5[%c0_8, %c0_9, %c0_10], %12 {strides = array<i32>} : memref<1x1x128xf32, #tpu.memory_space<vmem>>, vector<1x1x128xf32>,
    %13 = arith.mulf %5, %5 : vector<128x128xf32>
    %cst_11 = arith.constant dense<0.000000e+00> : vector<128xf32>
    %14 = vector.multi_reduction <add>, %13, %cst_11 [0] : vector<128x128xf32> to vector<128xf32>
    %15 = vector.shape_cast %14 : vector<128xf32> to vector<1x128xf32>
    %c0_12 = arith.constant 0 : index
    %c0_13 = arith.constant 0 : index
    %c0_14 = arith.constant 0 : index
    %16 = vector.load %arg6[%c0_12, %c0_13, %c0_14] : memref<1x1x128xf32, #tpu.memory_space<vmem>>, vector<1x1x128xf32>
    %17 = vector.shape_cast %16 : vector<1x1x128xf32> to vector<1x128xf32>
    %18 = vector.shape_cast %15 : vector<1x128xf32> to vector<1x1x128xf32>
    tpu.vector_store %arg6[%c0_12, %c0_13, %c0_14], %18 {strides = array<i32>} : memref<1x1x128xf32, #tpu.memory_space<vmem>>, vector<1x1x128xf32>,
    return
  }
  func.func @transform_0(%arg0: i32) -> (i32, i32) {
    %c0_i32 = arith.constant 0 : i32
    %c0_i32_0 = arith.constant 0 : i32
    return %arg0, %c0_i32 : i32, i32
  }
  func.func @transform_1(%arg0: i32) -> (i32, i32) {
    %c0_i32 = arith.constant 0 : i32
    %c0_i32_0 = arith.constant 0 : i32
    %c0_i32_1 = arith.constant 0 : i32
    return %c0_i32, %c0_i32_0 : i32, i32
  }
  func.func @transform_2(%arg0: i32) -> (i32, i32) {
    %c0_i32 = arith.constant 0 : i32
    %c0_i32_0 = arith.constant 0 : i32
    %c0_i32_1 = arith.constant 0 : i32
    return %c0_i32, %c0_i32_0 : i32, i32
  }
  func.func @transform_3(%arg0: i32) -> (i32, i32) {
    %c0_i32 = arith.constant 0 : i32
    %c0_i32_0 = arith.constant 0 : i32
    return %arg0, %c0_i32 : i32, i32
  }
  func.func @transform_4(%arg0: i32) -> (i32, i32, i32) {
    %c0_i32 = arith.constant 0 : i32
    %c0_i32_0 = arith.constant 0 : i32
    %c0_i32_1 = arith.constant 0 : i32
    return %arg0, %c0_i32, %c0_i32_0 : i32, i32, i32
  }
  func.func @transform_5(%arg0: i32) -> (i32, i32, i32) {
    %c0_i32 = arith.constant 0 : i32
    %c0_i32_0 = arith.constant 0 : i32
    %c0_i32_1 = arith.constant 0 : i32
    return %arg0, %c0_i32, %c0_i32_0 : i32, i32, i32
  }
}

module attributes {stable_mosaic.version = 11 : i64} {
  func.func @_bn_lrelu_kernel(%arg0: i32, %arg1: memref<128x128xbf16, #tpu.memory_space<vmem>>, %arg2: memref<1x128xf32, #tpu.memory_space<vmem>>, %arg3: memref<1x128xf32, #tpu.memory_space<vmem>>, %arg4: memref<128x128xbf16, #tpu.memory_space<vmem>>) attributes {dimension_semantics = [#tpu.dimension_semantics<parallel>], iteration_bounds = array<i64: 1>, scalar_prefetch = 0 : i64, scratch_operands = 0 : i64, tpu.core_type = #tpu.core_type<tc>, window_params = [{transform_indices = @transform_0, window_bounds = array<i64: 128, 128>}, {pipeline_mode = #tpu.pipeline_mode<synchronous>, transform_indices = @transform_1, window_bounds = array<i64: 1, 128>}, {pipeline_mode = #tpu.pipeline_mode<synchronous>, transform_indices = @transform_2, window_bounds = array<i64: 1, 128>}, {transform_indices = @transform_3, window_bounds = array<i64: 128, 128>}]} {
    %c0 = arith.constant 0 : index
    %c0_0 = arith.constant 0 : index
    %0 = vector.load %arg1[%c0, %c0_0] : memref<128x128xbf16, #tpu.memory_space<vmem>>, vector<128x128xbf16>
    %1 = arith.extf %0 : vector<128x128xbf16> to vector<128x128xf32>
    %c0_1 = arith.constant 0 : index
    %c0_2 = arith.constant 0 : index
    %2 = vector.load %arg2[%c0_1, %c0_2] : memref<1x128xf32, #tpu.memory_space<vmem>>, vector<1x128xf32>
    %3 = vector.broadcast %2 : vector<1x128xf32> to vector<128x128xf32>
    %4 = arith.mulf %1, %3 : vector<128x128xf32>
    %c0_3 = arith.constant 0 : index
    %c0_4 = arith.constant 0 : index
    %5 = vector.load %arg3[%c0_3, %c0_4] : memref<1x128xf32, #tpu.memory_space<vmem>>, vector<1x128xf32>
    %6 = vector.broadcast %5 : vector<1x128xf32> to vector<128x128xf32>
    %7 = arith.addf %4, %6 : vector<128x128xf32>
    %cst = arith.constant 0.000000e+00 : f32
    %8 = vector.broadcast %cst : f32 to vector<128x128xf32>
    %9 = arith.cmpf oge, %7, %8 : vector<128x128xf32>
    %cst_5 = arith.constant 2.000000e-01 : f32
    %10 = vector.broadcast %cst_5 : f32 to vector<128x128xf32>
    %11 = arith.mulf %10, %7 : vector<128x128xf32>
    %12 = arith.select %9, %7, %11 : vector<128x128xi1>, vector<128x128xf32>
    %13 = arith.truncf %12 : vector<128x128xf32> to vector<128x128xbf16>
    %c0_6 = arith.constant 0 : index
    %c0_7 = arith.constant 0 : index
    %14 = vector.load %arg4[%c0_6, %c0_7] : memref<128x128xbf16, #tpu.memory_space<vmem>>, vector<128x128xbf16>
    tpu.vector_store %arg4[%c0_6, %c0_7], %13 {strides = array<i32>} : memref<128x128xbf16, #tpu.memory_space<vmem>>, vector<128x128xbf16>,
    return
  }
  func.func @transform_0(%arg0: i32) -> (i32, i32) {
    %c0_i32 = arith.constant 0 : i32
    %c0_i32_0 = arith.constant 0 : i32
    return %arg0, %c0_i32 : i32, i32
  }
  func.func @transform_1(%arg0: i32) -> (i32, i32) {
    %c0_i32 = arith.constant 0 : i32
    %c0_i32_0 = arith.constant 0 : i32
    %c0_i32_1 = arith.constant 0 : i32
    return %c0_i32, %c0_i32_0 : i32, i32
  }
  func.func @transform_2(%arg0: i32) -> (i32, i32) {
    %c0_i32 = arith.constant 0 : i32
    %c0_i32_0 = arith.constant 0 : i32
    %c0_i32_1 = arith.constant 0 : i32
    return %c0_i32, %c0_i32_0 : i32, i32
  }
  func.func @transform_3(%arg0: i32) -> (i32, i32) {
    %c0_i32 = arith.constant 0 : i32
    %c0_i32_0 = arith.constant 0 : i32
    return %arg0, %c0_i32 : i32, i32
  }
}

module attributes {stable_mosaic.version = 11 : i64} {
  func.func @_conv4_conv5_kernel(%arg0: memref<32x512xbf16, #tpu.memory_space<vmem>>, %arg1: memref<512x128xbf16, #tpu.memory_space<vmem>>, %arg2: memref<1x128xf32, #tpu.memory_space<vmem>>, %arg3: memref<1x128xf32, #tpu.memory_space<vmem>>, %arg4: memref<1x128xf32, #tpu.memory_space<vmem>>, %arg5: memref<16x128xf32, #tpu.memory_space<vmem>>, %arg6: memref<1x1xf32, #tpu.memory_space<vmem>>, %arg7: memref<2x1xf32, #tpu.memory_space<vmem>>) attributes {dimension_semantics = [], scalar_prefetch = 0 : i64, scratch_operands = 0 : i64, tpu.core_type = #tpu.core_type<tc>} {
    %c0 = arith.constant 0 : index
    %c0_0 = arith.constant 0 : index
    %0 = vector.load %arg0[%c0, %c0_0] : memref<32x512xbf16, #tpu.memory_space<vmem>>, vector<32x512xbf16>
    %c0_1 = arith.constant 0 : index
    %c0_2 = arith.constant 0 : index
    %1 = vector.load %arg1[%c0_1, %c0_2] : memref<512x128xbf16, #tpu.memory_space<vmem>>, vector<512x128xbf16>
    %cst = arith.constant dense<0.000000e+00> : vector<32x128xf32>
    %2 = tpu.matmul %0, %1, %cst {dimension_numbers = #tpu.dot_dimension_numbers<[1], [0], [0], [1], [0, 0, 1, 1], [], []>} : vector<32x512xbf16>, vector<512x128xbf16>, vector<32x128xf32> -> vector<32x128xf32>
    %c0_3 = arith.constant 0 : index
    %c0_4 = arith.constant 0 : index
    %3 = vector.load %arg2[%c0_3, %c0_4] : memref<1x128xf32, #tpu.memory_space<vmem>>, vector<1x128xf32>
    %4 = vector.broadcast %3 : vector<1x128xf32> to vector<32x128xf32>
    %5 = arith.addf %2, %4 : vector<32x128xf32>
    %cst_5 = arith.constant dense<0.000000e+00> : vector<128xf32>
    %6 = vector.multi_reduction <add>, %5, %cst_5 [0] : vector<32x128xf32> to vector<128xf32>
    %7 = vector.shape_cast %6 : vector<128xf32> to vector<1x128xf32>
    %cst_6 = arith.constant 3.200000e+01 : f32
    %8 = vector.broadcast %cst_6 : f32 to vector<1x128xf32>
    %9 = arith.divf %7, %8 : vector<1x128xf32>
    %10 = vector.broadcast %9 : vector<1x128xf32> to vector<32x128xf32>
    %11 = arith.subf %5, %10 : vector<32x128xf32>
    %12 = arith.mulf %11, %11 : vector<32x128xf32>
    %cst_7 = arith.constant dense<0.000000e+00> : vector<128xf32>
    %13 = vector.multi_reduction <add>, %12, %cst_7 [0] : vector<32x128xf32> to vector<128xf32>
    %14 = vector.shape_cast %13 : vector<128xf32> to vector<1x128xf32>
    %cst_8 = arith.constant 3.200000e+01 : f32
    %15 = vector.broadcast %cst_8 : f32 to vector<1x128xf32>
    %16 = arith.divf %14, %15 : vector<1x128xf32>
    %cst_9 = arith.constant 9.99999974E-6 : f32
    %17 = vector.broadcast %cst_9 : f32 to vector<1x128xf32>
    %18 = arith.addf %16, %17 : vector<1x128xf32>
    %19 = math.rsqrt %18 : vector<1x128xf32>
    %20 = vector.broadcast %19 : vector<1x128xf32> to vector<32x128xf32>
    %21 = arith.mulf %11, %20 : vector<32x128xf32>
    %c0_10 = arith.constant 0 : index
    %c0_11 = arith.constant 0 : index
    %22 = vector.load %arg3[%c0_10, %c0_11] : memref<1x128xf32, #tpu.memory_space<vmem>>, vector<1x128xf32>
    %23 = vector.broadcast %22 : vector<1x128xf32> to vector<32x128xf32>
    %24 = arith.mulf %21, %23 : vector<32x128xf32>
    %c0_12 = arith.constant 0 : index
    %c0_13 = arith.constant 0 : index
    %25 = vector.load %arg4[%c0_12, %c0_13] : memref<1x128xf32, #tpu.memory_space<vmem>>, vector<1x128xf32>
    %26 = vector.broadcast %25 : vector<1x128xf32> to vector<32x128xf32>
    %27 = arith.addf %24, %26 : vector<32x128xf32>
    %cst_14 = arith.constant 0.000000e+00 : f32
    %28 = vector.broadcast %cst_14 : f32 to vector<32x128xf32>
    %29 = arith.cmpf oge, %27, %28 : vector<32x128xf32>
    %cst_15 = arith.constant 2.000000e-01 : f32
    %30 = vector.broadcast %cst_15 : f32 to vector<32x128xf32>
    %31 = arith.mulf %30, %27 : vector<32x128xf32>
    %32 = arith.select %29, %27, %31 : vector<32x128xi1>, vector<32x128xf32>
    %33 = vector.shape_cast %32 : vector<32x128xf32> to vector<2x16x128xf32>
    %c0_16 = arith.constant 0 : index
    %c0_17 = arith.constant 0 : index
    %34 = vector.load %arg5[%c0_16, %c0_17] : memref<16x128xf32, #tpu.memory_space<vmem>>, vector<16x128xf32>
    %35 = vector.shape_cast %34 : vector<16x128xf32> to vector<1x16x128xf32>
    %36 = vector.broadcast %35 : vector<1x16x128xf32> to vector<2x16x128xf32>
    %37 = arith.mulf %33, %36 : vector<2x16x128xf32>
    %cst_18 = arith.constant dense<0.000000e+00> : vector<2x128xf32>
    %38 = vector.multi_reduction <add>, %37, %cst_18 [1] : vector<2x16x128xf32> to vector<2x128xf32>
    %cst_19 = arith.constant dense<0.000000e+00> : vector<2xf32>
    %39 = vector.multi_reduction <add>, %38, %cst_19 [1] : vector<2x128xf32> to vector<2xf32>
    %40 = vector.shape_cast %39 : vector<2xf32> to vector<2x1xf32>
    %c0_20 = arith.constant 0 : index
    %c0_21 = arith.constant 0 : index
    %41 = vector.load %arg6[%c0_20, %c0_21] : memref<1x1xf32, #tpu.memory_space<vmem>>, vector<1x1xf32>
    %42 = vector.broadcast %41 : vector<1x1xf32> to vector<2x1xf32>
    %43 = arith.addf %40, %42 : vector<2x1xf32>
    %c0_22 = arith.constant 0 : index
    %c0_23 = arith.constant 0 : index
    %44 = vector.load %arg7[%c0_22, %c0_23] : memref<2x1xf32, #tpu.memory_space<vmem>>, vector<2x1xf32>
    tpu.vector_store %arg7[%c0_22, %c0_23], %43 {strides = array<i32>} : memref<2x1xf32, #tpu.memory_space<vmem>>, vector<2x1xf32>,
    return
  }
}

</mosaic_0001>

<bundles_post_ra>
// kernel: discriminator_forward.7
= control target key start
LH: loop header
LB: loop body
LE: loop exit
PB: predicated region body
PF: predicated region fallthrough
CT: control target
= control target key end

     0   :  { %s2085_s18 = smov 0   ;;  %s2473_s0 = inlined_call_operand.vmem [shape: bf16[2048,128], index: 0, kind: input, shape index: {}]   ;;  %s2474_s1 = inlined_call_operand.vmem [shape: bf16[128,128], index: 1, kind: input, shape index: {}]   ;;  %s2475_s2 = inlined_call_operand.vmem [shape: f32[1,128], index: 2, kind: input, shape index: {}]   ;;  %s2476_s3 = inlined_call_operand.vmem [shape: bf16[2048,128], index: 3, kind: output, shape index: {0}]   ;;  %s2477_s4 = inlined_call_operand.vmem [shape: f32[4,1,128], index: 4, kind: output, shape index: {1}]   ;;  %s2478_s5 = inlined_call_operand.vmem [shape: f32[4,1,128], index: 5, kind: output, shape index: {2}]  }
   0x1 LB: > { %s2091_s19 = sadd.s32 4294967295, %s2053_s18   ;;  %p1496_p0 = scmp.ge.s32.totalorder %s2053_s18, 1  ;;  %s2053_s18 = sphi %s2085_s18, %s16_s18  }
   0x2   : > { %p193_p1 = scmp.lt.s32.totalorder %s2053_s18, 5 }
   0x4   : > { %p194_p2 = pnand %p1496_p0, %p193_p1 }
   0x5   : > { %v2007_v0 = vld [vmem:[%s2474_s1] sm:$0xff] (!%p194_p2)   ;;  %s1497_s22 = sshll.u32 (!%p194_p2), %s2091_s19, 6  ;;  %v2008_v1 = vld [vmem:[%s2474_s1 + $0x8] sm:$0xff] (!%p194_p2)   ;;  %v2009_v2 = vld [vmem:[%s2474_s1 + $0x10] sm:$0xff] (!%p194_p2)   ;;  %p239_p4 = scmp.lt.s32.totalorder (!%p194_p2), %s2091_s19, 3 }
   0x6   : > { %197 = sbr.rel (%p194_p2) target bundleno = 396 (0x18c), region = 32  ;;  %p228_p3 = scmp.lt.s32.totalorder (!%p194_p2), %s1497_s22, 255  ;;  %1903 = vmatprep.subr.bf16.mxu0 (!%p194_p2), %v2007_v0  ;;  %1983 = vmatprep.subr.bf16.mxu1 (!%p194_p2), %v2007_v0  ;;  %v2010_v3 = vld [vmem:[%s2474_s1 + $0x18] sm:$0xff] (!%p194_p2)   ;;  %v2011_v5 = vld [vmem:[%s2474_s1 + $0x20] sm:$0xff] (!%p194_p2)   ;;  %v2012_v6 = vld [vmem:[%s2474_s1 + $0x28] sm:$0xff] (!%p194_p2)  }
   0x7   : > { %1904 = vmatpush3.bf16.msra.mxu0 (!%p194_p2), %v2007_v0  ;;  %1991 = vmatpush3.bf16.msra.mxu1 (!%p194_p2), %v2007_v0  ;;  %v2013_v7 = vld [vmem:[%s2474_s1 + $0x30] sm:$0xff] (!%p194_p2)   ;;  %v2014_v8 = vld [vmem:[%s2474_s1 + $0x38] sm:$0xff] (!%p194_p2)   ;;  %v2165_v40 = vld [vmem:[%s2475_s2] ss:$0 sm:$0xff] (!%p194_p2) }
   0x8   : > { %1905 = vmatprep.subr.bf16.mxu0 (!%p194_p2), %v2008_v1  ;;  %1984 = vmatprep.subr.bf16.mxu1 (!%p194_p2), %v2008_v1 }
   0xb   : > { %1906 = vmatpush3.bf16.msra.mxu0 (!%p194_p2), %v2008_v1  ;;  %1992 = vmatpush3.bf16.msra.mxu1 (!%p194_p2), %v2008_v1 }
   0xc   : > { %1907 = vmatprep.subr.bf16.mxu0 (!%p194_p2), %v2009_v2  ;;  %1985 = vmatprep.subr.bf16.mxu1 (!%p194_p2), %v2009_v2 }
   0xd   : > { %s2480_s22 = smov (!%p228_p3, %s1497_s22), 255  ;;  %s2482_s19 = smov (!%p239_p4, %s2091_s19), 3 }
   0xe   : > { %s1498_s27 = sshll.u32 %s2480_s22, 2  ;;  %s241_s25 = scalar_lea.vmem %s2477_s4, %s2482_s19 }
   0xf   : > { %s2113_s30 = scalar_lea.vmem %s2473_s0, %s1498_s27  ;;  %1908 = vmatpush3.bf16.msra.mxu0 %v2009_v2  ;;  %1993 = vmatpush3.bf16.msra.mxu1 %v2009_v2  ;;  %s2184_s23 = scalar_lea.vmem %s2476_s3, %s1498_s27 }
  0x10   : > { %v2015_v4 = vld [vmem:[%s2113_s30] sm:$0xff]   ;;  %1909 = vmatprep.subr.bf16.mxu0 %v2010_v3  ;;  %1986 = vmatprep.subr.bf16.mxu1 %v2010_v3  ;;  %v2016_v10 = vld [vmem:[%s2113_s30 + $0x8] sm:$0xff]   ;;  %v2017_v11 = vld [vmem:[%s2113_s30 + $0x10] sm:$0xff]   ;;  %s244_s28 = scalar_lea.vmem %s2478_s5, %s2482_s19 }
  0x11   : > { %1919 = vmatprep.mubr.bf16.mxu0 %v2015_v4  ;;  %v2031_v9 = vld [vmem:[%s2113_s30 + $0x80] sm:$0xff]   ;;  %v2032_v12 = vld [vmem:[%s2113_s30 + $0x88] sm:$0xff]   ;;  %v2033_v13 = vld [vmem:[%s2113_s30 + $0x90] sm:$0xff]  }
  0x12   : > { %1951 = vmatprep.mubr.bf16.mxu1 %v2031_v9  ;;  %v2018_v14 = vld [vmem:[%s2113_s30 + $0x18] sm:$0xff]   ;;  %v2019_v15 = vld [vmem:[%s2113_s30 + $0x20] sm:$0xff]   ;;  %v2020_v18 = vld [vmem:[%s2113_s30 + $0x28] sm:$0xff]  }
  0x13   : > { %1910 = vmatpush3.bf16.msra.mxu0 %v2010_v3  ;;  %1994 = vmatpush3.bf16.msra.mxu1 %v2010_v3  ;;  %v2034_v16 = vld [vmem:[%s2113_s30 + $0x98] sm:$0xff]   ;;  %v2035_v17 = vld [vmem:[%s2113_s30 + $0xa0] sm:$0xff]   ;;  %v2036_v19 = vld [vmem:[%s2113_s30 + $0xa8] sm:$0xff]  }
  0x14   : > { %1911 = vmatprep.subr.bf16.mxu0 %v2011_v5  ;;  %1987 = vmatprep.subr.bf16.mxu1 %v2011_v5  ;;  %v2021_v20 = vld [vmem:[%s2113_s30 + $0x30] sm:$0xff]   ;;  %v2022_v22 = vld [vmem:[%s2113_s30 + $0x38] sm:$0xff]   ;;  %v2023_v24 = vld [vmem:[%s2113_s30 + $0x40] sm:$0xff]  }
  0x15   : > { %v2037_v21 = vld [vmem:[%s2113_s30 + $0xb0] sm:$0xff]   ;;  %v2038_v23 = vld [vmem:[%s2113_s30 + $0xb8] sm:$0xff]   ;;  %v2039_v25 = vld [vmem:[%s2113_s30 + $0xc0] sm:$0xff]  }
  0x16   : > { %v2024_v26 = vld [vmem:[%s2113_s30 + $0x48] sm:$0xff]   ;;  %v2025_v28 = vld [vmem:[%s2113_s30 + $0x50] sm:$0xff]   ;;  %v2026_v30 = vld [vmem:[%s2113_s30 + $0x58] sm:$0xff]  }
  0x17   : > { %1912 = vmatpush3.bf16.msra.mxu0 %v2011_v5  ;;  %1995 = vmatpush3.bf16.msra.mxu1 %v2011_v5  ;;  %v2040_v27 = vld [vmem:[%s2113_s30 + $0xc8] sm:$0xff]   ;;  %v2041_v29 = vld [vmem:[%s2113_s30 + $0xd0] sm:$0xff]   ;;  %v2042_v31 = vld [vmem:[%s2113_s30 + $0xd8] sm:$0xff]  }
  0x18   : > { %1913 = vmatprep.subr.bf16.mxu0 %v2012_v6  ;;  %1988 = vmatprep.subr.bf16.mxu1 %v2012_v6  ;;  %v2027_v32 = vld [vmem:[%s2113_s30 + $0x60] sm:$0xff]   ;;  %v2028_v34 = vld [vmem:[%s2113_s30 + $0x68] sm:$0xff]   ;;  %v2029_v36 = vld [vmem:[%s2113_s30 + $0x70] sm:$0xff]  }
  0x19   : > { %v2043_v33 = vld [vmem:[%s2113_s30 + $0xe0] sm:$0xff]   ;;  %v2044_v35 = vld [vmem:[%s2113_s30 + $0xe8] sm:$0xff]   ;;  %v2045_v37 = vld [vmem:[%s2113_s30 + $0xf0] sm:$0xff]  }
  0x1a   : > { %v2030_v38 = vld [vmem:[%s2113_s30 + $0x78] sm:$0xff]  }
  0x1b   : > { %1914 = vmatpush3.bf16.msra.mxu0 %v2012_v6  ;;  %1996 = vmatpush3.bf16.msra.mxu1 %v2012_v6  ;;  %v2046_v39 = vld [vmem:[%s2113_s30 + $0xf8] sm:$0xff]  }
  0x1c   : > { %1915 = vmatprep.subr.bf16.mxu0 %v2013_v7  ;;  %1989 = vmatprep.subr.bf16.mxu1 %v2013_v7 }
  0x1f   : > { %1916 = vmatpush3.bf16.msra.mxu0 %v2013_v7  ;;  %1997 = vmatpush3.bf16.msra.mxu1 %v2013_v7 }
  0x20   : > { %1917 = vmatprep.subr.bf16.mxu0 %v2014_v8  ;;  %1990 = vmatprep.subr.bf16.mxu1 %v2014_v8 }
  0x23   : > { %1918 = vmatpush3.bf16.msra.mxu0 %v2014_v8  ;;  %1998 = vmatpush3.bf16.msra.mxu1 %v2014_v8 }
  0x26   : > { %1920 = vmatmul.mubr.bf16.vlgmr.msra.gmra.mrb[0].mxu0 %v2016_v10  ;;  %1952 = vmatmul.mubr.bf16.vlgmr.msra.gmra.mrb[0].mxu1 %v2032_v12 }
  0x27   : > { %1923 = vmatprep.mubr.bf16.mxu0 %v2017_v11  ;;  %1955 = vmatprep.mubr.bf16.mxu1 %v2033_v13 }
  0x2e   : > { %1924 = vmatmul.mubr.bf16.gmra.mrb[4].mxu0 %v2018_v14  ;;  %1956 = vmatmul.mubr.bf16.gmra.mrb[4].mxu1 %v2034_v16 }
  0x2f   : > { %1927 = vmatprep.mubr.bf16.mxu0 %v2019_v15  ;;  %1959 = vmatprep.mubr.bf16.mxu1 %v2035_v17 }
  0x36   : > { %1928 = vmatmul.mubr.bf16.gmra.mrb[8].mxu0 %v2020_v18  ;;  %1960 = vmatmul.mubr.bf16.gmra.mrb[8].mxu1 %v2036_v19 }
  0x37   : > { %1931 = vmatprep.mubr.bf16.mxu0 %v2021_v20  ;;  %1963 = vmatprep.mubr.bf16.mxu1 %v2037_v21 }
  0x3e   : > { %1932 = vmatmul.mubr.bf16.gmra.mrb[12].mxu0 %v2022_v22  ;;  %1964 = vmatmul.mubr.bf16.gmra.mrb[12].mxu1 %v2038_v23 }
  0x3f   : > { %1935 = vmatprep.mubr.bf16.mxu0 %v2023_v24  ;;  %1967 = vmatprep.mubr.bf16.mxu1 %v2039_v25 }
  0x46   : > { %1936 = vmatmul.mubr.bf16.gmra.mrb[16].mxu0 %v2024_v26  ;;  %1968 = vmatmul.mubr.bf16.gmra.mrb[16].mxu1 %v2040_v27 }
  0x47   : > { %1939 = vmatprep.mubr.bf16.mxu0 %v2025_v28  ;;  %1971 = vmatprep.mubr.bf16.mxu1 %v2041_v29 }
  0x4e   : > { %1940 = vmatmul.mubr.bf16.gmra.mrb[20].mxu0 %v2026_v30  ;;  %1972 = vmatmul.mubr.bf16.gmra.mrb[20].mxu1 %v2042_v31 }
  0x4f   : > { %1943 = vmatprep.mubr.bf16.mxu0 %v2027_v32  ;;  %1975 = vmatprep.mubr.bf16.mxu1 %v2043_v33 }
  0x56   : > { %1944 = vmatmul.mubr.bf16.gmra.mrb[24].mxu0 %v2028_v34  ;;  %1976 = vmatmul.mubr.bf16.gmra.mrb[24].mxu1 %v2044_v35 }
  0x57   : > { %1947 = vmatprep.mubr.bf16.mxu0 %v2029_v36  ;;  %1979 = vmatprep.mubr.bf16.mxu1 %v2045_v37 }
  0x5e   : > { %1948 = vmatmul.mubr.bf16.gmra.mrb[28].mxu0 %v2030_v38  ;;  %1980 = vmatmul.mubr.bf16.gmra.mrb[28].mxu1 %v2046_v39 }
  0xf9   : > { %v1921_v41 = vpop.f32.mrb[0].mxu0  ;;  %v1953_v42 = vpop.f32.mrb[0].mxu1 }
  0xfa   : > { %v607_v43 = vpop.f32.mrb[1].mxu0  ;;  %v2168_v44 = vadd.f32 %v1953_v42, %v2165_v40  ;;  %v735_v45 = vpop.f32.mrb[1].mxu1  ;;  %v616_v50 = vadd.f32 %v1921_v41, %v2165_v40 }
  0xfb   : > { %v608_v46 = vadd.f32 %v2165_v40, %v607_v43  ;;  %v1922_v47 = vpop.f32.mrb[2].mxu0  ;;  %v2172_v48 = vadd.f32 %v2165_v40, %v735_v45  ;;  %v1954_v49 = vpop.f32.mrb[2].mxu1 }
  0xfc   : > { %v619_v51 = vadd.f32 %v1922_v47, %v2165_v40  ;;  %v610_v52 = vpop.f32.mrb[3].mxu0  ;;  %v2177_v53 = vadd.f32 %v1954_v49, %v2165_v40  ;;  %v738_v54 = vpop.f32.mrb[3].mxu1  ;;  %v1254_v0 = vmul.f32 %v616_v50, %v616_v50 }
  0xfd   : > { %v611_v55 = vadd.f32 %v2165_v40, %v610_v52  ;;  %v2188_v56 = vadd.f32 %v2165_v40, %v738_v54  ;;  %v1252_v57 = vmul.f32 %v608_v46, %v608_v46 }
  0xfe   : > { %v1680_v58 = vpack.c.bf16 %v619_v51, %v616_v50  ;;  %v1760_v59 = vpack.c.bf16 %v2177_v53, %v2168_v44  ;;  %v1255_v8 = vmul.f32 %v619_v51, %v619_v51 }
  0xff   : > { %v1675_v60 = vpack.c.bf16 %v611_v55, %v608_v46  ;;  %v1182_v61 = vadd.f32 %v611_v55, %v608_v46  ;;  %v1253_v62 = vmul.f32 %v611_v55, %v611_v55  ;;  %v1755_v63 = vpack.c.bf16 %v2188_v56, %v2172_v48 }
 0x100   : > { %1832 = vst [vmem:[%s2184_s23 + $0x8] sm:$0xff] %v1680_v58   ;;  %1848 = vst [vmem:[%s2184_s23 + $0x88] sm:$0xff] %v1760_v59  }
 0x101   : > { %1676 = vst [vmem:[%s2184_s23] sm:$0xff] %v1675_v60   ;;  %v1183_v1 = vadd.f32 %v1182_v61, %v616_v50  ;;  %v1316_v2 = vadd.f32 %v1253_v62, %v1252_v57  ;;  %v1925_v3 = vpop.f32.mrb[4].mxu0  ;;  %1847 = vst [vmem:[%s2184_s23 + $0x80] sm:$0xff] %v1755_v63   ;;  %v1957_v4 = vpop.f32.mrb[4].mxu1 }
 0x102   : > { %v623_v5 = vpop.f32.mrb[5].mxu0  ;;  %v2199_v6 = vadd.f32 %v1957_v4, %v2165_v40  ;;  %v751_v7 = vpop.f32.mrb[5].mxu1  ;;  %v632_v14 = vadd.f32 %v1925_v3, %v2165_v40 }
 0x103   : > { %v1317_v9 = vadd.f32 %v1316_v2, %v1254_v0  ;;  %v624_v10 = vadd.f32 %v2165_v40, %v623_v5  ;;  %v1184_v11 = vadd.f32 %v1183_v1, %v619_v51  ;;  %v1926_v12 = vpop.f32.mrb[6].mxu0  ;;  %v1958_v13 = vpop.f32.mrb[6].mxu1  ;;  %v2209_v24 = vadd.f32 %v2165_v40, %v751_v7 }
 0x104   : > { %v635_v15 = vadd.f32 %v1926_v12, %v2165_v40  ;;  %v626_v16 = vpop.f32.mrb[7].mxu0  ;;  %v2205_v17 = vadd.f32 %v1958_v13, %v2165_v40  ;;  %v754_v18 = vpop.f32.mrb[7].mxu1  ;;  %v1258_v31 = vmul.f32 %v632_v14, %v632_v14 }
 0x105   : > { %v1185_v19 = vadd.f32 %v1184_v11, %v624_v10  ;;  %v1256_v20 = vmul.f32 %v624_v10, %v624_v10  ;;  %v1318_v21 = vadd.f32 %v1317_v9, %v1255_v8  ;;  %v627_v22 = vadd.f32 %v2165_v40, %v626_v16 }
 0x106   : > { %v1690_v23 = vpack.c.bf16 %v635_v15, %v632_v14  ;;  %v1770_v25 = vpack.c.bf16 %v2205_v17, %v2199_v6  ;;  %v2216_v30 = vadd.f32 %v2165_v40, %v754_v18  ;;  %v1259_v41 = vmul.f32 %v635_v15, %v635_v15 }
 0x107   : > { %v1319_v26 = vadd.f32 %v1318_v21, %v1256_v20  ;;  %v1685_v27 = vpack.c.bf16 %v627_v22, %v624_v10  ;;  %v1186_v28 = vadd.f32 %v1185_v19, %v627_v22  ;;  %v1257_v29 = vmul.f32 %v627_v22, %v627_v22 }
 0x108   : > { %1834 = vst [vmem:[%s2184_s23 + $0x18] sm:$0xff] %v1690_v23   ;;  %1850 = vst [vmem:[%s2184_s23 + $0x98] sm:$0xff] %v1770_v25   ;;  %v1765_v37 = vpack.c.bf16 %v2216_v30, %v2209_v24 }
 0x109   : > { %1833 = vst [vmem:[%s2184_s23 + $0x10] sm:$0xff] %v1685_v27   ;;  %v1187_v32 = vadd.f32 %v1186_v28, %v632_v14  ;;  %v1320_v33 = vadd.f32 %v1319_v26, %v1257_v29  ;;  %v1929_v34 = vpop.f32.mrb[8].mxu0  ;;  %v1961_v35 = vpop.f32.mrb[8].mxu1 }
 0x10a   : > { %v639_v36 = vpop.f32.mrb[9].mxu0  ;;  %v2222_v38 = vadd.f32 %v1961_v35, %v2165_v40  ;;  %v767_v39 = vpop.f32.mrb[9].mxu1  ;;  %v648_v49 = vadd.f32 %v1929_v34, %v2165_v40  ;;  %1849 = vst [vmem:[%s2184_s23 + $0x90] sm:$0xff] %v1765_v37  }
 0x10b   : > { %v1321_v42 = vadd.f32 %v1320_v33, %v1258_v31  ;;  %v640_v43 = vadd.f32 %v2165_v40, %v639_v36  ;;  %v1188_v45 = vadd.f32 %v1187_v32, %v635_v15  ;;  %v1930_v46 = vpop.f32.mrb[10].mxu0  ;;  %v1962_v47 = vpop.f32.mrb[10].mxu1  ;;  %v2233_v61 = vadd.f32 %v2165_v40, %v767_v39 }
 0x10c   : > { %v651_v50 = vadd.f32 %v1930_v46, %v2165_v40  ;;  %v642_v51 = vpop.f32.mrb[11].mxu0  ;;  %v2229_v52 = vadd.f32 %v1962_v47, %v2165_v40  ;;  %v770_v54 = vpop.f32.mrb[11].mxu1  ;;  %v1262_v4 = vmul.f32 %v648_v49, %v648_v49 }
 0x10d   : > { %v1189_v55 = vadd.f32 %v1188_v45, %v640_v43  ;;  %v1260_v57 = vmul.f32 %v640_v43, %v640_v43  ;;  %v1322_v58 = vadd.f32 %v1321_v42, %v1259_v41  ;;  %v643_v59 = vadd.f32 %v2165_v40, %v642_v51 }
 0x10e   : > { %v1700_v60 = vpack.c.bf16 %v651_v50, %v648_v49  ;;  %v1780_v62 = vpack.c.bf16 %v2229_v52, %v2222_v38  ;;  %v2240_v3 = vadd.f32 %v2165_v40, %v770_v54  ;;  %v1263_v14 = vmul.f32 %v651_v50, %v651_v50 }
 0x10f   : > { %v1323_v63 = vadd.f32 %v1322_v58, %v1260_v57  ;;  %v1695_v0 = vpack.c.bf16 %v643_v59, %v640_v43  ;;  %v1190_v1 = vadd.f32 %v1189_v55, %v643_v59  ;;  %v1261_v2 = vmul.f32 %v643_v59, %v643_v59 }
 0x110   : > { %1836 = vst [vmem:[%s2184_s23 + $0x28] sm:$0xff] %v1700_v60   ;;  %1852 = vst [vmem:[%s2184_s23 + $0xa8] sm:$0xff] %v1780_v62   ;;  %v1775_v11 = vpack.c.bf16 %v2240_v3, %v2233_v61 }
 0x111   : > { %1835 = vst [vmem:[%s2184_s23 + $0x20] sm:$0xff] %v1695_v0   ;;  %v1191_v5 = vadd.f32 %v1190_v1, %v648_v49  ;;  %v1324_v7 = vadd.f32 %v1323_v63, %v1261_v2  ;;  %v1933_v8 = vpop.f32.mrb[12].mxu0  ;;  %v1965_v9 = vpop.f32.mrb[12].mxu1 }
 0x112   : > { %v655_v10 = vpop.f32.mrb[13].mxu0  ;;  %v2246_v12 = vadd.f32 %v1965_v9, %v2165_v40  ;;  %v783_v13 = vpop.f32.mrb[13].mxu1  ;;  %v664_v21 = vadd.f32 %v1933_v8, %v2165_v40  ;;  %1851 = vst [vmem:[%s2184_s23 + $0xa0] sm:$0xff] %v1775_v11  }
 0x113   : > { %v1325_v15 = vadd.f32 %v1324_v7, %v1262_v4  ;;  %v656_v16 = vadd.f32 %v2165_v40, %v655_v10  ;;  %v1192_v18 = vadd.f32 %v1191_v5, %v651_v50  ;;  %v1934_v19 = vpop.f32.mrb[14].mxu0  ;;  %v1966_v20 = vpop.f32.mrb[14].mxu1  ;;  %v2257_v33 = vadd.f32 %v2165_v40, %v783_v13 }
 0x114   : > { %v667_v22 = vadd.f32 %v1934_v19, %v2165_v40  ;;  %v658_v23 = vpop.f32.mrb[15].mxu0  ;;  %v2253_v25 = vadd.f32 %v1966_v20, %v2165_v40  ;;  %v786_v26 = vpop.f32.mrb[15].mxu1  ;;  %v1266_v42 = vmul.f32 %v664_v21, %v664_v21 }
 0x115   : > { %v1193_v27 = vadd.f32 %v1192_v18, %v656_v16  ;;  %v1264_v28 = vmul.f32 %v656_v16, %v656_v16  ;;  %v1326_v29 = vadd.f32 %v1325_v15, %v1263_v14  ;;  %v659_v31 = vadd.f32 %v2165_v40, %v658_v23 }
 0x116   : > { %v1710_v32 = vpack.c.bf16 %v667_v22, %v664_v21  ;;  %v1790_v34 = vpack.c.bf16 %v2253_v25, %v2246_v12  ;;  %v2264_v41 = vadd.f32 %v2165_v40, %v786_v26  ;;  %v1267_v55 = vmul.f32 %v667_v22, %v667_v22 }
 0x117   : > { %v1327_v35 = vadd.f32 %v1326_v29, %v1264_v28  ;;  %v1705_v36 = vpack.c.bf16 %v659_v31, %v656_v16  ;;  %v1194_v37 = vadd.f32 %v1193_v27, %v659_v31  ;;  %v1265_v39 = vmul.f32 %v659_v31, %v659_v31 }
 0x118   : > { %1838 = vst [vmem:[%s2184_s23 + $0x38] sm:$0xff] %v1710_v32   ;;  %1854 = vst [vmem:[%s2184_s23 + $0xb8] sm:$0xff] %v1790_v34   ;;  %v1785_v50 = vpack.c.bf16 %v2264_v41, %v2257_v33 }
 0x119   : > { %1837 = vst [vmem:[%s2184_s23 + $0x30] sm:$0xff] %v1705_v36   ;;  %v1195_v43 = vadd.f32 %v1194_v37, %v664_v21  ;;  %v1328_v45 = vadd.f32 %v1327_v35, %v1265_v39  ;;  %v1937_v46 = vpop.f32.mrb[16].mxu0  ;;  %v1969_v47 = vpop.f32.mrb[16].mxu1 }
 0x11a   : > { %v671_v49 = vpop.f32.mrb[17].mxu0  ;;  %v2270_v51 = vadd.f32 %v1969_v47, %v2165_v40  ;;  %v799_v54 = vpop.f32.mrb[17].mxu1  ;;  %v680_v63 = vadd.f32 %v1937_v46, %v2165_v40  ;;  %1853 = vst [vmem:[%s2184_s23 + $0xb0] sm:$0xff] %v1785_v50  }
 0x11b   : > { %v1329_v57 = vadd.f32 %v1328_v45, %v1266_v42  ;;  %v672_v58 = vadd.f32 %v2165_v40, %v671_v49  ;;  %v1196_v59 = vadd.f32 %v1195_v43, %v667_v22  ;;  %v1938_v60 = vpop.f32.mrb[18].mxu0  ;;  %v1970_v62 = vpop.f32.mrb[18].mxu1  ;;  %v2281_v11 = vadd.f32 %v2165_v40, %v799_v54 }
 0x11c   : > { %v683_v0 = vadd.f32 %v1938_v60, %v2165_v40  ;;  %v674_v1 = vpop.f32.mrb[19].mxu0  ;;  %v2277_v2 = vadd.f32 %v1970_v62, %v2165_v40  ;;  %v802_v4 = vpop.f32.mrb[19].mxu1  ;;  %v1270_v20 = vmul.f32 %v680_v63, %v680_v63 }
 0x11d   : > { %v1197_v5 = vadd.f32 %v1196_v59, %v672_v58  ;;  %v1268_v7 = vmul.f32 %v672_v58, %v672_v58  ;;  %v1330_v8 = vadd.f32 %v1329_v57, %v1267_v55  ;;  %v675_v9 = vadd.f32 %v2165_v40, %v674_v1 }
 0x11e   : > { %v1720_v10 = vpack.c.bf16 %v683_v0, %v680_v63  ;;  %v1800_v13 = vpack.c.bf16 %v2277_v2, %v2270_v51  ;;  %v2288_v19 = vadd.f32 %v2165_v40, %v802_v4  ;;  %v1271_v32 = vmul.f32 %v683_v0, %v683_v0 }
 0x11f   : > { %v1331_v14 = vadd.f32 %v1330_v8, %v1268_v7  ;;  %v1715_v15 = vpack.c.bf16 %v675_v9, %v672_v58  ;;  %v1198_v16 = vadd.f32 %v1197_v5, %v675_v9  ;;  %v1269_v18 = vmul.f32 %v675_v9, %v675_v9 }
 0x120   : > { %1840 = vst [vmem:[%s2184_s23 + $0x48] sm:$0xff] %v1720_v10   ;;  %1856 = vst [vmem:[%s2184_s23 + $0xc8] sm:$0xff] %v1800_v13   ;;  %v1795_v28 = vpack.c.bf16 %v2288_v19, %v2281_v11 }
 0x121   : > { %1839 = vst [vmem:[%s2184_s23 + $0x40] sm:$0xff] %v1715_v15   ;;  %v1199_v21 = vadd.f32 %v1198_v16, %v680_v63  ;;  %v1332_v22 = vadd.f32 %v1331_v14, %v1269_v18  ;;  %v1941_v23 = vpop.f32.mrb[20].mxu0  ;;  %v1973_v26 = vpop.f32.mrb[20].mxu1 }
 0x122   : > { %v687_v27 = vpop.f32.mrb[21].mxu0  ;;  %v2294_v29 = vadd.f32 %v1973_v26, %v2165_v40  ;;  %v815_v31 = vpop.f32.mrb[21].mxu1  ;;  %v696_v42 = vadd.f32 %v1941_v23, %v2165_v40  ;;  %1855 = vst [vmem:[%s2184_s23 + $0xc0] sm:$0xff] %v1795_v28  }
 0x123   : > { %v1333_v34 = vadd.f32 %v1332_v22, %v1270_v20  ;;  %v688_v35 = vadd.f32 %v2165_v40, %v687_v27  ;;  %v1200_v36 = vadd.f32 %v1199_v21, %v683_v0  ;;  %v1942_v37 = vpop.f32.mrb[22].mxu0  ;;  %v1974_v39 = vpop.f32.mrb[22].mxu1  ;;  %v2305_v58 = vadd.f32 %v2165_v40, %v815_v31 }
 0x124   : > { %v699_v43 = vadd.f32 %v1942_v37, %v2165_v40  ;;  %v690_v45 = vpop.f32.mrb[23].mxu0  ;;  %v2301_v46 = vadd.f32 %v1974_v39, %v2165_v40  ;;  %v818_v47 = vpop.f32.mrb[23].mxu1  ;;  %v1274_v4 = vmul.f32 %v696_v42, %v696_v42 }
 0x125   : > { %v1201_v49 = vadd.f32 %v1200_v36, %v688_v35  ;;  %v1272_v50 = vmul.f32 %v688_v35, %v688_v35  ;;  %v1334_v54 = vadd.f32 %v1333_v34, %v1271_v32  ;;  %v691_v55 = vadd.f32 %v2165_v40, %v690_v45 }
 0x126   : > { %v1730_v57 = vpack.c.bf16 %v699_v43, %v696_v42  ;;  %v1810_v59 = vpack.c.bf16 %v2301_v46, %v2294_v29  ;;  %v2312_v1 = vadd.f32 %v2165_v40, %v818_v47  ;;  %v1275_v16 = vmul.f32 %v699_v43, %v699_v43 }
 0x127   : > { %v1335_v60 = vadd.f32 %v1334_v54, %v1272_v50  ;;  %v1725_v62 = vpack.c.bf16 %v691_v55, %v688_v35  ;;  %v1202_v63 = vadd.f32 %v1201_v49, %v691_v55  ;;  %v1273_v0 = vmul.f32 %v691_v55, %v691_v55 }
 0x128   : > { %1842 = vst [vmem:[%s2184_s23 + $0x58] sm:$0xff] %v1730_v57   ;;  %1858 = vst [vmem:[%s2184_s23 + $0xd8] sm:$0xff] %v1810_v59   ;;  %v1805_v13 = vpack.c.bf16 %v2312_v1, %v2305_v58 }
 0x129   : > { %1841 = vst [vmem:[%s2184_s23 + $0x50] sm:$0xff] %v1725_v62   ;;  %v1203_v5 = vadd.f32 %v1202_v63, %v696_v42  ;;  %v1336_v7 = vadd.f32 %v1335_v60, %v1273_v0  ;;  %v1945_v8 = vpop.f32.mrb[24].mxu0  ;;  %v1977_v9 = vpop.f32.mrb[24].mxu1 }
 0x12a   : > { %v703_v10 = vpop.f32.mrb[25].mxu0  ;;  %v2318_v14 = vadd.f32 %v1977_v9, %v2165_v40  ;;  %v831_v15 = vpop.f32.mrb[25].mxu1  ;;  %v712_v26 = vadd.f32 %v1945_v8, %v2165_v40  ;;  %1857 = vst [vmem:[%s2184_s23 + $0xd0] sm:$0xff] %v1805_v13  }
 0x12b   : > { %v1337_v18 = vadd.f32 %v1336_v7, %v1274_v4  ;;  %v704_v20 = vadd.f32 %v2165_v40, %v703_v10  ;;  %v1204_v21 = vadd.f32 %v1203_v5, %v699_v43  ;;  %v1946_v22 = vpop.f32.mrb[26].mxu0  ;;  %v1978_v23 = vpop.f32.mrb[26].mxu1  ;;  %v2329_v42 = vadd.f32 %v2165_v40, %v831_v15 }
 0x12c   : > { %v715_v27 = vadd.f32 %v1946_v22, %v2165_v40  ;;  %v706_v28 = vpop.f32.mrb[27].mxu0  ;;  %v2325_v31 = vadd.f32 %v1978_v23, %v2165_v40  ;;  %v834_v32 = vpop.f32.mrb[27].mxu1  ;;  %v1278_v55 = vmul.f32 %v712_v26, %v712_v26 }
 0x12d   : > { %v1205_v34 = vadd.f32 %v1204_v21, %v704_v20  ;;  %v1276_v35 = vmul.f32 %v704_v20, %v704_v20  ;;  %v1338_v36 = vadd.f32 %v1337_v18, %v1275_v16  ;;  %v707_v37 = vadd.f32 %v2165_v40, %v706_v28 }
 0x12e   : > { %v1740_v39 = vpack.c.bf16 %v715_v27, %v712_v26  ;;  %v1820_v43 = vpack.c.bf16 %v2325_v31, %v2318_v14  ;;  %v2336_v54 = vadd.f32 %v2165_v40, %v834_v32  ;;  %v1279_v7 = vmul.f32 %v715_v27, %v715_v27 }
 0x12f   : > { %v1339_v45 = vadd.f32 %v1338_v36, %v1276_v35  ;;  %v1735_v47 = vpack.c.bf16 %v707_v37, %v704_v20  ;;  %v1206_v49 = vadd.f32 %v1205_v34, %v707_v37  ;;  %v1277_v50 = vmul.f32 %v707_v37, %v707_v37 }
 0x130   : > { %1844 = vst [vmem:[%s2184_s23 + $0x68] sm:$0xff] %v1740_v39   ;;  %1860 = vst [vmem:[%s2184_s23 + $0xe8] sm:$0xff] %v1820_v43   ;;  %v1815_v0 = vpack.c.bf16 %v2336_v54, %v2329_v42 }
 0x131   : > { %1843 = vst [vmem:[%s2184_s23 + $0x60] sm:$0xff] %v1735_v47   ;;  %v1207_v57 = vadd.f32 %v1206_v49, %v712_v26  ;;  %v1340_v59 = vadd.f32 %v1339_v45, %v1277_v50  ;;  %v1949_v60 = vpop.f32.mrb[28].mxu0  ;;  %v1981_v62 = vpop.f32.mrb[28].mxu1 }
 0x132   : > { %v719_v63 = vpop.f32.mrb[29].mxu0  ;;  %v2342_v4 = vadd.f32 %v1981_v62, %v2165_v40  ;;  %v847_v5 = vpop.f32.mrb[29].mxu1  ;;  %v728_v16 = vadd.f32 %v1949_v60, %v2165_v40  ;;  %1859 = vst [vmem:[%s2184_s23 + $0xe0] sm:$0xff] %v1815_v0   ;;  %v1284_v62 = vmul.f32 %v2172_v48, %v2172_v48 }
 0x133   : > { %v1341_v8 = vadd.f32 %v1340_v59, %v1278_v55  ;;  %v720_v9 = vadd.f32 %v2165_v40, %v719_v63  ;;  %v1208_v10 = vadd.f32 %v1207_v57, %v715_v27  ;;  %v1950_v13 = vpop.f32.mrb[30].mxu0  ;;  %v1982_v15 = vpop.f32.mrb[30].mxu1  ;;  %v2353_v34 = vadd.f32 %v2165_v40, %v847_v5 }
 0x134   : > { %v731_v18 = vadd.f32 %v1950_v13, %v2165_v40  ;;  %v722_v20 = vpop.f32.mrb[31].mxu0  ;;  %v2349_v21 = vadd.f32 %v1982_v15, %v2165_v40  ;;  %v850_v22 = vpop.f32.mrb[31].mxu1  ;;  %v1282_v47 = vmul.f32 %v728_v16, %v728_v16  ;;  %v1287_v13 = vmul.f32 %v2177_v53, %v2177_v53 }
 0x135   : > { %v1209_v23 = vadd.f32 %v1208_v10, %v720_v9  ;;  %v1280_v26 = vmul.f32 %v720_v9, %v720_v9  ;;  %v1342_v28 = vadd.f32 %v1341_v8, %v1279_v7  ;;  %v723_v27 = vadd.f32 %v2165_v40, %v722_v20 }
 0x136   : > { %v1750_v32 = vpack.c.bf16 %v731_v18, %v728_v16  ;;  %v1830_v35 = vpack.c.bf16 %v2349_v21, %v2342_v4  ;;  %v2360_v45 = vadd.f32 %v2165_v40, %v850_v22  ;;  %v1283_v57 = vmul.f32 %v731_v18, %v731_v18 }
 0x137   : > { %v1343_v36 = vadd.f32 %v1342_v28, %v1280_v26  ;;  %v1745_v37 = vpack.c.bf16 %v723_v27, %v720_v9  ;;  %v1210_v39 = vadd.f32 %v1209_v23, %v723_v27  ;;  %v1281_v43 = vmul.f32 %v723_v27, %v723_v27 }
 0x138   : > { %1846 = vst [vmem:[%s2184_s23 + $0x78] sm:$0xff] %v1750_v32   ;;  %1862 = vst [vmem:[%s2184_s23 + $0xf8] sm:$0xff] %v1830_v35   ;;  %v1825_v55 = vpack.c.bf16 %v2360_v45, %v2353_v34  ;;  %v1285_v7 = vmul.f32 %v2188_v56, %v2188_v56  ;;  %v1286_v8 = vmul.f32 %v2168_v44, %v2168_v44 }
 0x139   : > { %1845 = vst [vmem:[%s2184_s23 + $0x70] sm:$0xff] %v1745_v37   ;;  %v1211_v49 = vadd.f32 %v1210_v39, %v728_v16  ;;  %v1344_v50 = vadd.f32 %v1343_v36, %v1281_v43  ;;  %v1289_v23 = vmul.f32 %v2216_v30, %v2216_v30  ;;  %v1293_v39 = vmul.f32 %v2240_v3, %v2240_v3 }
 0x13a   : > { %1861 = vst [vmem:[%s2184_s23 + $0xf0] sm:$0xff] %v1825_v55  }
 0x13b   : > { %v1345_v59 = vadd.f32 %v1344_v50, %v1282_v47  ;;  %v1212_v60 = vadd.f32 %v1211_v49, %v731_v18 }
 0x13d   : > { %v1213_v63 = vadd.f32 %v1212_v60, %v2172_v48  ;;  %v1346_v0 = vadd.f32 %v1345_v59, %v1283_v57  ;;  %v1288_v48 = vmul.f32 %v2209_v24, %v2209_v24  ;;  %v1297_v60 = vmul.f32 %v2264_v41, %v2264_v41 }
 0x13f   : > { %v1347_v5 = vadd.f32 %v1346_v0, %v1284_v62  ;;  %v1214_v40 = vadd.f32 %v1213_v63, %v2188_v56 }
 0x141   : > { %v1215_v9 = vadd.f32 %v1214_v40, %v2168_v44  ;;  %v1348_v10 = vadd.f32 %v1347_v5, %v1285_v7  ;;  %v1290_v44 = vmul.f32 %v2199_v6, %v2199_v6 }
 0x143   : > { %v1349_v15 = vadd.f32 %v1348_v10, %v1286_v8  ;;  %v1216_v16 = vadd.f32 %v1215_v9, %v2177_v53  ;;  %v1291_v53 = vmul.f32 %v2205_v17, %v2205_v17  ;;  %v1301_v9 = vmul.f32 %v2288_v19, %v2288_v19 }
 0x145   : > { %v1217_v18 = vadd.f32 %v1216_v16, %v2209_v24  ;;  %v1350_v20 = vadd.f32 %v1349_v15, %v1287_v13  ;;  %v1292_v24 = vmul.f32 %v2233_v61, %v2233_v61 }
 0x147   : > { %v1351_v22 = vadd.f32 %v1350_v20, %v1288_v48  ;;  %v1218_v56 = vadd.f32 %v1217_v18, %v2216_v30 }
 0x149   : > { %v1219_v26 = vadd.f32 %v1218_v56, %v2199_v6  ;;  %v1352_v28 = vadd.f32 %v1351_v22, %v1289_v23  ;;  %v1294_v6 = vmul.f32 %v2222_v38, %v2222_v38  ;;  %v1305_v22 = vmul.f32 %v2312_v1, %v2312_v1 }
 0x14b   : > { %v1353_v27 = vadd.f32 %v1352_v28, %v1290_v44  ;;  %v1220_v32 = vadd.f32 %v1219_v26, %v2205_v17  ;;  %v1295_v17 = vmul.f32 %v2229_v52, %v2229_v52 }
 0x14d   : > { %v1221_v35 = vadd.f32 %v1220_v32, %v2233_v61  ;;  %v1354_v36 = vadd.f32 %v1353_v27, %v1291_v53  ;;  %v1296_v61 = vmul.f32 %v2257_v33, %v2257_v33  ;;  %v1309_v32 = vmul.f32 %v2336_v54, %v2336_v54 }
 0x14f   : > { %v1355_v37 = vadd.f32 %v1354_v36, %v1292_v24  ;;  %v1222_v30 = vadd.f32 %v1221_v35, %v2240_v3 }
 0x151   : > { %v1223_v43 = vadd.f32 %v1222_v30, %v2222_v38  ;;  %v1356_v47 = vadd.f32 %v1355_v37, %v1293_v39  ;;  %v1298_v38 = vmul.f32 %v2246_v12, %v2246_v12  ;;  %v1312_v37 = vmul.f32 %v2353_v34, %v2353_v34 }
 0x153   : > { %v1357_v49 = vadd.f32 %v1356_v47, %v1294_v6  ;;  %v1224_v50 = vadd.f32 %v1223_v43, %v2229_v52  ;;  %v1299_v52 = vmul.f32 %v2253_v25, %v2253_v25  ;;  %v1314_v43 = vmul.f32 %v2342_v4, %v2342_v4 }
 0x155   : > { %v1225_v55 = vadd.f32 %v1224_v50, %v2257_v33  ;;  %v1358_v57 = vadd.f32 %v1357_v49, %v1295_v17  ;;  %v1300_v33 = vmul.f32 %v2281_v11, %v2281_v11 }
 0x157   : > { %v1359_v59 = vadd.f32 %v1358_v57, %v1296_v61  ;;  %v1226_v3 = vadd.f32 %v1225_v55, %v2264_v41 }
 0x159   : > { %v1227_v62 = vadd.f32 %v1226_v3, %v2246_v12  ;;  %v1360_v63 = vadd.f32 %v1359_v59, %v1297_v60  ;;  %v1302_v12 = vmul.f32 %v2270_v51, %v2270_v51 }
 0x15b   : > { %v1361_v0 = vadd.f32 %v1360_v63, %v1298_v38  ;;  %v1228_v5 = vadd.f32 %v1227_v62, %v2253_v25  ;;  %v1303_v25 = vmul.f32 %v2277_v2, %v2277_v2 }
 0x15d   : > { %v1229_v40 = vadd.f32 %v1228_v5, %v2281_v11  ;;  %v1362_v7 = vadd.f32 %v1361_v0, %v1299_v52  ;;  %v1304_v11 = vmul.f32 %v2305_v58, %v2305_v58 }
 0x15f   : > { %v1363_v8 = vadd.f32 %v1362_v7, %v1300_v33  ;;  %v1230_v41 = vadd.f32 %v1229_v40, %v2288_v19 }
 0x161   : > { %v1231_v10 = vadd.f32 %v1230_v41, %v2270_v51  ;;  %v1364_v13 = vadd.f32 %v1363_v8, %v1301_v9  ;;  %v1306_v51 = vmul.f32 %v2294_v29, %v2294_v29 }
 0x163   : > { %v1365_v15 = vadd.f32 %v1364_v13, %v1302_v12  ;;  %v1232_v16 = vadd.f32 %v1231_v10, %v2277_v2  ;;  %v1307_v2 = vmul.f32 %v2301_v46, %v2301_v46 }
 0x165   : > { %v1233_v48 = vadd.f32 %v1232_v16, %v2305_v58  ;;  %v1366_v18 = vadd.f32 %v1365_v15, %v1303_v25  ;;  %v1308_v58 = vmul.f32 %v2329_v42, %v2329_v42 }
 0x167   : > { %v1367_v20 = vadd.f32 %v1366_v18, %v1304_v11  ;;  %v1234_v19 = vadd.f32 %v1233_v48, %v2312_v1 }
 0x169   : > { %v1235_v56 = vadd.f32 %v1234_v19, %v2294_v29  ;;  %v1368_v23 = vadd.f32 %v1367_v20, %v1305_v22  ;;  %v1310_v29 = vmul.f32 %v2318_v14, %v2318_v14 }
 0x16b   : > { %v1369_v44 = vadd.f32 %v1368_v23, %v1306_v51  ;;  %v1236_v26 = vadd.f32 %v1235_v56, %v2301_v46  ;;  %v1311_v46 = vmul.f32 %v2325_v31, %v2325_v31 }
 0x16d   : > { %v1237_v28 = vadd.f32 %v1236_v26, %v2329_v42  ;;  %v1370_v53 = vadd.f32 %v1369_v44, %v1307_v2 }
 0x16f   : > { %v1371_v27 = vadd.f32 %v1370_v53, %v1308_v58  ;;  %v1238_v1 = vadd.f32 %v1237_v28, %v2336_v54 }
 0x171   : > { %v1239_v24 = vadd.f32 %v1238_v1, %v2318_v14  ;;  %v1372_v35 = vadd.f32 %v1371_v27, %v1309_v32  ;;  %v1313_v14 = vmul.f32 %v2360_v45, %v2360_v45 }
 0x173   : > { %v1373_v36 = vadd.f32 %v1372_v35, %v1310_v29  ;;  %v1240_v42 = vadd.f32 %v1239_v24, %v2325_v31  ;;  %v1315_v31 = vmul.f32 %v2349_v21, %v2349_v21 }
 0x175   : > { %v1241_v30 = vadd.f32 %v1240_v42, %v2353_v34  ;;  %v1374_v39 = vadd.f32 %v1373_v36, %v1311_v46 }
 0x177   : > { %v1375_v54 = vadd.f32 %v1374_v39, %v1312_v37  ;;  %v1242_v6 = vadd.f32 %v1241_v30, %v2360_v45 }
 0x179   : > { %v1243_v47 = vadd.f32 %v1242_v6, %v2342_v4  ;;  %v1376_v17 = vadd.f32 %v1375_v54, %v1313_v14 }
 0x17b   : > { %v1244_v49 = vadd.f32 %v1243_v47, %v2349_v21  ;;  %v1377_v34 = vadd.f32 %v1376_v17, %v1314_v43 }
 0x17d   : > { %v1245_v50 = vrot.slane %v1244_v49, 4  ;;  %v1378_v61 = vadd.f32 %v1377_v34, %v1315_v31 }
 0x17f   : > { %v1246_v55 = vadd.f32 %v1245_v50, %v1244_v49  ;;  %v1379_v57 = vrot.slane %v1378_v61, 4 }
 0x181   : > { %v1247_v59 = vrot.slane %v1246_v55, 2  ;;  %v1380_v3 = vadd.f32 %v1379_v57, %v1378_v61 }
 0x183   : > { %v1248_v45 = vadd.f32 %v1247_v59, %v1246_v55  ;;  %v1381_v60 = vrot.slane %v1380_v3, 2 }
 0x185   : > { %v1249_v38 = vrot.slane %v1248_v45, 1  ;;  %v1382_v62 = vadd.f32 %v1381_v60, %v1380_v3 }
 0x187   : > { %v1250_v4 = vadd.f32 %v1249_v38, %v1248_v45  ;;  %v1383_v63 = vrot.slane %v1382_v62, 1 }
 0x189   : > { %1251 = vst [vmem:[%s241_s25] sm:$0x1] %v1250_v4  ;;  %v1384_v21 = vadd.f32 %v1383_v63, %v1382_v62 }
 0x18b   : > { %1385 = vst [vmem:[%s244_s28] sm:$0x1] %v1384_v21 }
 0x18c PF: > { %s16_s18 = sadd.s32 1, %s2053_s18  }
 0x18d   : > { %p13_p5 = scmp.ge.s32.totalorder %s16_s18, 6  }
 0x18f   :  { %15 = sbr.rel (!%p13_p5) target bundleno = 1 (0x1), region = 86 }

// kernel: discriminator_forward.8
= control target key start
LH: loop header
LB: loop body
LE: loop exit
PB: predicated region body
PF: predicated region fallthrough
CT: control target
= control target key end

     0   :  { %s1539_s12 = smov 0   ;;  %s1770_s0 = inlined_call_operand.vmem [shape: bf16[2048,128], index: 0, kind: input, shape index: {}]   ;;  %s1771_s1 = inlined_call_operand.vmem [shape: f32[1,128], index: 1, kind: input, shape index: {}]   ;;  %s1772_s2 = inlined_call_operand.vmem [shape: f32[1,128], index: 2, kind: input, shape index: {}]   ;;  %s1773_s3 = inlined_call_operand.vmem [shape: bf16[2048,128], index: 3, kind: output, shape index: {}]  }
   0x1 LB: > { %s1012_s13 = sadd.s32 4294967295, %s1517_s12   ;;  %p1016_p0 = scmp.ge.s32.totalorder %s1517_s12, 1  ;;  %s1517_s12 = sphi %s1539_s12, %s13_s12  }
   0x2   : > { %p138_p1 = scmp.lt.s32.totalorder %s1517_s12, 5 }
   0x4   : > { %p139_p2 = pnand %p1016_p0, %p138_p1 }
   0x5   : > { %s1017_s14 = sshll.u32 (!%p139_p2), %s1012_s13, 6  ;;  %v1560_v0 = vld [vmem:[%s1771_s1] ss:$0 sm:$0xff] (!%p139_p2) }
   0x6   : > { %142 = sbr.rel (%p139_p2) target bundleno = 129 (0x81), region = 32  ;;  %p163_p3 = scmp.lt.s32.totalorder (!%p139_p2), %s1017_s14, 255  ;;  %v1569_v9 = vld [vmem:[%s1772_s2] ss:$0 sm:$0xff] (!%p139_p2) }
   0xd   : > { %s1775_s14 = smov (!%p163_p3, %s1017_s14), 255 }
   0xe   : > { %s1018_s15 = sshll.u32 %s1775_s14, 2 }
   0xf   : > { %s1555_s18 = scalar_lea.vmem %s1770_s0, %s1018_s15  ;;  %s1592_s25 = scalar_lea.vmem %s1773_s3, %s1018_s15 }
  0x10   : > { %v1154_v1 = vld [vmem:[%s1555_s18] sm:$0xff]   ;;  %v1441_v2 = vld [vmem:[%s1555_s18 + $0x8] sm:$0xff]   ;;  %v1442_v3 = vld [vmem:[%s1555_s18 + $0x10] sm:$0xff]  }
  0x11   : > { %v1155_v4 = vunpack.c.l.bf16 %v1154_v1  ;;  %v1156_v5 = vunpack.c.h.bf16 %v1154_v1  ;;  %v1159_v6 = vunpack.c.l.bf16 %v1441_v2  ;;  %v1160_v7 = vunpack.c.h.bf16 %v1441_v2  ;;  %v1443_v8 = vld [vmem:[%s1555_s18 + $0x18] sm:$0xff]   ;;  %v1444_v36 = vld [vmem:[%s1555_s18 + $0x20] sm:$0xff]   ;;  %v1445_v41 = vld [vmem:[%s1555_s18 + $0x28] sm:$0xff]  }
  0x12   : > { %v1163_v10 = vunpack.c.l.bf16 %v1442_v3  ;;  %v1164_v11 = vunpack.c.h.bf16 %v1442_v3  ;;  %v1167_v12 = vunpack.c.l.bf16 %v1443_v8  ;;  %v1168_v13 = vunpack.c.h.bf16 %v1443_v8  ;;  %v1446_v52 = vld [vmem:[%s1555_s18 + $0x30] sm:$0xff]   ;;  %v1447_v53 = vld [vmem:[%s1555_s18 + $0x38] sm:$0xff]  }
  0x13   : > { %v309_v14 = vmul.f32 %v1155_v4, %v1560_v0  ;;  %v310_v15 = vmul.f32 %v1156_v5, %v1560_v0  ;;  %v311_v16 = vmul.f32 %v1159_v6, %v1560_v0  ;;  %v312_v17 = vmul.f32 %v1160_v7, %v1560_v0 }
  0x14   : > { %v313_v18 = vmul.f32 %v1163_v10, %v1560_v0  ;;  %v314_v19 = vmul.f32 %v1164_v11, %v1560_v0  ;;  %v315_v20 = vmul.f32 %v1167_v12, %v1560_v0  ;;  %v316_v21 = vmul.f32 %v1168_v13, %v1560_v0 }
  0x15   : > { %v380_v22 = vadd.f32 %v1569_v9, %v309_v14  ;;  %v381_v23 = vadd.f32 %v1569_v9, %v310_v15  ;;  %v382_v24 = vadd.f32 %v1569_v9, %v311_v16  ;;  %v383_v25 = vadd.f32 %v1569_v9, %v312_v17 }
  0x16   : > { %v384_v26 = vadd.f32 %v1569_v9, %v313_v18  ;;  %v385_v27 = vadd.f32 %v1569_v9, %v314_v19  ;;  %v386_v28 = vadd.f32 %v1569_v9, %v315_v20  ;;  %v387_v29 = vadd.f32 %v1569_v9, %v316_v21  ;;  %v1448_v20 = vld [vmem:[%s1555_s18 + $0x40] sm:$0xff]  }
  0x17   : > { %vm444_vm0 = vcmp.ge.f32.partialorder %v380_v22, 0.0  ;;  %vm445_vm1 = vcmp.ge.f32.partialorder %v381_v23, 0.0  ;;  %v508_v30 = vmul.f32 0.2, %v380_v22  ;;  %v509_v31 = vmul.f32 0.2, %v381_v23 }
  0x18   : > { %vm446_vm2 = vcmp.ge.f32.partialorder %v382_v24, 0.0  ;;  %vm447_vm3 = vcmp.ge.f32.partialorder %v383_v25, 0.0  ;;  %v510_v32 = vmul.f32 0.2, %v382_v24  ;;  %v511_v33 = vmul.f32 0.2, %v383_v25 }
  0x19   : > { %v572_v34 = vsel %vm444_vm0, %v380_v22, %v508_v30  ;;  %v573_v35 = vsel %vm445_vm1, %v381_v23, %v509_v31  ;;  %vm448_vm4 = vcmp.ge.f32.partialorder %v384_v26, 0.0  ;;  %vm449_vm5 = vcmp.ge.f32.partialorder %v385_v27, 0.0 }
  0x1a   : > { %v1284_v37 = vpack.c.bf16 %v573_v35, %v572_v34  ;;  %v574_v38 = vsel %vm446_vm2, %v382_v24, %v510_v32  ;;  %v575_v39 = vsel %vm447_vm3, %v383_v25, %v511_v33  ;;  %v512_v40 = vmul.f32 0.2, %v384_v26  ;;  %v1449_v24 = vld [vmem:[%s1555_s18 + $0x48] sm:$0xff]  }
  0x1b   : > { %v1289_v42 = vpack.c.bf16 %v575_v39, %v574_v38  ;;  %v513_v43 = vmul.f32 0.2, %v385_v27  ;;  %vm450_vm6 = vcmp.ge.f32.partialorder %v386_v28, 0.0  ;;  %vm451_vm7 = vcmp.ge.f32.partialorder %v387_v29, 0.0 }
  0x1c   : > { %1285 = vst [vmem:[%s1592_s25] sm:$0xff] %v1284_v37   ;;  %v576_v44 = vsel %vm448_vm4, %v384_v26, %v512_v40  ;;  %v514_v45 = vmul.f32 0.2, %v386_v28  ;;  %v515_v46 = vmul.f32 0.2, %v387_v29  ;;  %v1171_v47 = vunpack.c.l.bf16 %v1444_v36 }
  0x1d   : > { %1472 = vst [vmem:[%s1592_s25 + $0x8] sm:$0xff] %v1289_v42   ;;  %v577_v48 = vsel %vm449_vm5, %v385_v27, %v513_v43  ;;  %v1172_v49 = vunpack.c.h.bf16 %v1444_v36  ;;  %v1175_v50 = vunpack.c.l.bf16 %v1445_v41  ;;  %v1176_v51 = vunpack.c.h.bf16 %v1445_v41  ;;  %v1450_v36 = vld [vmem:[%s1555_s18 + $0x50] sm:$0xff]  }
  0x1e   : > { %v1294_v54 = vpack.c.bf16 %v577_v48, %v576_v44  ;;  %v578_v55 = vsel %vm450_vm6, %v386_v28, %v514_v45  ;;  %v579_v56 = vsel %vm451_vm7, %v387_v29, %v515_v46  ;;  %v317_v57 = vmul.f32 %v1171_v47, %v1560_v0 }
  0x1f   : > { %v1299_v58 = vpack.c.bf16 %v579_v56, %v578_v55  ;;  %v318_v59 = vmul.f32 %v1172_v49, %v1560_v0  ;;  %v319_v60 = vmul.f32 %v1175_v50, %v1560_v0  ;;  %v320_v61 = vmul.f32 %v1176_v51, %v1560_v0  ;;  %v1451_v55 = vld [vmem:[%s1555_s18 + $0x58] sm:$0xff]  }
  0x20   : > { %1473 = vst [vmem:[%s1592_s25 + $0x10] sm:$0xff] %v1294_v54   ;;  %v388_v62 = vadd.f32 %v1569_v9, %v317_v57  ;;  %v1179_v63 = vunpack.c.l.bf16 %v1446_v52  ;;  %v1180_v1 = vunpack.c.h.bf16 %v1446_v52  ;;  %v1183_v2 = vunpack.c.l.bf16 %v1447_v53 }
  0x21   : > { %1474 = vst [vmem:[%s1592_s25 + $0x18] sm:$0xff] %v1299_v58   ;;  %v389_v3 = vadd.f32 %v1569_v9, %v318_v59  ;;  %v390_v4 = vadd.f32 %v1569_v9, %v319_v60  ;;  %v391_v5 = vadd.f32 %v1569_v9, %v320_v61  ;;  %v1184_v6 = vunpack.c.h.bf16 %v1447_v53 }
  0x22   : > { %vm452_vm8 = vcmp.ge.f32.partialorder %v388_v62, 0.0  ;;  %v516_v7 = vmul.f32 0.2, %v388_v62  ;;  %v321_v8 = vmul.f32 %v1179_v63, %v1560_v0  ;;  %v322_v10 = vmul.f32 %v1180_v1, %v1560_v0  ;;  %v1452_v1 = vld [vmem:[%s1555_s18 + $0x60] sm:$0xff]  }
  0x23   : > { %vm453_vm9 = vcmp.ge.f32.partialorder %v389_v3, 0.0  ;;  %v517_v11 = vmul.f32 0.2, %v389_v3  ;;  %vm454_vm10 = vcmp.ge.f32.partialorder %v390_v4, 0.0  ;;  %vm455_vm11 = vcmp.ge.f32.partialorder %v391_v5, 0.0 }
  0x24   : > { %v580_v12 = vsel %vm452_vm8, %v388_v62, %v516_v7  ;;  %v518_v13 = vmul.f32 0.2, %v390_v4  ;;  %v519_v14 = vmul.f32 0.2, %v391_v5  ;;  %v392_v15 = vadd.f32 %v1569_v9, %v321_v8 }
  0x25   : > { %v581_v16 = vsel %vm453_vm9, %v389_v3, %v517_v11  ;;  %v393_v17 = vadd.f32 %v1569_v9, %v322_v10  ;;  %v323_v18 = vmul.f32 %v1183_v2, %v1560_v0  ;;  %v324_v19 = vmul.f32 %v1184_v6, %v1560_v0  ;;  %v1453_v6 = vld [vmem:[%s1555_s18 + $0x68] sm:$0xff]  }
  0x26   : > { %v1304_v21 = vpack.c.bf16 %v581_v16, %v580_v12  ;;  %v582_v22 = vsel %vm454_vm10, %v390_v4, %v518_v13  ;;  %v583_v23 = vsel %vm455_vm11, %v391_v5, %v519_v14  ;;  %vm456_vm12 = vcmp.ge.f32.partialorder %v392_v15, 0.0 }
  0x27   : > { %v1309_v25 = vpack.c.bf16 %v583_v23, %v582_v22  ;;  %vm457_vm13 = vcmp.ge.f32.partialorder %v393_v17, 0.0  ;;  %v520_v26 = vmul.f32 0.2, %v392_v15  ;;  %v521_v27 = vmul.f32 0.2, %v393_v17  ;;  %v1454_v22 = vld [vmem:[%s1555_s18 + $0x70] sm:$0xff]  }
  0x28   : > { %1475 = vst [vmem:[%s1592_s25 + $0x20] sm:$0xff] %v1304_v21   ;;  %v394_v28 = vadd.f32 %v1569_v9, %v323_v18  ;;  %v395_v29 = vadd.f32 %v1569_v9, %v324_v19  ;;  %v1187_v30 = vunpack.c.l.bf16 %v1448_v20  ;;  %v1188_v31 = vunpack.c.h.bf16 %v1448_v20 }
  0x29   : > { %1476 = vst [vmem:[%s1592_s25 + $0x28] sm:$0xff] %v1309_v25   ;;  %v584_v32 = vsel %vm456_vm12, %v392_v15, %v520_v26  ;;  %v585_v33 = vsel %vm457_vm13, %v393_v17, %v521_v27  ;;  %v1191_v34 = vunpack.c.l.bf16 %v1449_v24  ;;  %v1192_v35 = vunpack.c.h.bf16 %v1449_v24 }
  0x2a   : > { %v1314_v37 = vpack.c.bf16 %v585_v33, %v584_v32  ;;  %vm458_vm14 = vcmp.ge.f32.partialorder %v394_v28, 0.0  ;;  %vm459_vm15 = vcmp.ge.f32.partialorder %v395_v29, 0.0  ;;  %v522_v38 = vmul.f32 0.2, %v394_v28 }
  0x2b   : > { %v523_v39 = vmul.f32 0.2, %v395_v29  ;;  %v325_v40 = vmul.f32 %v1187_v30, %v1560_v0  ;;  %v326_v41 = vmul.f32 %v1188_v31, %v1560_v0  ;;  %v327_v42 = vmul.f32 %v1191_v34, %v1560_v0 }
  0x2c   : > { %1477 = vst [vmem:[%s1592_s25 + $0x30] sm:$0xff] %v1314_v37   ;;  %v586_v43 = vsel %vm458_vm14, %v394_v28, %v522_v38  ;;  %v328_v44 = vmul.f32 %v1192_v35, %v1560_v0  ;;  %v1195_v45 = vunpack.c.l.bf16 %v1450_v36  ;;  %v1196_v46 = vunpack.c.h.bf16 %v1450_v36 }
  0x2d   : > { %v587_v47 = vsel %vm459_vm15, %v395_v29, %v523_v39  ;;  %v396_v48 = vadd.f32 %v1569_v9, %v325_v40  ;;  %v397_v49 = vadd.f32 %v1569_v9, %v326_v41  ;;  %v398_v50 = vadd.f32 %v1569_v9, %v327_v42  ;;  %v1455_v41 = vld [vmem:[%s1555_s18 + $0x78] sm:$0xff]  }
  0x2e   : > { %v1319_v51 = vpack.c.bf16 %v587_v47, %v586_v43  ;;  %v399_v52 = vadd.f32 %v1569_v9, %v328_v44  ;;  %v329_v53 = vmul.f32 %v1195_v45, %v1560_v0  ;;  %v330_v54 = vmul.f32 %v1196_v46, %v1560_v0  ;;  %v1456_v46 = vld [vmem:[%s1555_s18 + $0x80] sm:$0xff]   ;;  %v1457_v47 = vld [vmem:[%s1555_s18 + $0x88] sm:$0xff]  }
  0x2f   : > { %vm460_vm0 = vcmp.ge.f32.partialorder %v396_v48, 0.0  ;;  %vm461_vm1 = vcmp.ge.f32.partialorder %v397_v49, 0.0  ;;  %v524_v56 = vmul.f32 0.2, %v396_v48  ;;  %v525_v57 = vmul.f32 0.2, %v397_v49 }
  0x30   : > { %1478 = vst [vmem:[%s1592_s25 + $0x38] sm:$0xff] %v1319_v51   ;;  %vm462_vm2 = vcmp.ge.f32.partialorder %v398_v50, 0.0  ;;  %vm463_vm3 = vcmp.ge.f32.partialorder %v399_v52, 0.0  ;;  %v526_v58 = vmul.f32 0.2, %v398_v50  ;;  %v400_v62 = vadd.f32 %v1569_v9, %v329_v53 }
  0x31   : > { %v527_v59 = vmul.f32 0.2, %v399_v52  ;;  %v588_v60 = vsel %vm460_vm0, %v396_v48, %v524_v56  ;;  %v589_v61 = vsel %vm461_vm1, %v397_v49, %v525_v57  ;;  %v401_v63 = vadd.f32 %v1569_v9, %v330_v54 }
  0x32   : > { %v1324_v2 = vpack.c.bf16 %v589_v61, %v588_v60  ;;  %v590_v3 = vsel %vm462_vm2, %v398_v50, %v526_v58  ;;  %v1199_v5 = vunpack.c.l.bf16 %v1451_v55  ;;  %vm464_vm4 = vcmp.ge.f32.partialorder %v400_v62, 0.0 }
  0x33   : > { %v591_v4 = vsel %vm463_vm3, %v399_v52, %v527_v59  ;;  %vm465_vm5 = vcmp.ge.f32.partialorder %v401_v63, 0.0  ;;  %v528_v8 = vmul.f32 0.2, %v400_v62  ;;  %v529_v10 = vmul.f32 0.2, %v401_v63 }
  0x34   : > { %v1329_v7 = vpack.c.bf16 %v591_v4, %v590_v3  ;;  %1479 = vst [vmem:[%s1592_s25 + $0x40] sm:$0xff] %v1324_v2   ;;  %v1200_v11 = vunpack.c.h.bf16 %v1451_v55  ;;  %v331_v12 = vmul.f32 %v1199_v5, %v1560_v0  ;;  %v1203_v13 = vunpack.c.l.bf16 %v1452_v1 }
  0x35   : > { %v592_v14 = vsel %vm464_vm4, %v400_v62, %v528_v8  ;;  %v1204_v15 = vunpack.c.h.bf16 %v1452_v1  ;;  %v1207_v16 = vunpack.c.l.bf16 %v1453_v6  ;;  %v1208_v17 = vunpack.c.h.bf16 %v1453_v6 }
  0x36   : > { %1480 = vst [vmem:[%s1592_s25 + $0x48] sm:$0xff] %v1329_v7   ;;  %v593_v18 = vsel %vm465_vm5, %v401_v63, %v529_v10  ;;  %v332_v19 = vmul.f32 %v1200_v11, %v1560_v0  ;;  %v402_v20 = vadd.f32 %v1569_v9, %v331_v12  ;;  %v333_v21 = vmul.f32 %v1203_v13, %v1560_v0 }
  0x37   : > { %v1334_v23 = vpack.c.bf16 %v593_v18, %v592_v14  ;;  %v334_v24 = vmul.f32 %v1204_v15, %v1560_v0  ;;  %v335_v25 = vmul.f32 %v1207_v16, %v1560_v0  ;;  %v336_v26 = vmul.f32 %v1208_v17, %v1560_v0  ;;  %v1458_v14 = vld [vmem:[%s1555_s18 + $0x90] sm:$0xff]  }
  0x38   : > { %v403_v27 = vadd.f32 %v1569_v9, %v332_v19  ;;  %vm466_vm6 = vcmp.ge.f32.partialorder %v402_v20, 0.0  ;;  %v530_v28 = vmul.f32 0.2, %v402_v20  ;;  %v404_v29 = vadd.f32 %v1569_v9, %v333_v21 }
  0x39   : > { %1481 = vst [vmem:[%s1592_s25 + $0x50] sm:$0xff] %v1334_v23   ;;  %v405_v30 = vadd.f32 %v1569_v9, %v334_v24  ;;  %v406_v31 = vadd.f32 %v1569_v9, %v335_v25  ;;  %v407_v32 = vadd.f32 %v1569_v9, %v336_v26  ;;  %v1211_v33 = vunpack.c.l.bf16 %v1454_v22  ;;  %v1459_v25 = vld [vmem:[%s1555_s18 + $0x98] sm:$0xff]  }
  0x3a   : > { %vm467_vm7 = vcmp.ge.f32.partialorder %v403_v27, 0.0  ;;  %v531_v34 = vmul.f32 0.2, %v403_v27  ;;  %v594_v35 = vsel %vm466_vm6, %v402_v20, %v530_v28  ;;  %vm468_vm8 = vcmp.ge.f32.partialorder %v404_v29, 0.0 }
  0x3b   : > { %vm469_vm9 = vcmp.ge.f32.partialorder %v405_v30, 0.0  ;;  %v532_v36 = vmul.f32 0.2, %v404_v29  ;;  %v533_v37 = vmul.f32 0.2, %v405_v30  ;;  %vm470_vm10 = vcmp.ge.f32.partialorder %v406_v31, 0.0 }
  0x3c   : > { %v595_v38 = vsel %vm467_vm7, %v403_v27, %v531_v34  ;;  %vm471_vm11 = vcmp.ge.f32.partialorder %v407_v32, 0.0  ;;  %v534_v39 = vmul.f32 0.2, %v406_v31  ;;  %v535_v40 = vmul.f32 0.2, %v407_v32 }
  0x3d   : > { %v1339_v42 = vpack.c.bf16 %v595_v38, %v594_v35  ;;  %v596_v43 = vsel %vm468_vm8, %v404_v29, %v532_v36  ;;  %v597_v44 = vsel %vm469_vm9, %v405_v30, %v533_v37  ;;  %v1212_v45 = vunpack.c.h.bf16 %v1454_v22  ;;  %v1460_v30 = vld [vmem:[%s1555_s18 + $0xa0] sm:$0xff]  }
  0x3e   : > { %v1344_v48 = vpack.c.bf16 %v597_v44, %v596_v43  ;;  %v598_v49 = vsel %vm470_vm10, %v406_v31, %v534_v39  ;;  %v599_v50 = vsel %vm471_vm11, %v407_v32, %v535_v40  ;;  %v337_v51 = vmul.f32 %v1211_v33, %v1560_v0 }
  0x3f   : > { %1482 = vst [vmem:[%s1592_s25 + $0x58] sm:$0xff] %v1339_v42   ;;  %v1349_v52 = vpack.c.bf16 %v599_v50, %v598_v49  ;;  %v338_v53 = vmul.f32 %v1212_v45, %v1560_v0  ;;  %v1215_v54 = vunpack.c.l.bf16 %v1455_v41  ;;  %v1216_v55 = vunpack.c.h.bf16 %v1455_v41  ;;  %v1461_v45 = vld [vmem:[%s1555_s18 + $0xa8] sm:$0xff]  }
  0x40   : > { %1483 = vst [vmem:[%s1592_s25 + $0x60] sm:$0xff] %v1344_v48   ;;  %v408_v56 = vadd.f32 %v1569_v9, %v337_v51  ;;  %v1219_v57 = vunpack.c.l.bf16 %v1456_v46  ;;  %v1220_v58 = vunpack.c.h.bf16 %v1456_v46  ;;  %v1223_v59 = vunpack.c.l.bf16 %v1457_v47 }
  0x41   : > { %1484 = vst [vmem:[%s1592_s25 + $0x68] sm:$0xff] %v1349_v52   ;;  %v409_v60 = vadd.f32 %v1569_v9, %v338_v53  ;;  %v339_v61 = vmul.f32 %v1215_v54, %v1560_v0  ;;  %v340_v62 = vmul.f32 %v1216_v55, %v1560_v0  ;;  %v1224_v63 = vunpack.c.h.bf16 %v1457_v47 }
  0x42   : > { %vm472_vm12 = vcmp.ge.f32.partialorder %v408_v56, 0.0  ;;  %v536_v1 = vmul.f32 0.2, %v408_v56  ;;  %v341_v2 = vmul.f32 %v1219_v57, %v1560_v0  ;;  %v342_v3 = vmul.f32 %v1220_v58, %v1560_v0 }
  0x43   : > { %vm473_vm13 = vcmp.ge.f32.partialorder %v409_v60, 0.0  ;;  %v537_v4 = vmul.f32 0.2, %v409_v60  ;;  %v410_v5 = vadd.f32 %v1569_v9, %v339_v61  ;;  %v411_v6 = vadd.f32 %v1569_v9, %v340_v62  ;;  %v1462_v62 = vld [vmem:[%s1555_s18 + $0xb0] sm:$0xff]  }
  0x44   : > { %v600_v7 = vsel %vm472_vm12, %v408_v56, %v536_v1  ;;  %v412_v8 = vadd.f32 %v1569_v9, %v341_v2  ;;  %v413_v10 = vadd.f32 %v1569_v9, %v342_v3  ;;  %v343_v11 = vmul.f32 %v1223_v59, %v1560_v0  ;;  %v1463_v3 = vld [vmem:[%s1555_s18 + $0xb8] sm:$0xff]  }
  0x45   : > { %v601_v12 = vsel %vm473_vm13, %v409_v60, %v537_v4  ;;  %vm474_vm14 = vcmp.ge.f32.partialorder %v410_v5, 0.0  ;;  %vm475_vm15 = vcmp.ge.f32.partialorder %v411_v6, 0.0  ;;  %v538_v13 = vmul.f32 0.2, %v410_v5 }
  0x46   : > { %v1354_v15 = vpack.c.bf16 %v601_v12, %v600_v7  ;;  %v539_v16 = vmul.f32 0.2, %v411_v6  ;;  %vm476_vm0 = vcmp.ge.f32.partialorder %v412_v8, 0.0  ;;  %vm477_vm1 = vcmp.ge.f32.partialorder %v413_v10, 0.0 }
  0x47   : > { %v602_v17 = vsel %vm474_vm14, %v410_v5, %v538_v13  ;;  %v540_v18 = vmul.f32 0.2, %v412_v8  ;;  %v541_v19 = vmul.f32 0.2, %v413_v10  ;;  %v344_v20 = vmul.f32 %v1224_v63, %v1560_v0 }
  0x48   : > { %1485 = vst [vmem:[%s1592_s25 + $0x70] sm:$0xff] %v1354_v15   ;;  %v603_v21 = vsel %vm475_vm15, %v411_v6, %v539_v16  ;;  %v414_v22 = vadd.f32 %v1569_v9, %v343_v11  ;;  %v1227_v23 = vunpack.c.l.bf16 %v1458_v14  ;;  %v1228_v24 = vunpack.c.h.bf16 %v1458_v14 }
  0x49   : > { %v1359_v26 = vpack.c.bf16 %v603_v21, %v602_v17  ;;  %v604_v27 = vsel %vm476_vm0, %v412_v8, %v540_v18  ;;  %v605_v28 = vsel %vm477_vm1, %v413_v10, %v541_v19  ;;  %v415_v29 = vadd.f32 %v1569_v9, %v344_v20  ;;  %v1464_v20 = vld [vmem:[%s1555_s18 + $0xc0] sm:$0xff]  }
  0x4a   : > { %v1364_v31 = vpack.c.bf16 %v605_v28, %v604_v27  ;;  %vm478_vm2 = vcmp.ge.f32.partialorder %v414_v22, 0.0  ;;  %v542_v32 = vmul.f32 0.2, %v414_v22  ;;  %v345_v33 = vmul.f32 %v1227_v23, %v1560_v0 }
  0x4b   : > { %1486 = vst [vmem:[%s1592_s25 + $0x78] sm:$0xff] %v1359_v26   ;;  %vm479_vm3 = vcmp.ge.f32.partialorder %v415_v29, 0.0  ;;  %v543_v34 = vmul.f32 0.2, %v415_v29  ;;  %v346_v35 = vmul.f32 %v1228_v24, %v1560_v0  ;;  %v1231_v36 = vunpack.c.l.bf16 %v1459_v25 }
  0x4c   : > { %1487 = vst [vmem:[%s1592_s25 + $0x80] sm:$0xff] %v1364_v31   ;;  %v606_v37 = vsel %vm478_vm2, %v414_v22, %v542_v32  ;;  %v416_v38 = vadd.f32 %v1569_v9, %v345_v33  ;;  %v1232_v39 = vunpack.c.h.bf16 %v1459_v25  ;;  %v1235_v40 = vunpack.c.l.bf16 %v1460_v30 }
  0x4d   : > { %v607_v41 = vsel %vm479_vm3, %v415_v29, %v543_v34  ;;  %v417_v42 = vadd.f32 %v1569_v9, %v346_v35  ;;  %v347_v43 = vmul.f32 %v1231_v36, %v1560_v0  ;;  %v1236_v44 = vunpack.c.h.bf16 %v1460_v30  ;;  %v1465_v34 = vld [vmem:[%s1555_s18 + $0xc8] sm:$0xff]  }
  0x4e   : > { %v1369_v46 = vpack.c.bf16 %v607_v41, %v606_v37  ;;  %vm480_vm4 = vcmp.ge.f32.partialorder %v416_v38, 0.0  ;;  %v544_v47 = vmul.f32 0.2, %v416_v38  ;;  %v348_v48 = vmul.f32 %v1232_v39, %v1560_v0 }
  0x4f   : > { %vm481_vm5 = vcmp.ge.f32.partialorder %v417_v42, 0.0  ;;  %v545_v49 = vmul.f32 0.2, %v417_v42  ;;  %v418_v50 = vadd.f32 %v1569_v9, %v347_v43  ;;  %v349_v51 = vmul.f32 %v1235_v40, %v1560_v0 }
  0x50   : > { %1488 = vst [vmem:[%s1592_s25 + $0x88] sm:$0xff] %v1369_v46   ;;  %v608_v52 = vsel %vm480_vm4, %v416_v38, %v544_v47  ;;  %v419_v53 = vadd.f32 %v1569_v9, %v348_v48  ;;  %v350_v54 = vmul.f32 %v1236_v44, %v1560_v0  ;;  %v1239_v55 = vunpack.c.l.bf16 %v1461_v45  ;;  %v1466_v44 = vld [vmem:[%s1555_s18 + $0xd0] sm:$0xff]  }
  0x51   : > { %v609_v56 = vsel %vm481_vm5, %v417_v42, %v545_v49  ;;  %vm482_vm6 = vcmp.ge.f32.partialorder %v418_v50, 0.0  ;;  %v546_v57 = vmul.f32 0.2, %v418_v50  ;;  %v420_v58 = vadd.f32 %v1569_v9, %v349_v51 }
  0x52   : > { %v1374_v59 = vpack.c.bf16 %v609_v56, %v608_v52  ;;  %vm483_vm7 = vcmp.ge.f32.partialorder %v419_v53, 0.0  ;;  %v547_v60 = vmul.f32 0.2, %v419_v53  ;;  %v421_v61 = vadd.f32 %v1569_v9, %v350_v54 }
  0x53   : > { %v610_v63 = vsel %vm482_vm6, %v418_v50, %v546_v57  ;;  %vm484_vm8 = vcmp.ge.f32.partialorder %v420_v58, 0.0  ;;  %v548_v1 = vmul.f32 0.2, %v420_v58  ;;  %v1240_v2 = vunpack.c.h.bf16 %v1461_v45  ;;  %v1467_v45 = vld [vmem:[%s1555_s18 + $0xd8] sm:$0xff]  }
  0x54   : > { %1489 = vst [vmem:[%s1592_s25 + $0x90] sm:$0xff] %v1374_v59   ;;  %v611_v4 = vsel %vm483_vm7, %v419_v53, %v547_v60  ;;  %vm485_vm9 = vcmp.ge.f32.partialorder %v421_v61, 0.0  ;;  %v549_v5 = vmul.f32 0.2, %v421_v61  ;;  %v351_v6 = vmul.f32 %v1239_v55, %v1560_v0 }
  0x55   : > { %v1379_v7 = vpack.c.bf16 %v611_v4, %v610_v63  ;;  %v612_v8 = vsel %vm484_vm8, %v420_v58, %v548_v1  ;;  %v352_v10 = vmul.f32 %v1240_v2, %v1560_v0  ;;  %v1243_v11 = vunpack.c.l.bf16 %v1462_v62 }
  0x56   : > { %v613_v12 = vsel %vm485_vm9, %v421_v61, %v549_v5  ;;  %v422_v13 = vadd.f32 %v1569_v9, %v351_v6  ;;  %v1244_v14 = vunpack.c.h.bf16 %v1462_v62  ;;  %v1247_v15 = vunpack.c.l.bf16 %v1463_v3 }
  0x57   : > { %1490 = vst [vmem:[%s1592_s25 + $0x98] sm:$0xff] %v1379_v7   ;;  %v1384_v16 = vpack.c.bf16 %v613_v12, %v612_v8  ;;  %v423_v17 = vadd.f32 %v1569_v9, %v352_v10  ;;  %v353_v18 = vmul.f32 %v1243_v11, %v1560_v0  ;;  %v1248_v19 = vunpack.c.h.bf16 %v1463_v3  ;;  %v1468_v12 = vld [vmem:[%s1555_s18 + $0xe0] sm:$0xff]  }
  0x58   : > { %vm486_vm10 = vcmp.ge.f32.partialorder %v422_v13, 0.0  ;;  %v550_v21 = vmul.f32 0.2, %v422_v13  ;;  %v354_v22 = vmul.f32 %v1244_v14, %v1560_v0  ;;  %v355_v23 = vmul.f32 %v1247_v15, %v1560_v0 }
  0x59   : > { %1491 = vst [vmem:[%s1592_s25 + $0xa0] sm:$0xff] %v1384_v16   ;;  %vm487_vm11 = vcmp.ge.f32.partialorder %v423_v17, 0.0  ;;  %v551_v24 = vmul.f32 0.2, %v423_v17  ;;  %v424_v25 = vadd.f32 %v1569_v9, %v353_v18  ;;  %v356_v26 = vmul.f32 %v1248_v19, %v1560_v0  ;;  %v1469_v16 = vld [vmem:[%s1555_s18 + $0xe8] sm:$0xff]  }
  0x5a   : > { %v614_v27 = vsel %vm486_vm10, %v422_v13, %v550_v21  ;;  %v425_v28 = vadd.f32 %v1569_v9, %v354_v22  ;;  %v426_v29 = vadd.f32 %v1569_v9, %v355_v23  ;;  %v1251_v30 = vunpack.c.l.bf16 %v1464_v20 }
  0x5b   : > { %v615_v31 = vsel %vm487_vm11, %v423_v17, %v551_v24  ;;  %vm488_vm12 = vcmp.ge.f32.partialorder %v424_v25, 0.0  ;;  %v552_v32 = vmul.f32 0.2, %v424_v25  ;;  %v427_v33 = vadd.f32 %v1569_v9, %v356_v26 }
  0x5c   : > { %v1389_v35 = vpack.c.bf16 %v615_v31, %v614_v27  ;;  %vm489_vm13 = vcmp.ge.f32.partialorder %v425_v28, 0.0  ;;  %v553_v36 = vmul.f32 0.2, %v425_v28  ;;  %vm490_vm14 = vcmp.ge.f32.partialorder %v426_v29, 0.0 }
  0x5d   : > { %v616_v37 = vsel %vm488_vm12, %v424_v25, %v552_v32  ;;  %vm491_vm15 = vcmp.ge.f32.partialorder %v427_v33, 0.0  ;;  %v554_v38 = vmul.f32 0.2, %v426_v29  ;;  %v555_v39 = vmul.f32 0.2, %v427_v33 }
  0x5e   : > { %1492 = vst [vmem:[%s1592_s25 + $0xa8] sm:$0xff] %v1389_v35   ;;  %v617_v40 = vsel %vm489_vm13, %v425_v28, %v553_v36  ;;  %v1252_v41 = vunpack.c.h.bf16 %v1464_v20  ;;  %v357_v42 = vmul.f32 %v1251_v30, %v1560_v0  ;;  %v1255_v43 = vunpack.c.l.bf16 %v1465_v34  ;;  %v1470_v28 = vld [vmem:[%s1555_s18 + $0xf0] sm:$0xff]  }
  0x5f   : > { %v1394_v46 = vpack.c.bf16 %v617_v40, %v616_v37  ;;  %v618_v47 = vsel %vm490_vm14, %v426_v29, %v554_v38  ;;  %v619_v48 = vsel %vm491_vm15, %v427_v33, %v555_v39  ;;  %v1256_v49 = vunpack.c.h.bf16 %v1465_v34 }
  0x60   : > { %v1399_v50 = vpack.c.bf16 %v619_v48, %v618_v47  ;;  %v358_v51 = vmul.f32 %v1252_v41, %v1560_v0  ;;  %v428_v52 = vadd.f32 %v1569_v9, %v357_v42  ;;  %v359_v53 = vmul.f32 %v1255_v43, %v1560_v0  ;;  %v1471_v47 = vld [vmem:[%s1555_s18 + $0xf8] sm:$0xff]  }
  0x61   : > { %1493 = vst [vmem:[%s1592_s25 + $0xb0] sm:$0xff] %v1394_v46   ;;  %v360_v54 = vmul.f32 %v1256_v49, %v1560_v0  ;;  %v1259_v55 = vunpack.c.l.bf16 %v1466_v44  ;;  %v1260_v56 = vunpack.c.h.bf16 %v1466_v44  ;;  %v1263_v57 = vunpack.c.l.bf16 %v1467_v45 }
  0x62   : > { %1494 = vst [vmem:[%s1592_s25 + $0xb8] sm:$0xff] %v1399_v50   ;;  %v429_v58 = vadd.f32 %v1569_v9, %v358_v51  ;;  %vm492_vm0 = vcmp.ge.f32.partialorder %v428_v52, 0.0  ;;  %v556_v59 = vmul.f32 0.2, %v428_v52  ;;  %v430_v60 = vadd.f32 %v1569_v9, %v359_v53 }
  0x63   : > { %v431_v61 = vadd.f32 %v1569_v9, %v360_v54  ;;  %v361_v62 = vmul.f32 %v1259_v55, %v1560_v0  ;;  %v362_v63 = vmul.f32 %v1260_v56, %v1560_v0  ;;  %v1264_v1 = vunpack.c.h.bf16 %v1467_v45 }
  0x64   : > { %vm493_vm1 = vcmp.ge.f32.partialorder %v429_v58, 0.0  ;;  %v557_v2 = vmul.f32 0.2, %v429_v58  ;;  %v620_v3 = vsel %vm492_vm0, %v428_v52, %v556_v59  ;;  %vm494_vm2 = vcmp.ge.f32.partialorder %v430_v60, 0.0 }
  0x65   : > { %vm495_vm3 = vcmp.ge.f32.partialorder %v431_v61, 0.0  ;;  %v558_v4 = vmul.f32 0.2, %v430_v60  ;;  %v559_v5 = vmul.f32 0.2, %v431_v61  ;;  %v432_v6 = vadd.f32 %v1569_v9, %v361_v62 }
  0x66   : > { %v621_v7 = vsel %vm493_vm1, %v429_v58, %v557_v2  ;;  %v433_v8 = vadd.f32 %v1569_v9, %v362_v63  ;;  %v363_v10 = vmul.f32 %v1263_v57, %v1560_v0  ;;  %v364_v11 = vmul.f32 %v1264_v1, %v1560_v0 }
  0x67   : > { %v1404_v13 = vpack.c.bf16 %v621_v7, %v620_v3  ;;  %v622_v14 = vsel %vm494_vm2, %v430_v60, %v558_v4  ;;  %v623_v15 = vsel %vm495_vm3, %v431_v61, %v559_v5  ;;  %vm496_vm4 = vcmp.ge.f32.partialorder %v432_v6, 0.0 }
  0x68   : > { %v1409_v17 = vpack.c.bf16 %v623_v15, %v622_v14  ;;  %vm497_vm5 = vcmp.ge.f32.partialorder %v433_v8, 0.0  ;;  %v560_v18 = vmul.f32 0.2, %v432_v6  ;;  %v561_v19 = vmul.f32 0.2, %v433_v8 }
  0x69   : > { %1495 = vst [vmem:[%s1592_s25 + $0xc0] sm:$0xff] %v1404_v13   ;;  %v434_v20 = vadd.f32 %v1569_v9, %v363_v10  ;;  %v435_v21 = vadd.f32 %v1569_v9, %v364_v11  ;;  %v1267_v22 = vunpack.c.l.bf16 %v1468_v12  ;;  %v1268_v23 = vunpack.c.h.bf16 %v1468_v12 }
  0x6a   : > { %1496 = vst [vmem:[%s1592_s25 + $0xc8] sm:$0xff] %v1409_v17   ;;  %v624_v24 = vsel %vm496_vm4, %v432_v6, %v560_v18  ;;  %v625_v25 = vsel %vm497_vm5, %v433_v8, %v561_v19  ;;  %v1271_v26 = vunpack.c.l.bf16 %v1469_v16  ;;  %v1272_v27 = vunpack.c.h.bf16 %v1469_v16 }
  0x6b   : > { %v1414_v29 = vpack.c.bf16 %v625_v25, %v624_v24  ;;  %vm498_vm6 = vcmp.ge.f32.partialorder %v434_v20, 0.0  ;;  %vm499_vm7 = vcmp.ge.f32.partialorder %v435_v21, 0.0  ;;  %v562_v30 = vmul.f32 0.2, %v434_v20 }
  0x6c   : > { %v563_v31 = vmul.f32 0.2, %v435_v21  ;;  %v365_v32 = vmul.f32 %v1267_v22, %v1560_v0  ;;  %v366_v33 = vmul.f32 %v1268_v23, %v1560_v0  ;;  %v367_v34 = vmul.f32 %v1271_v26, %v1560_v0 }
  0x6d   : > { %1497 = vst [vmem:[%s1592_s25 + $0xd0] sm:$0xff] %v1414_v29   ;;  %v626_v35 = vsel %vm498_vm6, %v434_v20, %v562_v30  ;;  %v368_v36 = vmul.f32 %v1272_v27, %v1560_v0  ;;  %v1275_v37 = vunpack.c.l.bf16 %v1470_v28  ;;  %v1276_v38 = vunpack.c.h.bf16 %v1470_v28 }
  0x6e   : > { %v627_v39 = vsel %vm499_vm7, %v435_v21, %v563_v31  ;;  %v436_v40 = vadd.f32 %v1569_v9, %v365_v32  ;;  %v437_v41 = vadd.f32 %v1569_v9, %v366_v33  ;;  %v438_v42 = vadd.f32 %v1569_v9, %v367_v34 }
  0x6f   : > { %v1419_v43 = vpack.c.bf16 %v627_v39, %v626_v35  ;;  %v439_v44 = vadd.f32 %v1569_v9, %v368_v36  ;;  %v369_v45 = vmul.f32 %v1275_v37, %v1560_v0  ;;  %v370_v46 = vmul.f32 %v1276_v38, %v1560_v0 }
  0x70   : > { %vm500_vm8 = vcmp.ge.f32.partialorder %v436_v40, 0.0  ;;  %vm501_vm9 = vcmp.ge.f32.partialorder %v437_v41, 0.0  ;;  %v564_v48 = vmul.f32 0.2, %v436_v40  ;;  %v565_v49 = vmul.f32 0.2, %v437_v41 }
  0x71   : > { %1498 = vst [vmem:[%s1592_s25 + $0xd8] sm:$0xff] %v1419_v43   ;;  %vm502_vm10 = vcmp.ge.f32.partialorder %v438_v42, 0.0  ;;  %vm503_vm11 = vcmp.ge.f32.partialorder %v439_v44, 0.0  ;;  %v566_v50 = vmul.f32 0.2, %v438_v42  ;;  %v440_v54 = vadd.f32 %v1569_v9, %v369_v45 }
  0x72   : > { %v567_v51 = vmul.f32 0.2, %v439_v44  ;;  %v628_v52 = vsel %vm500_vm8, %v436_v40, %v564_v48  ;;  %v629_v53 = vsel %vm501_vm9, %v437_v41, %v565_v49  ;;  %v441_v55 = vadd.f32 %v1569_v9, %v370_v46 }
  0x73   : > { %v1424_v56 = vpack.c.bf16 %v629_v53, %v628_v52  ;;  %v630_v57 = vsel %vm502_vm10, %v438_v42, %v566_v50  ;;  %v1279_v59 = vunpack.c.l.bf16 %v1471_v47  ;;  %vm504_vm12 = vcmp.ge.f32.partialorder %v440_v54, 0.0 }
  0x74   : > { %v631_v58 = vsel %vm503_vm11, %v439_v44, %v567_v51  ;;  %vm505_vm13 = vcmp.ge.f32.partialorder %v441_v55, 0.0  ;;  %v568_v61 = vmul.f32 0.2, %v440_v54  ;;  %v569_v62 = vmul.f32 0.2, %v441_v55 }
  0x75   : > { %v1429_v60 = vpack.c.bf16 %v631_v58, %v630_v57  ;;  %1499 = vst [vmem:[%s1592_s25 + $0xe0] sm:$0xff] %v1424_v56   ;;  %v1280_v63 = vunpack.c.h.bf16 %v1471_v47  ;;  %v371_v1 = vmul.f32 %v1279_v59, %v1560_v0 }
  0x76   : > { %v632_v2 = vsel %vm504_vm12, %v440_v54, %v568_v61  ;;  %v633_v3 = vsel %vm505_vm13, %v441_v55, %v569_v62 }
  0x77   : > { %1500 = vst [vmem:[%s1592_s25 + $0xe8] sm:$0xff] %v1429_v60   ;;  %v372_v4 = vmul.f32 %v1280_v63, %v1560_v0  ;;  %v442_v5 = vadd.f32 %v1569_v9, %v371_v1  ;;  %v1434_v6 = vpack.c.bf16 %v633_v3, %v632_v2 }
  0x79   : > { %v443_v7 = vadd.f32 %v1569_v9, %v372_v4  ;;  %vm506_vm14 = vcmp.ge.f32.partialorder %v442_v5, 0.0  ;;  %v570_v8 = vmul.f32 0.2, %v442_v5  ;;  %1501 = vst [vmem:[%s1592_s25 + $0xf0] sm:$0xff] %v1434_v6  }
  0x7b   : > { %vm507_vm15 = vcmp.ge.f32.partialorder %v443_v7, 0.0  ;;  %v571_v10 = vmul.f32 0.2, %v443_v7  ;;  %v634_v11 = vsel %vm506_vm14, %v442_v5, %v570_v8 }
  0x7d   : > { %v635_v12 = vsel %vm507_vm15, %v443_v7, %v571_v10 }
  0x7e   : > { %v1439_v13 = vpack.c.bf16 %v635_v12, %v634_v11 }
  0x80   : > { %1502 = vst [vmem:[%s1592_s25 + $0xf8] sm:$0xff] %v1439_v13  }
  0x81 PF: > { %s13_s12 = sadd.s32 1, %s1517_s12  }
  0x82   : > { %p10_p4 = scmp.ge.s32.totalorder %s13_s12, 6  }
  0x84   :  { %12 = sbr.rel (!%p10_p4) target bundleno = 1 (0x1), region = 62 }

// kernel: discriminator_forward.9
= control target key start
LH: loop header
LB: loop body
LE: loop exit
PB: predicated region body
PF: predicated region fallthrough
CT: control target
= control target key end

     0   :  { %s2219_s1 = inlined_call_operand.vmem [shape: bf16[128,128], index: 1, kind: input, shape index: {}]   ;;  %s2220_s0 = inlined_call_operand.vmem [shape: bf16[512,128], index: 0, kind: input, shape index: {}]   ;;  %s2221_s2 = inlined_call_operand.vmem [shape: f32[1,128], index: 2, kind: input, shape index: {}]   ;;  %s2222_s3 = inlined_call_operand.vmem [shape: bf16[512,128], index: 3, kind: output, shape index: {0}]   ;;  %s2223_s4 = inlined_call_operand.vmem [shape: f32[1,1,128], index: 4, kind: output, shape index: {1}]   ;;  %s2224_s5 = inlined_call_operand.vmem [shape: f32[1,1,128], index: 5, kind: output, shape index: {2}]  }
   0x1   :  { %v1666_v0 = vld [vmem:[%s2219_s1] sm:$0xff]   ;;  %v1667_v1 = vld [vmem:[%s2219_s1 + $0x8] sm:$0xff]   ;;  %v1668_v2 = vld [vmem:[%s2219_s1 + $0x10] sm:$0xff]  }
   0x2   :  { %1570 = vmatprep.subr.bf16.mxu0 %v1666_v0  ;;  %1650 = vmatprep.subr.bf16.mxu1 %v1666_v0  ;;  %v1669_v3 = vld [vmem:[%s2219_s1 + $0x18] sm:$0xff]   ;;  %v1674_v4 = vld [vmem:[%s2220_s0] sm:$0xff]   ;;  %v1671_v6 = vld [vmem:[%s2219_s1 + $0x28] sm:$0xff]  }
   0x3   :  { %1571 = vmatpush3.bf16.msra.mxu0 %v1666_v0  ;;  %1658 = vmatpush3.bf16.msra.mxu1 %v1666_v0  ;;  %v1670_v5 = vld [vmem:[%s2219_s1 + $0x20] sm:$0xff]   ;;  %v1672_v7 = vld [vmem:[%s2219_s1 + $0x30] sm:$0xff]   ;;  %v1673_v8 = vld [vmem:[%s2219_s1 + $0x38] sm:$0xff]  }
   0x4   :  { %1572 = vmatprep.subr.bf16.mxu0 %v1667_v1  ;;  %1651 = vmatprep.subr.bf16.mxu1 %v1667_v1  ;;  %v1690_v9 = vld [vmem:[%s2220_s0 + $0x80] sm:$0xff]   ;;  %v1675_v10 = vld [vmem:[%s2220_s0 + $0x8] sm:$0xff]   ;;  %v1676_v11 = vld [vmem:[%s2220_s0 + $0x10] sm:$0xff]  }
   0x5   :  { %1586 = vmatprep.mubr.bf16.mxu0 %v1674_v4  ;;  %1618 = vmatprep.mubr.bf16.mxu1 %v1690_v9  ;;  %v1691_v12 = vld [vmem:[%s2220_s0 + $0x88] sm:$0xff]   ;;  %v1692_v13 = vld [vmem:[%s2220_s0 + $0x90] sm:$0xff]   ;;  %v1677_v14 = vld [vmem:[%s2220_s0 + $0x18] sm:$0xff]  }
   0x6   :  { %v1678_v15 = vld [vmem:[%s2220_s0 + $0x20] sm:$0xff]   ;;  %v1693_v16 = vld [vmem:[%s2220_s0 + $0x98] sm:$0xff]   ;;  %v1679_v18 = vld [vmem:[%s2220_s0 + $0x28] sm:$0xff]  }
   0x7   :  { %1573 = vmatpush3.bf16.msra.mxu0 %v1667_v1  ;;  %1659 = vmatpush3.bf16.msra.mxu1 %v1667_v1  ;;  %v1694_v17 = vld [vmem:[%s2220_s0 + $0xa0] sm:$0xff]   ;;  %v1695_v19 = vld [vmem:[%s2220_s0 + $0xa8] sm:$0xff]   ;;  %v1680_v20 = vld [vmem:[%s2220_s0 + $0x30] sm:$0xff]  }
   0x8   :  { %1574 = vmatprep.subr.bf16.mxu0 %v1668_v2  ;;  %1652 = vmatprep.subr.bf16.mxu1 %v1668_v2  ;;  %v1696_v21 = vld [vmem:[%s2220_s0 + $0xb0] sm:$0xff]   ;;  %v1681_v22 = vld [vmem:[%s2220_s0 + $0x38] sm:$0xff]   ;;  %v1682_v24 = vld [vmem:[%s2220_s0 + $0x40] sm:$0xff]  }
   0x9   :  { %v1697_v23 = vld [vmem:[%s2220_s0 + $0xb8] sm:$0xff]   ;;  %v1698_v25 = vld [vmem:[%s2220_s0 + $0xc0] sm:$0xff]   ;;  %v1683_v26 = vld [vmem:[%s2220_s0 + $0x48] sm:$0xff]  }
   0xa   :  { %v1699_v27 = vld [vmem:[%s2220_s0 + $0xc8] sm:$0xff]   ;;  %v1684_v28 = vld [vmem:[%s2220_s0 + $0x50] sm:$0xff]   ;;  %v1685_v30 = vld [vmem:[%s2220_s0 + $0x58] sm:$0xff]  }
   0xb   :  { %1575 = vmatpush3.bf16.msra.mxu0 %v1668_v2  ;;  %1660 = vmatpush3.bf16.msra.mxu1 %v1668_v2  ;;  %v1700_v29 = vld [vmem:[%s2220_s0 + $0xd0] sm:$0xff]   ;;  %v1701_v31 = vld [vmem:[%s2220_s0 + $0xd8] sm:$0xff]   ;;  %v1686_v32 = vld [vmem:[%s2220_s0 + $0x60] sm:$0xff]  }
   0xc   :  { %1576 = vmatprep.subr.bf16.mxu0 %v1669_v3  ;;  %1653 = vmatprep.subr.bf16.mxu1 %v1669_v3  ;;  %v1702_v33 = vld [vmem:[%s2220_s0 + $0xe0] sm:$0xff]   ;;  %v1687_v34 = vld [vmem:[%s2220_s0 + $0x68] sm:$0xff]   ;;  %v1688_v36 = vld [vmem:[%s2220_s0 + $0x70] sm:$0xff]  }
   0xd   :  { %v1703_v35 = vld [vmem:[%s2220_s0 + $0xe8] sm:$0xff]   ;;  %v1704_v37 = vld [vmem:[%s2220_s0 + $0xf0] sm:$0xff]   ;;  %v1689_v38 = vld [vmem:[%s2220_s0 + $0x78] sm:$0xff]  }
   0xe   :  { %v1705_v39 = vld [vmem:[%s2220_s0 + $0xf8] sm:$0xff]   ;;  %v1859_v40 = vld [vmem:[%s2221_s2] ss:$0 sm:$0xff] }
   0xf   :  { %1577 = vmatpush3.bf16.msra.mxu0 %v1669_v3  ;;  %1661 = vmatpush3.bf16.msra.mxu1 %v1669_v3 }
  0x10   :  { %1578 = vmatprep.subr.bf16.mxu0 %v1670_v5  ;;  %1654 = vmatprep.subr.bf16.mxu1 %v1670_v5 }
  0x13   :  { %1579 = vmatpush3.bf16.msra.mxu0 %v1670_v5  ;;  %1662 = vmatpush3.bf16.msra.mxu1 %v1670_v5 }
  0x14   :  { %1580 = vmatprep.subr.bf16.mxu0 %v1671_v6  ;;  %1655 = vmatprep.subr.bf16.mxu1 %v1671_v6 }
  0x17   :  { %1581 = vmatpush3.bf16.msra.mxu0 %v1671_v6  ;;  %1663 = vmatpush3.bf16.msra.mxu1 %v1671_v6 }
  0x18   :  { %1582 = vmatprep.subr.bf16.mxu0 %v1672_v7  ;;  %1656 = vmatprep.subr.bf16.mxu1 %v1672_v7 }
  0x1b   :  { %1583 = vmatpush3.bf16.msra.mxu0 %v1672_v7  ;;  %1664 = vmatpush3.bf16.msra.mxu1 %v1672_v7 }
  0x1c   :  { %1584 = vmatprep.subr.bf16.mxu0 %v1673_v8  ;;  %1657 = vmatprep.subr.bf16.mxu1 %v1673_v8 }
  0x1f   :  { %1585 = vmatpush3.bf16.msra.mxu0 %v1673_v8  ;;  %1665 = vmatpush3.bf16.msra.mxu1 %v1673_v8 }
  0x22   :  { %1587 = vmatmul.mubr.bf16.vlgmr.msra.gmra.mrb[0].mxu0 %v1675_v10  ;;  %1619 = vmatmul.mubr.bf16.vlgmr.msra.gmra.mrb[0].mxu1 %v1691_v12 }
  0x23   :  { %1590 = vmatprep.mubr.bf16.mxu0 %v1676_v11  ;;  %1622 = vmatprep.mubr.bf16.mxu1 %v1692_v13 }
  0x2a   :  { %1591 = vmatmul.mubr.bf16.gmra.mrb[4].mxu0 %v1677_v14  ;;  %1623 = vmatmul.mubr.bf16.gmra.mrb[4].mxu1 %v1693_v16 }
  0x2b   :  { %1594 = vmatprep.mubr.bf16.mxu0 %v1678_v15  ;;  %1626 = vmatprep.mubr.bf16.mxu1 %v1694_v17 }
  0x32   :  { %1595 = vmatmul.mubr.bf16.gmra.mrb[8].mxu0 %v1679_v18  ;;  %1627 = vmatmul.mubr.bf16.gmra.mrb[8].mxu1 %v1695_v19 }
  0x33   :  { %1598 = vmatprep.mubr.bf16.mxu0 %v1680_v20  ;;  %1630 = vmatprep.mubr.bf16.mxu1 %v1696_v21 }
  0x3a   :  { %1599 = vmatmul.mubr.bf16.gmra.mrb[12].mxu0 %v1681_v22  ;;  %1631 = vmatmul.mubr.bf16.gmra.mrb[12].mxu1 %v1697_v23 }
  0x3b   :  { %1602 = vmatprep.mubr.bf16.mxu0 %v1682_v24  ;;  %1634 = vmatprep.mubr.bf16.mxu1 %v1698_v25 }
  0x42   :  { %1603 = vmatmul.mubr.bf16.gmra.mrb[16].mxu0 %v1683_v26  ;;  %1635 = vmatmul.mubr.bf16.gmra.mrb[16].mxu1 %v1699_v27 }
  0x43   :  { %1606 = vmatprep.mubr.bf16.mxu0 %v1684_v28  ;;  %1638 = vmatprep.mubr.bf16.mxu1 %v1700_v29 }
  0x4a   :  { %1607 = vmatmul.mubr.bf16.gmra.mrb[20].mxu0 %v1685_v30  ;;  %1639 = vmatmul.mubr.bf16.gmra.mrb[20].mxu1 %v1701_v31 }
  0x4b   :  { %1610 = vmatprep.mubr.bf16.mxu0 %v1686_v32  ;;  %1642 = vmatprep.mubr.bf16.mxu1 %v1702_v33 }
  0x52   :  { %1611 = vmatmul.mubr.bf16.gmra.mrb[24].mxu0 %v1687_v34  ;;  %1643 = vmatmul.mubr.bf16.gmra.mrb[24].mxu1 %v1703_v35 }
  0x53   :  { %1614 = vmatprep.mubr.bf16.mxu0 %v1688_v36  ;;  %1646 = vmatprep.mubr.bf16.mxu1 %v1704_v37 }
  0x5a   :  { %1615 = vmatmul.mubr.bf16.gmra.mrb[28].mxu0 %v1689_v38  ;;  %1647 = vmatmul.mubr.bf16.gmra.mrb[28].mxu1 %v1705_v39 }
  0xf5   :  { %v1588_v41 = vpop.f32.mrb[0].mxu0  ;;  %v1620_v42 = vpop.f32.mrb[0].mxu1 }
  0xf6   :  { %v379_v43 = vpop.f32.mrb[1].mxu0  ;;  %v1862_v44 = vadd.f32 %v1620_v42, %v1859_v40  ;;  %v507_v45 = vpop.f32.mrb[1].mxu1  ;;  %v388_v50 = vadd.f32 %v1588_v41, %v1859_v40 }
  0xf7   :  { %v380_v46 = vadd.f32 %v1859_v40, %v379_v43  ;;  %v1589_v47 = vpop.f32.mrb[2].mxu0  ;;  %v1866_v48 = vadd.f32 %v1859_v40, %v507_v45  ;;  %v1621_v49 = vpop.f32.mrb[2].mxu1 }
  0xf8   :  { %v391_v51 = vadd.f32 %v1589_v47, %v1859_v40  ;;  %v382_v52 = vpop.f32.mrb[3].mxu0  ;;  %v1871_v53 = vadd.f32 %v1621_v49, %v1859_v40  ;;  %v510_v54 = vpop.f32.mrb[3].mxu1  ;;  %v1026_v0 = vmul.f32 %v388_v50, %v388_v50 }
  0xf9   :  { %v383_v55 = vadd.f32 %v1859_v40, %v382_v52  ;;  %v1875_v56 = vadd.f32 %v1859_v40, %v510_v54  ;;  %v1024_v57 = vmul.f32 %v380_v46, %v380_v46 }
  0xfa   :  { %v1347_v58 = vpack.c.bf16 %v391_v51, %v388_v50  ;;  %v1427_v59 = vpack.c.bf16 %v1871_v53, %v1862_v44  ;;  %v1027_v8 = vmul.f32 %v391_v51, %v391_v51 }
  0xfb   :  { %v1342_v60 = vpack.c.bf16 %v383_v55, %v380_v46  ;;  %v954_v61 = vadd.f32 %v383_v55, %v380_v46  ;;  %v1025_v62 = vmul.f32 %v383_v55, %v383_v55  ;;  %v1422_v63 = vpack.c.bf16 %v1875_v56, %v1866_v48 }
  0xfc   :  { %1499 = vst [vmem:[%s2222_s3 + $0x8] sm:$0xff] %v1347_v58   ;;  %1515 = vst [vmem:[%s2222_s3 + $0x88] sm:$0xff] %v1427_v59  }
  0xfd   :  { %1343 = vst [vmem:[%s2222_s3] sm:$0xff] %v1342_v60   ;;  %v955_v1 = vadd.f32 %v954_v61, %v388_v50  ;;  %v1088_v2 = vadd.f32 %v1025_v62, %v1024_v57  ;;  %v1592_v3 = vpop.f32.mrb[4].mxu0  ;;  %1514 = vst [vmem:[%s2222_s3 + $0x80] sm:$0xff] %v1422_v63   ;;  %v1624_v4 = vpop.f32.mrb[4].mxu1 }
  0xfe   :  { %v395_v5 = vpop.f32.mrb[5].mxu0  ;;  %v1894_v6 = vadd.f32 %v1624_v4, %v1859_v40  ;;  %v523_v7 = vpop.f32.mrb[5].mxu1  ;;  %v404_v14 = vadd.f32 %v1592_v3, %v1859_v40 }
  0xff   :  { %v1089_v9 = vadd.f32 %v1088_v2, %v1026_v0  ;;  %v396_v10 = vadd.f32 %v1859_v40, %v395_v5  ;;  %v956_v11 = vadd.f32 %v955_v1, %v391_v51  ;;  %v1593_v12 = vpop.f32.mrb[6].mxu0  ;;  %v1625_v13 = vpop.f32.mrb[6].mxu1  ;;  %v1904_v24 = vadd.f32 %v1859_v40, %v523_v7 }
 0x100   :  { %v407_v15 = vadd.f32 %v1593_v12, %v1859_v40  ;;  %v398_v16 = vpop.f32.mrb[7].mxu0  ;;  %v1900_v17 = vadd.f32 %v1625_v13, %v1859_v40  ;;  %v526_v18 = vpop.f32.mrb[7].mxu1  ;;  %v1030_v31 = vmul.f32 %v404_v14, %v404_v14 }
 0x101   :  { %v957_v19 = vadd.f32 %v956_v11, %v396_v10  ;;  %v1028_v20 = vmul.f32 %v396_v10, %v396_v10  ;;  %v1090_v21 = vadd.f32 %v1089_v9, %v1027_v8  ;;  %v399_v22 = vadd.f32 %v1859_v40, %v398_v16 }
 0x102   :  { %v1357_v23 = vpack.c.bf16 %v407_v15, %v404_v14  ;;  %v1437_v25 = vpack.c.bf16 %v1900_v17, %v1894_v6  ;;  %v1915_v30 = vadd.f32 %v1859_v40, %v526_v18  ;;  %v1031_v41 = vmul.f32 %v407_v15, %v407_v15 }
 0x103   :  { %v1091_v26 = vadd.f32 %v1090_v21, %v1028_v20  ;;  %v1352_v27 = vpack.c.bf16 %v399_v22, %v396_v10  ;;  %v958_v28 = vadd.f32 %v957_v19, %v399_v22  ;;  %v1029_v29 = vmul.f32 %v399_v22, %v399_v22 }
 0x104   :  { %1501 = vst [vmem:[%s2222_s3 + $0x18] sm:$0xff] %v1357_v23   ;;  %1517 = vst [vmem:[%s2222_s3 + $0x98] sm:$0xff] %v1437_v25   ;;  %v1432_v37 = vpack.c.bf16 %v1915_v30, %v1904_v24 }
 0x105   :  { %1500 = vst [vmem:[%s2222_s3 + $0x10] sm:$0xff] %v1352_v27   ;;  %v959_v32 = vadd.f32 %v958_v28, %v404_v14  ;;  %v1092_v33 = vadd.f32 %v1091_v26, %v1029_v29  ;;  %v1596_v34 = vpop.f32.mrb[8].mxu0  ;;  %v1628_v35 = vpop.f32.mrb[8].mxu1 }
 0x106   :  { %v411_v36 = vpop.f32.mrb[9].mxu0  ;;  %v1923_v38 = vadd.f32 %v1628_v35, %v1859_v40  ;;  %v539_v39 = vpop.f32.mrb[9].mxu1  ;;  %v420_v49 = vadd.f32 %v1596_v34, %v1859_v40  ;;  %1516 = vst [vmem:[%s2222_s3 + $0x90] sm:$0xff] %v1432_v37  }
 0x107   :  { %v1093_v42 = vadd.f32 %v1092_v33, %v1030_v31  ;;  %v412_v43 = vadd.f32 %v1859_v40, %v411_v36  ;;  %v960_v45 = vadd.f32 %v959_v32, %v407_v15  ;;  %v1597_v46 = vpop.f32.mrb[10].mxu0  ;;  %v1629_v47 = vpop.f32.mrb[10].mxu1  ;;  %v1936_v61 = vadd.f32 %v1859_v40, %v539_v39 }
 0x108   :  { %v423_v50 = vadd.f32 %v1597_v46, %v1859_v40  ;;  %v414_v51 = vpop.f32.mrb[11].mxu0  ;;  %v1932_v52 = vadd.f32 %v1629_v47, %v1859_v40  ;;  %v542_v54 = vpop.f32.mrb[11].mxu1  ;;  %v1034_v4 = vmul.f32 %v420_v49, %v420_v49 }
 0x109   :  { %v961_v55 = vadd.f32 %v960_v45, %v412_v43  ;;  %v1032_v57 = vmul.f32 %v412_v43, %v412_v43  ;;  %v1094_v58 = vadd.f32 %v1093_v42, %v1031_v41  ;;  %v415_v59 = vadd.f32 %v1859_v40, %v414_v51 }
 0x10a   :  { %v1367_v60 = vpack.c.bf16 %v423_v50, %v420_v49  ;;  %v1447_v62 = vpack.c.bf16 %v1932_v52, %v1923_v38  ;;  %v1947_v3 = vadd.f32 %v1859_v40, %v542_v54  ;;  %v1035_v14 = vmul.f32 %v423_v50, %v423_v50 }
 0x10b   :  { %v1095_v63 = vadd.f32 %v1094_v58, %v1032_v57  ;;  %v1362_v0 = vpack.c.bf16 %v415_v59, %v412_v43  ;;  %v962_v1 = vadd.f32 %v961_v55, %v415_v59  ;;  %v1033_v2 = vmul.f32 %v415_v59, %v415_v59 }
 0x10c   :  { %1503 = vst [vmem:[%s2222_s3 + $0x28] sm:$0xff] %v1367_v60   ;;  %1519 = vst [vmem:[%s2222_s3 + $0xa8] sm:$0xff] %v1447_v62   ;;  %v1442_v11 = vpack.c.bf16 %v1947_v3, %v1936_v61 }
 0x10d   :  { %1502 = vst [vmem:[%s2222_s3 + $0x20] sm:$0xff] %v1362_v0   ;;  %v963_v5 = vadd.f32 %v962_v1, %v420_v49  ;;  %v1096_v7 = vadd.f32 %v1095_v63, %v1033_v2  ;;  %v1600_v8 = vpop.f32.mrb[12].mxu0  ;;  %v1632_v9 = vpop.f32.mrb[12].mxu1 }
 0x10e   :  { %v427_v10 = vpop.f32.mrb[13].mxu0  ;;  %v1955_v12 = vadd.f32 %v1632_v9, %v1859_v40  ;;  %v555_v13 = vpop.f32.mrb[13].mxu1  ;;  %v436_v21 = vadd.f32 %v1600_v8, %v1859_v40  ;;  %1518 = vst [vmem:[%s2222_s3 + $0xa0] sm:$0xff] %v1442_v11  }
 0x10f   :  { %v1097_v15 = vadd.f32 %v1096_v7, %v1034_v4  ;;  %v428_v16 = vadd.f32 %v1859_v40, %v427_v10  ;;  %v964_v18 = vadd.f32 %v963_v5, %v423_v50  ;;  %v1601_v19 = vpop.f32.mrb[14].mxu0  ;;  %v1633_v20 = vpop.f32.mrb[14].mxu1  ;;  %v1968_v33 = vadd.f32 %v1859_v40, %v555_v13 }
 0x110   :  { %v439_v22 = vadd.f32 %v1601_v19, %v1859_v40  ;;  %v430_v23 = vpop.f32.mrb[15].mxu0  ;;  %v1964_v25 = vadd.f32 %v1633_v20, %v1859_v40  ;;  %v558_v26 = vpop.f32.mrb[15].mxu1  ;;  %v1038_v42 = vmul.f32 %v436_v21, %v436_v21 }
 0x111   :  { %v965_v27 = vadd.f32 %v964_v18, %v428_v16  ;;  %v1036_v28 = vmul.f32 %v428_v16, %v428_v16  ;;  %v1098_v29 = vadd.f32 %v1097_v15, %v1035_v14  ;;  %v431_v31 = vadd.f32 %v1859_v40, %v430_v23 }
 0x112   :  { %v1377_v32 = vpack.c.bf16 %v439_v22, %v436_v21  ;;  %v1457_v34 = vpack.c.bf16 %v1964_v25, %v1955_v12  ;;  %v1979_v41 = vadd.f32 %v1859_v40, %v558_v26  ;;  %v1039_v55 = vmul.f32 %v439_v22, %v439_v22 }
 0x113   :  { %v1099_v35 = vadd.f32 %v1098_v29, %v1036_v28  ;;  %v1372_v36 = vpack.c.bf16 %v431_v31, %v428_v16  ;;  %v966_v37 = vadd.f32 %v965_v27, %v431_v31  ;;  %v1037_v39 = vmul.f32 %v431_v31, %v431_v31 }
 0x114   :  { %1505 = vst [vmem:[%s2222_s3 + $0x38] sm:$0xff] %v1377_v32   ;;  %1521 = vst [vmem:[%s2222_s3 + $0xb8] sm:$0xff] %v1457_v34   ;;  %v1452_v50 = vpack.c.bf16 %v1979_v41, %v1968_v33 }
 0x115   :  { %1504 = vst [vmem:[%s2222_s3 + $0x30] sm:$0xff] %v1372_v36   ;;  %v967_v43 = vadd.f32 %v966_v37, %v436_v21  ;;  %v1100_v45 = vadd.f32 %v1099_v35, %v1037_v39  ;;  %v1604_v46 = vpop.f32.mrb[16].mxu0  ;;  %v1636_v47 = vpop.f32.mrb[16].mxu1 }
 0x116   :  { %v443_v49 = vpop.f32.mrb[17].mxu0  ;;  %v1987_v51 = vadd.f32 %v1636_v47, %v1859_v40  ;;  %v571_v54 = vpop.f32.mrb[17].mxu1  ;;  %v452_v63 = vadd.f32 %v1604_v46, %v1859_v40  ;;  %1520 = vst [vmem:[%s2222_s3 + $0xb0] sm:$0xff] %v1452_v50  }
 0x117   :  { %v1101_v57 = vadd.f32 %v1100_v45, %v1038_v42  ;;  %v444_v58 = vadd.f32 %v1859_v40, %v443_v49  ;;  %v968_v59 = vadd.f32 %v967_v43, %v439_v22  ;;  %v1605_v60 = vpop.f32.mrb[18].mxu0  ;;  %v1637_v62 = vpop.f32.mrb[18].mxu1  ;;  %v2000_v11 = vadd.f32 %v1859_v40, %v571_v54 }
 0x118   :  { %v455_v0 = vadd.f32 %v1605_v60, %v1859_v40  ;;  %v446_v1 = vpop.f32.mrb[19].mxu0  ;;  %v1996_v2 = vadd.f32 %v1637_v62, %v1859_v40  ;;  %v574_v4 = vpop.f32.mrb[19].mxu1  ;;  %v1042_v20 = vmul.f32 %v452_v63, %v452_v63 }
 0x119   :  { %v969_v5 = vadd.f32 %v968_v59, %v444_v58  ;;  %v1040_v7 = vmul.f32 %v444_v58, %v444_v58  ;;  %v1102_v8 = vadd.f32 %v1101_v57, %v1039_v55  ;;  %v447_v9 = vadd.f32 %v1859_v40, %v446_v1 }
 0x11a   :  { %v1387_v10 = vpack.c.bf16 %v455_v0, %v452_v63  ;;  %v1467_v13 = vpack.c.bf16 %v1996_v2, %v1987_v51  ;;  %v2011_v19 = vadd.f32 %v1859_v40, %v574_v4  ;;  %v1043_v32 = vmul.f32 %v455_v0, %v455_v0 }
 0x11b   :  { %v1103_v14 = vadd.f32 %v1102_v8, %v1040_v7  ;;  %v1382_v15 = vpack.c.bf16 %v447_v9, %v444_v58  ;;  %v970_v16 = vadd.f32 %v969_v5, %v447_v9  ;;  %v1041_v18 = vmul.f32 %v447_v9, %v447_v9 }
 0x11c   :  { %1507 = vst [vmem:[%s2222_s3 + $0x48] sm:$0xff] %v1387_v10   ;;  %1523 = vst [vmem:[%s2222_s3 + $0xc8] sm:$0xff] %v1467_v13   ;;  %v1462_v28 = vpack.c.bf16 %v2011_v19, %v2000_v11 }
 0x11d   :  { %1506 = vst [vmem:[%s2222_s3 + $0x40] sm:$0xff] %v1382_v15   ;;  %v971_v21 = vadd.f32 %v970_v16, %v452_v63  ;;  %v1104_v22 = vadd.f32 %v1103_v14, %v1041_v18  ;;  %v1608_v23 = vpop.f32.mrb[20].mxu0  ;;  %v1640_v26 = vpop.f32.mrb[20].mxu1 }
 0x11e   :  { %v459_v27 = vpop.f32.mrb[21].mxu0  ;;  %v2019_v29 = vadd.f32 %v1640_v26, %v1859_v40  ;;  %v587_v31 = vpop.f32.mrb[21].mxu1  ;;  %v468_v42 = vadd.f32 %v1608_v23, %v1859_v40  ;;  %1522 = vst [vmem:[%s2222_s3 + $0xc0] sm:$0xff] %v1462_v28  }
 0x11f   :  { %v1105_v34 = vadd.f32 %v1104_v22, %v1042_v20  ;;  %v460_v35 = vadd.f32 %v1859_v40, %v459_v27  ;;  %v972_v36 = vadd.f32 %v971_v21, %v455_v0  ;;  %v1609_v37 = vpop.f32.mrb[22].mxu0  ;;  %v1641_v39 = vpop.f32.mrb[22].mxu1  ;;  %v2032_v58 = vadd.f32 %v1859_v40, %v587_v31 }
 0x120   :  { %v471_v43 = vadd.f32 %v1609_v37, %v1859_v40  ;;  %v462_v45 = vpop.f32.mrb[23].mxu0  ;;  %v2028_v46 = vadd.f32 %v1641_v39, %v1859_v40  ;;  %v590_v47 = vpop.f32.mrb[23].mxu1  ;;  %v1046_v4 = vmul.f32 %v468_v42, %v468_v42 }
 0x121   :  { %v973_v49 = vadd.f32 %v972_v36, %v460_v35  ;;  %v1044_v50 = vmul.f32 %v460_v35, %v460_v35  ;;  %v1106_v54 = vadd.f32 %v1105_v34, %v1043_v32  ;;  %v463_v55 = vadd.f32 %v1859_v40, %v462_v45 }
 0x122   :  { %v1397_v57 = vpack.c.bf16 %v471_v43, %v468_v42  ;;  %v1477_v59 = vpack.c.bf16 %v2028_v46, %v2019_v29  ;;  %v2043_v1 = vadd.f32 %v1859_v40, %v590_v47  ;;  %v1047_v16 = vmul.f32 %v471_v43, %v471_v43 }
 0x123   :  { %v1107_v60 = vadd.f32 %v1106_v54, %v1044_v50  ;;  %v1392_v62 = vpack.c.bf16 %v463_v55, %v460_v35  ;;  %v974_v63 = vadd.f32 %v973_v49, %v463_v55  ;;  %v1045_v0 = vmul.f32 %v463_v55, %v463_v55 }
 0x124   :  { %1509 = vst [vmem:[%s2222_s3 + $0x58] sm:$0xff] %v1397_v57   ;;  %1525 = vst [vmem:[%s2222_s3 + $0xd8] sm:$0xff] %v1477_v59   ;;  %v1472_v13 = vpack.c.bf16 %v2043_v1, %v2032_v58 }
 0x125   :  { %1508 = vst [vmem:[%s2222_s3 + $0x50] sm:$0xff] %v1392_v62   ;;  %v975_v5 = vadd.f32 %v974_v63, %v468_v42  ;;  %v1108_v7 = vadd.f32 %v1107_v60, %v1045_v0  ;;  %v1612_v8 = vpop.f32.mrb[24].mxu0  ;;  %v1644_v9 = vpop.f32.mrb[24].mxu1 }
 0x126   :  { %v475_v10 = vpop.f32.mrb[25].mxu0  ;;  %v2051_v14 = vadd.f32 %v1644_v9, %v1859_v40  ;;  %v603_v15 = vpop.f32.mrb[25].mxu1  ;;  %v484_v26 = vadd.f32 %v1612_v8, %v1859_v40  ;;  %1524 = vst [vmem:[%s2222_s3 + $0xd0] sm:$0xff] %v1472_v13  }
 0x127   :  { %v1109_v18 = vadd.f32 %v1108_v7, %v1046_v4  ;;  %v476_v20 = vadd.f32 %v1859_v40, %v475_v10  ;;  %v976_v21 = vadd.f32 %v975_v5, %v471_v43  ;;  %v1613_v22 = vpop.f32.mrb[26].mxu0  ;;  %v1645_v23 = vpop.f32.mrb[26].mxu1  ;;  %v2064_v42 = vadd.f32 %v1859_v40, %v603_v15 }
 0x128   :  { %v487_v27 = vadd.f32 %v1613_v22, %v1859_v40  ;;  %v478_v28 = vpop.f32.mrb[27].mxu0  ;;  %v2060_v31 = vadd.f32 %v1645_v23, %v1859_v40  ;;  %v606_v32 = vpop.f32.mrb[27].mxu1  ;;  %v1050_v55 = vmul.f32 %v484_v26, %v484_v26 }
 0x129   :  { %v977_v34 = vadd.f32 %v976_v21, %v476_v20  ;;  %v1048_v35 = vmul.f32 %v476_v20, %v476_v20  ;;  %v1110_v36 = vadd.f32 %v1109_v18, %v1047_v16  ;;  %v479_v37 = vadd.f32 %v1859_v40, %v478_v28 }
 0x12a   :  { %v1407_v39 = vpack.c.bf16 %v487_v27, %v484_v26  ;;  %v1487_v43 = vpack.c.bf16 %v2060_v31, %v2051_v14  ;;  %v2075_v54 = vadd.f32 %v1859_v40, %v606_v32  ;;  %v1051_v7 = vmul.f32 %v487_v27, %v487_v27 }
 0x12b   :  { %v1111_v45 = vadd.f32 %v1110_v36, %v1048_v35  ;;  %v1402_v47 = vpack.c.bf16 %v479_v37, %v476_v20  ;;  %v978_v49 = vadd.f32 %v977_v34, %v479_v37  ;;  %v1049_v50 = vmul.f32 %v479_v37, %v479_v37 }
 0x12c   :  { %1511 = vst [vmem:[%s2222_s3 + $0x68] sm:$0xff] %v1407_v39   ;;  %1527 = vst [vmem:[%s2222_s3 + $0xe8] sm:$0xff] %v1487_v43   ;;  %v1482_v0 = vpack.c.bf16 %v2075_v54, %v2064_v42 }
 0x12d   :  { %1510 = vst [vmem:[%s2222_s3 + $0x60] sm:$0xff] %v1402_v47   ;;  %v979_v57 = vadd.f32 %v978_v49, %v484_v26  ;;  %v1112_v59 = vadd.f32 %v1111_v45, %v1049_v50  ;;  %v1616_v60 = vpop.f32.mrb[28].mxu0  ;;  %v1648_v62 = vpop.f32.mrb[28].mxu1 }
 0x12e   :  { %v491_v63 = vpop.f32.mrb[29].mxu0  ;;  %v2083_v4 = vadd.f32 %v1648_v62, %v1859_v40  ;;  %v619_v5 = vpop.f32.mrb[29].mxu1  ;;  %v500_v16 = vadd.f32 %v1616_v60, %v1859_v40  ;;  %1526 = vst [vmem:[%s2222_s3 + $0xe0] sm:$0xff] %v1482_v0   ;;  %v1056_v62 = vmul.f32 %v1866_v48, %v1866_v48 }
 0x12f   :  { %v1113_v8 = vadd.f32 %v1112_v59, %v1050_v55  ;;  %v492_v9 = vadd.f32 %v1859_v40, %v491_v63  ;;  %v980_v10 = vadd.f32 %v979_v57, %v487_v27  ;;  %v1617_v13 = vpop.f32.mrb[30].mxu0  ;;  %v1649_v15 = vpop.f32.mrb[30].mxu1  ;;  %v2096_v34 = vadd.f32 %v1859_v40, %v619_v5 }
 0x130   :  { %v503_v18 = vadd.f32 %v1617_v13, %v1859_v40  ;;  %v494_v20 = vpop.f32.mrb[31].mxu0  ;;  %v2092_v21 = vadd.f32 %v1649_v15, %v1859_v40  ;;  %v622_v22 = vpop.f32.mrb[31].mxu1  ;;  %v1054_v47 = vmul.f32 %v500_v16, %v500_v16  ;;  %v1059_v13 = vmul.f32 %v1871_v53, %v1871_v53 }
 0x131   :  { %v981_v23 = vadd.f32 %v980_v10, %v492_v9  ;;  %v1052_v26 = vmul.f32 %v492_v9, %v492_v9  ;;  %v1114_v28 = vadd.f32 %v1113_v8, %v1051_v7  ;;  %v495_v27 = vadd.f32 %v1859_v40, %v494_v20 }
 0x132   :  { %v1417_v32 = vpack.c.bf16 %v503_v18, %v500_v16  ;;  %v1497_v35 = vpack.c.bf16 %v2092_v21, %v2083_v4  ;;  %v2107_v45 = vadd.f32 %v1859_v40, %v622_v22  ;;  %v1055_v57 = vmul.f32 %v503_v18, %v503_v18 }
 0x133   :  { %v1115_v36 = vadd.f32 %v1114_v28, %v1052_v26  ;;  %v1412_v37 = vpack.c.bf16 %v495_v27, %v492_v9  ;;  %v982_v39 = vadd.f32 %v981_v23, %v495_v27  ;;  %v1053_v43 = vmul.f32 %v495_v27, %v495_v27 }
 0x134   :  { %1513 = vst [vmem:[%s2222_s3 + $0x78] sm:$0xff] %v1417_v32   ;;  %1529 = vst [vmem:[%s2222_s3 + $0xf8] sm:$0xff] %v1497_v35   ;;  %v1492_v55 = vpack.c.bf16 %v2107_v45, %v2096_v34  ;;  %v1057_v7 = vmul.f32 %v1875_v56, %v1875_v56  ;;  %v1058_v8 = vmul.f32 %v1862_v44, %v1862_v44 }
 0x135   :  { %1512 = vst [vmem:[%s2222_s3 + $0x70] sm:$0xff] %v1412_v37   ;;  %v983_v49 = vadd.f32 %v982_v39, %v500_v16  ;;  %v1116_v50 = vadd.f32 %v1115_v36, %v1053_v43  ;;  %v1061_v23 = vmul.f32 %v1915_v30, %v1915_v30  ;;  %v1065_v39 = vmul.f32 %v1947_v3, %v1947_v3 }
 0x136   :  { %1528 = vst [vmem:[%s2222_s3 + $0xf0] sm:$0xff] %v1492_v55  }
 0x137   :  { %v1117_v59 = vadd.f32 %v1116_v50, %v1054_v47  ;;  %v984_v60 = vadd.f32 %v983_v49, %v503_v18 }
 0x139   :  { %v985_v40 = vadd.f32 %v984_v60, %v1866_v48  ;;  %v1118_v63 = vadd.f32 %v1117_v59, %v1055_v57  ;;  %v1060_v48 = vmul.f32 %v1904_v24, %v1904_v24  ;;  %v1069_v60 = vmul.f32 %v1979_v41, %v1979_v41 }
 0x13b   :  { %v1119_v0 = vadd.f32 %v1118_v63, %v1056_v62  ;;  %v986_v5 = vadd.f32 %v985_v40, %v1875_v56 }
 0x13d   :  { %v987_v9 = vadd.f32 %v986_v5, %v1862_v44  ;;  %v1120_v10 = vadd.f32 %v1119_v0, %v1057_v7  ;;  %v1062_v44 = vmul.f32 %v1894_v6, %v1894_v6 }
 0x13f   :  { %v1121_v15 = vadd.f32 %v1120_v10, %v1058_v8  ;;  %v988_v16 = vadd.f32 %v987_v9, %v1871_v53  ;;  %v1063_v53 = vmul.f32 %v1900_v17, %v1900_v17  ;;  %v1073_v9 = vmul.f32 %v2011_v19, %v2011_v19 }
 0x141   :  { %v989_v18 = vadd.f32 %v988_v16, %v1904_v24  ;;  %v1122_v20 = vadd.f32 %v1121_v15, %v1059_v13  ;;  %v1064_v24 = vmul.f32 %v1936_v61, %v1936_v61 }
 0x143   :  { %v1123_v22 = vadd.f32 %v1122_v20, %v1060_v48  ;;  %v990_v56 = vadd.f32 %v989_v18, %v1915_v30 }
 0x145   :  { %v991_v26 = vadd.f32 %v990_v56, %v1894_v6  ;;  %v1124_v28 = vadd.f32 %v1123_v22, %v1061_v23  ;;  %v1066_v6 = vmul.f32 %v1923_v38, %v1923_v38  ;;  %v1077_v22 = vmul.f32 %v2043_v1, %v2043_v1 }
 0x147   :  { %v1125_v27 = vadd.f32 %v1124_v28, %v1062_v44  ;;  %v992_v32 = vadd.f32 %v991_v26, %v1900_v17  ;;  %v1067_v17 = vmul.f32 %v1932_v52, %v1932_v52 }
 0x149   :  { %v993_v35 = vadd.f32 %v992_v32, %v1936_v61  ;;  %v1126_v36 = vadd.f32 %v1125_v27, %v1063_v53  ;;  %v1068_v61 = vmul.f32 %v1968_v33, %v1968_v33  ;;  %v1081_v32 = vmul.f32 %v2075_v54, %v2075_v54 }
 0x14b   :  { %v1127_v37 = vadd.f32 %v1126_v36, %v1064_v24  ;;  %v994_v30 = vadd.f32 %v993_v35, %v1947_v3 }
 0x14d   :  { %v995_v43 = vadd.f32 %v994_v30, %v1923_v38  ;;  %v1128_v47 = vadd.f32 %v1127_v37, %v1065_v39  ;;  %v1070_v38 = vmul.f32 %v1955_v12, %v1955_v12 }
 0x14f   :  { %v1129_v49 = vadd.f32 %v1128_v47, %v1066_v6  ;;  %v996_v50 = vadd.f32 %v995_v43, %v1932_v52  ;;  %v1071_v52 = vmul.f32 %v1964_v25, %v1964_v25  ;;  %v1085_v43 = vmul.f32 %v2107_v45, %v2107_v45 }
 0x151   :  { %v997_v55 = vadd.f32 %v996_v50, %v1968_v33  ;;  %v1130_v57 = vadd.f32 %v1129_v49, %v1067_v17  ;;  %v1072_v33 = vmul.f32 %v2000_v11, %v2000_v11 }
 0x153   :  { %v1131_v59 = vadd.f32 %v1130_v57, %v1068_v61  ;;  %v998_v3 = vadd.f32 %v997_v55, %v1979_v41 }
 0x155   :  { %v999_v62 = vadd.f32 %v998_v3, %v1955_v12  ;;  %v1132_v40 = vadd.f32 %v1131_v59, %v1069_v60  ;;  %v1074_v12 = vmul.f32 %v1987_v51, %v1987_v51 }
 0x157   :  { %v1133_v63 = vadd.f32 %v1132_v40, %v1070_v38  ;;  %v1000_v0 = vadd.f32 %v999_v62, %v1964_v25  ;;  %v1075_v25 = vmul.f32 %v1996_v2, %v1996_v2 }
 0x159   :  { %v1001_v5 = vadd.f32 %v1000_v0, %v2000_v11  ;;  %v1134_v7 = vadd.f32 %v1133_v63, %v1071_v52  ;;  %v1076_v11 = vmul.f32 %v2032_v58, %v2032_v58 }
 0x15b   :  { %v1135_v8 = vadd.f32 %v1134_v7, %v1072_v33  ;;  %v1002_v41 = vadd.f32 %v1001_v5, %v2011_v19 }
 0x15d   :  { %v1003_v10 = vadd.f32 %v1002_v41, %v1987_v51  ;;  %v1136_v13 = vadd.f32 %v1135_v8, %v1073_v9  ;;  %v1078_v51 = vmul.f32 %v2019_v29, %v2019_v29 }
 0x15f   :  { %v1137_v15 = vadd.f32 %v1136_v13, %v1074_v12  ;;  %v1004_v16 = vadd.f32 %v1003_v10, %v1996_v2  ;;  %v1079_v2 = vmul.f32 %v2028_v46, %v2028_v46 }
 0x161   :  { %v1005_v48 = vadd.f32 %v1004_v16, %v2032_v58  ;;  %v1138_v18 = vadd.f32 %v1137_v15, %v1075_v25  ;;  %v1080_v58 = vmul.f32 %v2064_v42, %v2064_v42 }
 0x163   :  { %v1139_v20 = vadd.f32 %v1138_v18, %v1076_v11  ;;  %v1006_v19 = vadd.f32 %v1005_v48, %v2043_v1 }
 0x165   :  { %v1007_v56 = vadd.f32 %v1006_v19, %v2019_v29  ;;  %v1140_v23 = vadd.f32 %v1139_v20, %v1077_v22  ;;  %v1082_v29 = vmul.f32 %v2051_v14, %v2051_v14 }
 0x167   :  { %v1141_v44 = vadd.f32 %v1140_v23, %v1078_v51  ;;  %v1008_v26 = vadd.f32 %v1007_v56, %v2028_v46  ;;  %v1083_v46 = vmul.f32 %v2060_v31, %v2060_v31 }
 0x169   :  { %v1009_v28 = vadd.f32 %v1008_v26, %v2064_v42  ;;  %v1142_v53 = vadd.f32 %v1141_v44, %v1079_v2  ;;  %v1084_v42 = vmul.f32 %v2096_v34, %v2096_v34 }
 0x16b   :  { %v1143_v27 = vadd.f32 %v1142_v53, %v1080_v58  ;;  %v1010_v1 = vadd.f32 %v1009_v28, %v2075_v54 }
 0x16d   :  { %v1011_v24 = vadd.f32 %v1010_v1, %v2051_v14  ;;  %v1144_v35 = vadd.f32 %v1143_v27, %v1081_v32  ;;  %v1086_v14 = vmul.f32 %v2083_v4, %v2083_v4 }
 0x16f   :  { %v1145_v36 = vadd.f32 %v1144_v35, %v1082_v29  ;;  %v1012_v37 = vadd.f32 %v1011_v24, %v2060_v31  ;;  %v1087_v31 = vmul.f32 %v2092_v21, %v2092_v21 }
 0x171   :  { %v1013_v30 = vadd.f32 %v1012_v37, %v2096_v34  ;;  %v1146_v39 = vadd.f32 %v1145_v36, %v1083_v46 }
 0x173   :  { %v1147_v6 = vadd.f32 %v1146_v39, %v1084_v42  ;;  %v1014_v54 = vadd.f32 %v1013_v30, %v2107_v45 }
 0x175   :  { %v1015_v47 = vadd.f32 %v1014_v54, %v2083_v4  ;;  %v1148_v17 = vadd.f32 %v1147_v6, %v1085_v43 }
 0x177   :  { %v1016_v49 = vadd.f32 %v1015_v47, %v2092_v21  ;;  %v1149_v50 = vadd.f32 %v1148_v17, %v1086_v14 }
 0x179   :  { %v1017_v34 = vrot.slane %v1016_v49, 4  ;;  %v1150_v61 = vadd.f32 %v1149_v50, %v1087_v31 }
 0x17b   :  { %v1018_v55 = vadd.f32 %v1017_v34, %v1016_v49  ;;  %v1151_v57 = vrot.slane %v1150_v61, 4 }
 0x17d   :  { %v1019_v59 = vrot.slane %v1018_v55, 2  ;;  %v1152_v3 = vadd.f32 %v1151_v57, %v1150_v61 }
 0x17f   :  { %v1020_v60 = vadd.f32 %v1019_v59, %v1018_v55  ;;  %v1153_v45 = vrot.slane %v1152_v3, 2 }
 0x181   :  { %v1021_v38 = vrot.slane %v1020_v60, 1  ;;  %v1154_v62 = vadd.f32 %v1153_v45, %v1152_v3 }
 0x183   :  { %v1022_v40 = vadd.f32 %v1021_v38, %v1020_v60  ;;  %v1155_v52 = vrot.slane %v1154_v62, 1 }
 0x185   :  { %1023 = vst [vmem:[%s2223_s4] sm:$0x1] %v1022_v40  ;;  %v1156_v4 = vadd.f32 %v1155_v52, %v1154_v62 }
 0x187   :  { %1157 = vst [vmem:[%s2224_s5] sm:$0x1] %v1156_v4 }

// kernel: discriminator_forward.10
= control target key start
LH: loop header
LB: loop body
LE: loop exit
PB: predicated region body
PF: predicated region fallthrough
CT: control target
= control target key end

     0   :  { %s1631_s0 = inlined_call_operand.vmem [shape: bf16[512,128], index: 0, kind: input, shape index: {}]   ;;  %s1632_s1 = inlined_call_operand.vmem [shape: f32[1,128], index: 1, kind: input, shape index: {}]   ;;  %s1633_s2 = inlined_call_operand.vmem [shape: f32[1,128], index: 2, kind: input, shape index: {}]   ;;  %s1634_s3 = inlined_call_operand.vmem [shape: bf16[512,128], index: 3, kind: output, shape index: {}]  }
   0x1   :  { %v931_v0 = vld [vmem:[%s1631_s0] sm:$0xff]   ;;  %v1218_v4 = vld [vmem:[%s1631_s0 + $0x8] sm:$0xff]   ;;  %v1219_v5 = vld [vmem:[%s1631_s0 + $0x10] sm:$0xff]  }
   0x2   :  { %v1306_v1 = vld [vmem:[%s1632_s1] ss:$0 sm:$0xff]  ;;  %v932_v2 = vunpack.c.l.bf16 %v931_v0  ;;  %v933_v3 = vunpack.c.h.bf16 %v931_v0  ;;  %v1220_v6 = vld [vmem:[%s1631_s0 + $0x18] sm:$0xff]   ;;  %v936_v8 = vunpack.c.l.bf16 %v1218_v4  ;;  %v937_v9 = vunpack.c.h.bf16 %v1218_v4  ;;  %v1222_v35 = vld [vmem:[%s1631_s0 + $0x28] sm:$0xff]  }
   0x3   :  { %v1320_v7 = vld [vmem:[%s1633_s2] ss:$0 sm:$0xff]  ;;  %v940_v10 = vunpack.c.l.bf16 %v1219_v5  ;;  %v941_v11 = vunpack.c.h.bf16 %v1219_v5  ;;  %v944_v14 = vunpack.c.l.bf16 %v1220_v6  ;;  %v945_v15 = vunpack.c.h.bf16 %v1220_v6  ;;  %v1223_v48 = vld [vmem:[%s1631_s0 + $0x30] sm:$0xff]   ;;  %v1224_v4 = vld [vmem:[%s1631_s0 + $0x38] sm:$0xff]  }
   0x4   :  { %v149_v12 = vmul.f32 %v932_v2, %v1306_v1  ;;  %v150_v13 = vmul.f32 %v933_v3, %v1306_v1  ;;  %v151_v16 = vmul.f32 %v936_v8, %v1306_v1  ;;  %v152_v17 = vmul.f32 %v937_v9, %v1306_v1  ;;  %v1221_v34 = vld [vmem:[%s1631_s0 + $0x20] sm:$0xff]  }
   0x5   :  { %v153_v18 = vmul.f32 %v940_v10, %v1306_v1  ;;  %v154_v19 = vmul.f32 %v941_v11, %v1306_v1  ;;  %v155_v22 = vmul.f32 %v944_v14, %v1306_v1  ;;  %v156_v23 = vmul.f32 %v945_v15, %v1306_v1  ;;  %v1225_v15 = vld [vmem:[%s1631_s0 + $0x40] sm:$0xff]  }
   0x6   :  { %v220_v20 = vadd.f32 %v1320_v7, %v149_v12  ;;  %v221_v21 = vadd.f32 %v1320_v7, %v150_v13  ;;  %v222_v24 = vadd.f32 %v1320_v7, %v151_v16  ;;  %v223_v25 = vadd.f32 %v1320_v7, %v152_v17 }
   0x7   :  { %v224_v26 = vadd.f32 %v1320_v7, %v153_v18  ;;  %v225_v27 = vadd.f32 %v1320_v7, %v154_v19  ;;  %v226_v42 = vadd.f32 %v1320_v7, %v155_v22  ;;  %v227_v43 = vadd.f32 %v1320_v7, %v156_v23 }
   0x8   :  { %vm284_vm0 = vcmp.ge.f32.partialorder %v220_v20, 0.0  ;;  %vm285_vm1 = vcmp.ge.f32.partialorder %v221_v21, 0.0  ;;  %v348_v28 = vmul.f32 0.2, %v220_v20  ;;  %v349_v29 = vmul.f32 0.2, %v221_v21 }
   0x9   :  { %vm286_vm2 = vcmp.ge.f32.partialorder %v222_v24, 0.0  ;;  %vm287_vm3 = vcmp.ge.f32.partialorder %v223_v25, 0.0  ;;  %v350_v30 = vmul.f32 0.2, %v222_v24  ;;  %v351_v31 = vmul.f32 0.2, %v223_v25 }
   0xa   :  { %v412_v32 = vsel %vm284_vm0, %v220_v20, %v348_v28  ;;  %v413_v33 = vsel %vm285_vm1, %v221_v21, %v349_v29  ;;  %vm288_vm4 = vcmp.ge.f32.partialorder %v224_v26, 0.0  ;;  %vm289_vm5 = vcmp.ge.f32.partialorder %v225_v27, 0.0 }
   0xb   :  { %v1061_v36 = vpack.c.bf16 %v413_v33, %v412_v32  ;;  %v414_v37 = vsel %vm286_vm2, %v222_v24, %v350_v30  ;;  %v415_v38 = vsel %vm287_vm3, %v223_v25, %v351_v31  ;;  %v352_v39 = vmul.f32 0.2, %v224_v26 }
   0xc   :  { %v1066_v40 = vpack.c.bf16 %v415_v38, %v414_v37  ;;  %v353_v41 = vmul.f32 0.2, %v225_v27  ;;  %v948_v45 = vunpack.c.l.bf16 %v1221_v34  ;;  %v949_v46 = vunpack.c.h.bf16 %v1221_v34 }
   0xd   :  { %1062 = vst [vmem:[%s1634_s3] sm:$0xff] %v1061_v36   ;;  %v416_v44 = vsel %vm288_vm4, %v224_v26, %v352_v39  ;;  %v952_v47 = vunpack.c.l.bf16 %v1222_v35  ;;  %vm290_vm6 = vcmp.ge.f32.partialorder %v226_v42, 0.0  ;;  %vm291_vm7 = vcmp.ge.f32.partialorder %v227_v43, 0.0  ;;  %v1226_v26 = vld [vmem:[%s1631_s0 + $0x48] sm:$0xff]  }
   0xe   :  { %1249 = vst [vmem:[%s1634_s3 + $0x8] sm:$0xff] %v1066_v40   ;;  %v417_v49 = vsel %vm289_vm5, %v225_v27, %v353_v41  ;;  %v354_v50 = vmul.f32 0.2, %v226_v42  ;;  %v355_v52 = vmul.f32 0.2, %v227_v43  ;;  %v157_v53 = vmul.f32 %v948_v45, %v1306_v1  ;;  %v1227_v27 = vld [vmem:[%s1631_s0 + $0x50] sm:$0xff]  }
   0xf   :  { %v1071_v51 = vpack.c.bf16 %v417_v49, %v416_v44  ;;  %v158_v54 = vmul.f32 %v949_v46, %v1306_v1  ;;  %v953_v56 = vunpack.c.h.bf16 %v1222_v35  ;;  %v159_v57 = vmul.f32 %v952_v47, %v1306_v1 }
  0x10   :  { %v418_v55 = vsel %vm290_vm6, %v226_v42, %v354_v50  ;;  %v956_v58 = vunpack.c.l.bf16 %v1223_v48  ;;  %v419_v59 = vsel %vm291_vm7, %v227_v43, %v355_v52  ;;  %v228_v60 = vadd.f32 %v1320_v7, %v157_v53 }
  0x11   :  { %1250 = vst [vmem:[%s1634_s3 + $0x10] sm:$0xff] %v1071_v51   ;;  %v229_v61 = vadd.f32 %v1320_v7, %v158_v54  ;;  %v957_v62 = vunpack.c.h.bf16 %v1223_v48  ;;  %v1076_v63 = vpack.c.bf16 %v419_v59, %v418_v55  ;;  %v160_v0 = vmul.f32 %v953_v56, %v1306_v1  ;;  %v1228_v55 = vld [vmem:[%s1631_s0 + $0x58] sm:$0xff]  }
  0x12   :  { %v230_v2 = vadd.f32 %v1320_v7, %v159_v57  ;;  %v161_v3 = vmul.f32 %v956_v58, %v1306_v1  ;;  %vm292_vm8 = vcmp.ge.f32.partialorder %v228_v60, 0.0  ;;  %v356_v5 = vmul.f32 0.2, %v228_v60 }
  0x13   :  { %vm293_vm9 = vcmp.ge.f32.partialorder %v229_v61, 0.0  ;;  %v357_v6 = vmul.f32 0.2, %v229_v61  ;;  %1251 = vst [vmem:[%s1634_s3 + $0x18] sm:$0xff] %v1076_v63   ;;  %v231_v8 = vadd.f32 %v1320_v7, %v160_v0  ;;  %v162_v10 = vmul.f32 %v957_v62, %v1306_v1 }
  0x14   :  { %vm294_vm10 = vcmp.ge.f32.partialorder %v230_v2, 0.0  ;;  %v358_v9 = vmul.f32 0.2, %v230_v2  ;;  %v420_v11 = vsel %vm292_vm8, %v228_v60, %v356_v5  ;;  %v232_v13 = vadd.f32 %v1320_v7, %v161_v3  ;;  %v1229_v60 = vld [vmem:[%s1631_s0 + $0x60] sm:$0xff]  }
  0x15   :  { %v421_v12 = vsel %vm293_vm9, %v229_v61, %v357_v6  ;;  %v960_v14 = vunpack.c.l.bf16 %v1224_v4  ;;  %vm295_vm11 = vcmp.ge.f32.partialorder %v231_v8, 0.0  ;;  %v359_v17 = vmul.f32 0.2, %v231_v8 }
  0x16   :  { %v1081_v16 = vpack.c.bf16 %v421_v12, %v420_v11  ;;  %v422_v18 = vsel %vm294_vm10, %v230_v2, %v358_v9  ;;  %v233_v19 = vadd.f32 %v1320_v7, %v162_v10  ;;  %vm296_vm12 = vcmp.ge.f32.partialorder %v232_v13, 0.0  ;;  %v1230_v9 = vld [vmem:[%s1631_s0 + $0x68] sm:$0xff]  }
  0x17   :  { %v360_v20 = vmul.f32 0.2, %v232_v13  ;;  %v961_v21 = vunpack.c.h.bf16 %v1224_v4  ;;  %v423_v22 = vsel %vm295_vm11, %v231_v8, %v359_v17  ;;  %v163_v23 = vmul.f32 %v960_v14, %v1306_v1 }
  0x18   :  { %1252 = vst [vmem:[%s1634_s3 + $0x20] sm:$0xff] %v1081_v16   ;;  %v964_v24 = vunpack.c.l.bf16 %v1225_v15  ;;  %v965_v25 = vunpack.c.h.bf16 %v1225_v15  ;;  %v1086_v28 = vpack.c.bf16 %v423_v22, %v422_v18  ;;  %vm297_vm13 = vcmp.ge.f32.partialorder %v233_v19, 0.0 }
  0x19   :  { %v361_v29 = vmul.f32 0.2, %v233_v19  ;;  %v424_v30 = vsel %vm296_vm12, %v232_v13, %v360_v20  ;;  %v164_v31 = vmul.f32 %v961_v21, %v1306_v1  ;;  %v234_v32 = vadd.f32 %v1320_v7, %v163_v23 }
  0x1a   :  { %v165_v33 = vmul.f32 %v964_v24, %v1306_v1  ;;  %v166_v34 = vmul.f32 %v965_v25, %v1306_v1  ;;  %1253 = vst [vmem:[%s1634_s3 + $0x28] sm:$0xff] %v1086_v28   ;;  %v968_v36 = vunpack.c.l.bf16 %v1226_v26  ;;  %v969_v37 = vunpack.c.h.bf16 %v1226_v26  ;;  %v1231_v28 = vld [vmem:[%s1631_s0 + $0x70] sm:$0xff]  }
  0x1b   :  { %v425_v35 = vsel %vm297_vm13, %v233_v19, %v361_v29  ;;  %v972_v38 = vunpack.c.l.bf16 %v1227_v27  ;;  %v235_v40 = vadd.f32 %v1320_v7, %v164_v31  ;;  %vm298_vm14 = vcmp.ge.f32.partialorder %v234_v32, 0.0 }
  0x1c   :  { %v1091_v39 = vpack.c.bf16 %v425_v35, %v424_v30  ;;  %v362_v41 = vmul.f32 0.2, %v234_v32  ;;  %v236_v42 = vadd.f32 %v1320_v7, %v165_v33  ;;  %v237_v43 = vadd.f32 %v1320_v7, %v166_v34 }
  0x1d   :  { %v167_v44 = vmul.f32 %v968_v36, %v1306_v1  ;;  %v168_v45 = vmul.f32 %v969_v37, %v1306_v1  ;;  %vm299_vm15 = vcmp.ge.f32.partialorder %v235_v40, 0.0  ;;  %v363_v46 = vmul.f32 0.2, %v235_v40  ;;  %v1232_v37 = vld [vmem:[%s1631_s0 + $0x78] sm:$0xff]  }
  0x1e   :  { %1254 = vst [vmem:[%s1634_s3 + $0x30] sm:$0xff] %v1091_v39   ;;  %v426_v47 = vsel %vm298_vm14, %v234_v32, %v362_v41  ;;  %v973_v48 = vunpack.c.h.bf16 %v1227_v27  ;;  %vm300_vm0 = vcmp.ge.f32.partialorder %v236_v42, 0.0  ;;  %vm301_vm1 = vcmp.ge.f32.partialorder %v237_v43, 0.0 }
  0x1f   :  { %v364_v49 = vmul.f32 0.2, %v236_v42  ;;  %v365_v50 = vmul.f32 0.2, %v237_v43  ;;  %v427_v51 = vsel %vm299_vm15, %v235_v40, %v363_v46  ;;  %v238_v52 = vadd.f32 %v1320_v7, %v167_v44 }
  0x20   :  { %v239_v53 = vadd.f32 %v1320_v7, %v168_v45  ;;  %v169_v54 = vmul.f32 %v972_v38, %v1306_v1  ;;  %v1096_v56 = vpack.c.bf16 %v427_v51, %v426_v47  ;;  %v170_v59 = vmul.f32 %v973_v48, %v1306_v1 }
  0x21   :  { %v428_v57 = vsel %vm300_vm0, %v236_v42, %v364_v49  ;;  %v429_v58 = vsel %vm301_vm1, %v237_v43, %v365_v50  ;;  %vm302_vm2 = vcmp.ge.f32.partialorder %v238_v52, 0.0  ;;  %v366_v62 = vmul.f32 0.2, %v238_v52  ;;  %v1233_v42 = vld [vmem:[%s1631_s0 + $0x80] sm:$0xff]   ;;  %v1234_v50 = vld [vmem:[%s1631_s0 + $0x88] sm:$0xff]  }
  0x22   :  { %v1101_v61 = vpack.c.bf16 %v429_v58, %v428_v57  ;;  %vm303_vm3 = vcmp.ge.f32.partialorder %v239_v53, 0.0  ;;  %1255 = vst [vmem:[%s1634_s3 + $0x38] sm:$0xff] %v1096_v56   ;;  %v367_v63 = vmul.f32 0.2, %v239_v53  ;;  %v240_v0 = vadd.f32 %v1320_v7, %v169_v54 }
  0x23   :  { %v241_v2 = vadd.f32 %v1320_v7, %v170_v59  ;;  %v976_v3 = vunpack.c.l.bf16 %v1228_v55  ;;  %v430_v4 = vsel %vm302_vm2, %v238_v52, %v366_v62  ;;  %v977_v5 = vunpack.c.h.bf16 %v1228_v55 }
  0x24   :  { %1256 = vst [vmem:[%s1634_s3 + $0x40] sm:$0xff] %v1101_v61   ;;  %v980_v6 = vunpack.c.l.bf16 %v1229_v60  ;;  %v981_v8 = vunpack.c.h.bf16 %v1229_v60  ;;  %v431_v10 = vsel %vm303_vm3, %v239_v53, %v367_v63  ;;  %vm304_vm4 = vcmp.ge.f32.partialorder %v240_v0, 0.0 }
  0x25   :  { %vm305_vm5 = vcmp.ge.f32.partialorder %v241_v2, 0.0  ;;  %v368_v11 = vmul.f32 0.2, %v240_v0  ;;  %v1106_v12 = vpack.c.bf16 %v431_v10, %v430_v4  ;;  %v369_v13 = vmul.f32 0.2, %v241_v2 }
  0x26   :  { %v171_v14 = vmul.f32 %v976_v3, %v1306_v1  ;;  %v172_v15 = vmul.f32 %v977_v5, %v1306_v1  ;;  %v173_v17 = vmul.f32 %v980_v6, %v1306_v1  ;;  %v174_v18 = vmul.f32 %v981_v8, %v1306_v1 }
  0x27   :  { %v432_v16 = vsel %vm304_vm4, %v240_v0, %v368_v11  ;;  %v984_v19 = vunpack.c.l.bf16 %v1230_v9  ;;  %1257 = vst [vmem:[%s1634_s3 + $0x48] sm:$0xff] %v1106_v12   ;;  %v433_v20 = vsel %vm305_vm5, %v241_v2, %v369_v13  ;;  %v985_v23 = vunpack.c.h.bf16 %v1230_v9 }
  0x28   :  { %v242_v21 = vadd.f32 %v1320_v7, %v171_v14  ;;  %v243_v22 = vadd.f32 %v1320_v7, %v172_v15  ;;  %v1111_v24 = vpack.c.bf16 %v433_v20, %v432_v16  ;;  %v244_v25 = vadd.f32 %v1320_v7, %v173_v17  ;;  %v1235_v15 = vld [vmem:[%s1631_s0 + $0x90] sm:$0xff]   ;;  %v1236_v20 = vld [vmem:[%s1631_s0 + $0x98] sm:$0xff]  }
  0x29   :  { %v245_v26 = vadd.f32 %v1320_v7, %v174_v18  ;;  %v175_v27 = vmul.f32 %v984_v19, %v1306_v1  ;;  %v176_v35 = vmul.f32 %v985_v23, %v1306_v1  ;;  %v988_v41 = vunpack.c.l.bf16 %v1231_v28 }
  0x2a   :  { %vm306_vm6 = vcmp.ge.f32.partialorder %v242_v21, 0.0  ;;  %vm307_vm7 = vcmp.ge.f32.partialorder %v243_v22, 0.0  ;;  %v370_v29 = vmul.f32 0.2, %v242_v21  ;;  %v371_v30 = vmul.f32 0.2, %v243_v22 }
  0x2b   :  { %1258 = vst [vmem:[%s1634_s3 + $0x50] sm:$0xff] %v1111_v24   ;;  %vm308_vm8 = vcmp.ge.f32.partialorder %v244_v25, 0.0  ;;  %vm309_vm9 = vcmp.ge.f32.partialorder %v245_v26, 0.0  ;;  %v372_v31 = vmul.f32 0.2, %v244_v25  ;;  %v246_v36 = vadd.f32 %v1320_v7, %v175_v27 }
  0x2c   :  { %v373_v32 = vmul.f32 0.2, %v245_v26  ;;  %v434_v33 = vsel %vm306_vm6, %v242_v21, %v370_v29  ;;  %v435_v34 = vsel %vm307_vm7, %v243_v22, %v371_v30  ;;  %v247_v44 = vadd.f32 %v1320_v7, %v176_v35  ;;  %v1237_v21 = vld [vmem:[%s1631_s0 + $0xa0] sm:$0xff]  }
  0x2d   :  { %v1116_v38 = vpack.c.bf16 %v435_v34, %v434_v33  ;;  %v436_v39 = vsel %vm308_vm8, %v244_v25, %v372_v31  ;;  %vm310_vm10 = vcmp.ge.f32.partialorder %v246_v36, 0.0  ;;  %v374_v45 = vmul.f32 0.2, %v246_v36 }
  0x2e   :  { %v437_v40 = vsel %vm309_vm9, %v245_v26, %v373_v32  ;;  %v989_v46 = vunpack.c.h.bf16 %v1231_v28  ;;  %v177_v47 = vmul.f32 %v988_v41, %v1306_v1  ;;  %v992_v48 = vunpack.c.l.bf16 %v1232_v37 }
  0x2f   :  { %v1121_v43 = vpack.c.bf16 %v437_v40, %v436_v39  ;;  %1259 = vst [vmem:[%s1634_s3 + $0x58] sm:$0xff] %v1116_v38   ;;  %v993_v49 = vunpack.c.h.bf16 %v1232_v37  ;;  %vm311_vm11 = vcmp.ge.f32.partialorder %v247_v44, 0.0  ;;  %v375_v51 = vmul.f32 0.2, %v247_v44  ;;  %v1238_v40 = vld [vmem:[%s1631_s0 + $0xa8] sm:$0xff]  }
  0x30   :  { %v438_v52 = vsel %vm310_vm10, %v246_v36, %v374_v45  ;;  %v996_v53 = vunpack.c.l.bf16 %v1233_v42  ;;  %v178_v54 = vmul.f32 %v989_v46, %v1306_v1  ;;  %v248_v55 = vadd.f32 %v1320_v7, %v177_v47 }
  0x31   :  { %1260 = vst [vmem:[%s1634_s3 + $0x60] sm:$0xff] %v1121_v43   ;;  %v179_v56 = vmul.f32 %v992_v48, %v1306_v1  ;;  %v180_v57 = vmul.f32 %v993_v49, %v1306_v1  ;;  %v439_v58 = vsel %vm311_vm11, %v247_v44, %v375_v51  ;;  %v997_v59 = vunpack.c.h.bf16 %v1233_v42 }
  0x32   :  { %v181_v60 = vmul.f32 %v996_v53, %v1306_v1  ;;  %v1000_v61 = vunpack.c.l.bf16 %v1234_v50  ;;  %v1126_v62 = vpack.c.bf16 %v439_v58, %v438_v52  ;;  %v249_v63 = vadd.f32 %v1320_v7, %v178_v54 }
  0x33   :  { %vm312_vm12 = vcmp.ge.f32.partialorder %v248_v55, 0.0  ;;  %v376_v0 = vmul.f32 0.2, %v248_v55  ;;  %v250_v2 = vadd.f32 %v1320_v7, %v179_v56  ;;  %v251_v3 = vadd.f32 %v1320_v7, %v180_v57 }
  0x34   :  { %v182_v4 = vmul.f32 %v997_v59, %v1306_v1  ;;  %v252_v5 = vadd.f32 %v1320_v7, %v181_v60  ;;  %1261 = vst [vmem:[%s1634_s3 + $0x68] sm:$0xff] %v1126_v62   ;;  %vm313_vm13 = vcmp.ge.f32.partialorder %v249_v63, 0.0  ;;  %v377_v6 = vmul.f32 0.2, %v249_v63 }
  0x35   :  { %v440_v8 = vsel %vm312_vm12, %v248_v55, %v376_v0  ;;  %v1001_v9 = vunpack.c.h.bf16 %v1234_v50  ;;  %vm314_vm14 = vcmp.ge.f32.partialorder %v250_v2, 0.0  ;;  %vm315_vm15 = vcmp.ge.f32.partialorder %v251_v3, 0.0  ;;  %v1239_v0 = vld [vmem:[%s1631_s0 + $0xb0] sm:$0xff]  }
  0x36   :  { %v378_v10 = vmul.f32 0.2, %v250_v2  ;;  %v379_v11 = vmul.f32 0.2, %v251_v3  ;;  %v441_v12 = vsel %vm313_vm13, %v249_v63, %v377_v6  ;;  %v253_v13 = vadd.f32 %v1320_v7, %v182_v4 }
  0x37   :  { %vm316_vm0 = vcmp.ge.f32.partialorder %v252_v5, 0.0  ;;  %v380_v14 = vmul.f32 0.2, %v252_v5  ;;  %v1131_v16 = vpack.c.bf16 %v441_v12, %v440_v8  ;;  %v183_v19 = vmul.f32 %v1000_v61, %v1306_v1 }
  0x38   :  { %v442_v17 = vsel %vm314_vm14, %v250_v2, %v378_v10  ;;  %v443_v18 = vsel %vm315_vm15, %v251_v3, %v379_v11  ;;  %vm317_vm1 = vcmp.ge.f32.partialorder %v253_v13, 0.0  ;;  %v381_v23 = vmul.f32 0.2, %v253_v13  ;;  %v1240_v2 = vld [vmem:[%s1631_s0 + $0xb8] sm:$0xff]  }
  0x39   :  { %v1136_v22 = vpack.c.bf16 %v443_v18, %v442_v17  ;;  %v444_v24 = vsel %vm316_vm0, %v252_v5, %v380_v14  ;;  %1262 = vst [vmem:[%s1634_s3 + $0x70] sm:$0xff] %v1131_v16   ;;  %v184_v25 = vmul.f32 %v1001_v9, %v1306_v1  ;;  %v254_v26 = vadd.f32 %v1320_v7, %v183_v19  ;;  %v1241_v18 = vld [vmem:[%s1631_s0 + $0xc0] sm:$0xff]  }
  0x3a   :  { %v1004_v27 = vunpack.c.l.bf16 %v1235_v15  ;;  %v1005_v28 = vunpack.c.h.bf16 %v1235_v15  ;;  %v445_v29 = vsel %vm317_vm1, %v253_v13, %v381_v23  ;;  %v1008_v30 = vunpack.c.l.bf16 %v1236_v20 }
  0x3b   :  { %1263 = vst [vmem:[%s1634_s3 + $0x78] sm:$0xff] %v1136_v22   ;;  %v1009_v31 = vunpack.c.h.bf16 %v1236_v20  ;;  %v1012_v32 = vunpack.c.l.bf16 %v1237_v21  ;;  %v1141_v33 = vpack.c.bf16 %v445_v29, %v444_v24  ;;  %v255_v34 = vadd.f32 %v1320_v7, %v184_v25 }
  0x3c   :  { %vm318_vm2 = vcmp.ge.f32.partialorder %v254_v26, 0.0  ;;  %v382_v35 = vmul.f32 0.2, %v254_v26  ;;  %v185_v36 = vmul.f32 %v1004_v27, %v1306_v1  ;;  %v186_v37 = vmul.f32 %v1005_v28, %v1306_v1 }
  0x3d   :  { %v187_v38 = vmul.f32 %v1008_v30, %v1306_v1  ;;  %v188_v39 = vmul.f32 %v1009_v31, %v1306_v1  ;;  %1264 = vst [vmem:[%s1634_s3 + $0x80] sm:$0xff] %v1141_v33   ;;  %vm319_vm3 = vcmp.ge.f32.partialorder %v255_v34, 0.0  ;;  %v383_v41 = vmul.f32 0.2, %v255_v34 }
  0x3e   :  { %v446_v42 = vsel %vm318_vm2, %v254_v26, %v382_v35  ;;  %v1013_v43 = vunpack.c.h.bf16 %v1237_v21  ;;  %v256_v44 = vadd.f32 %v1320_v7, %v185_v36  ;;  %v257_v45 = vadd.f32 %v1320_v7, %v186_v37  ;;  %v1242_v36 = vld [vmem:[%s1631_s0 + $0xc8] sm:$0xff]  }
  0x3f   :  { %v258_v46 = vadd.f32 %v1320_v7, %v187_v38  ;;  %v259_v47 = vadd.f32 %v1320_v7, %v188_v39  ;;  %v447_v48 = vsel %vm319_vm3, %v255_v34, %v383_v41  ;;  %v189_v49 = vmul.f32 %v1012_v32, %v1306_v1 }
  0x40   :  { %v190_v50 = vmul.f32 %v1013_v43, %v1306_v1  ;;  %v1016_v51 = vunpack.c.l.bf16 %v1238_v40  ;;  %v1146_v52 = vpack.c.bf16 %v447_v48, %v446_v42  ;;  %vm320_vm4 = vcmp.ge.f32.partialorder %v256_v44, 0.0  ;;  %v1243_v42 = vld [vmem:[%s1631_s0 + $0xd0] sm:$0xff]  }
  0x41   :  { %vm321_vm5 = vcmp.ge.f32.partialorder %v257_v45, 0.0  ;;  %v384_v53 = vmul.f32 0.2, %v256_v44  ;;  %v385_v54 = vmul.f32 0.2, %v257_v45  ;;  %vm322_vm6 = vcmp.ge.f32.partialorder %v258_v46, 0.0 }
  0x42   :  { %vm323_vm7 = vcmp.ge.f32.partialorder %v259_v47, 0.0  ;;  %v386_v55 = vmul.f32 0.2, %v258_v46  ;;  %1265 = vst [vmem:[%s1634_s3 + $0x88] sm:$0xff] %v1146_v52   ;;  %v387_v57 = vmul.f32 0.2, %v259_v47  ;;  %v260_v58 = vadd.f32 %v1320_v7, %v189_v49 }
  0x43   :  { %v448_v56 = vsel %vm320_vm4, %v256_v44, %v384_v53  ;;  %v261_v59 = vadd.f32 %v1320_v7, %v190_v50  ;;  %v449_v60 = vsel %vm321_vm5, %v257_v45, %v385_v54  ;;  %v1017_v62 = vunpack.c.h.bf16 %v1238_v40 }
  0x44   :  { %v450_v61 = vsel %vm322_vm6, %v258_v46, %v386_v55  ;;  %v191_v63 = vmul.f32 %v1016_v51, %v1306_v1  ;;  %v1151_v3 = vpack.c.bf16 %v449_v60, %v448_v56  ;;  %v451_v4 = vsel %vm323_vm7, %v259_v47, %v387_v57  ;;  %v1244_v55 = vld [vmem:[%s1631_s0 + $0xd8] sm:$0xff]  }
  0x45   :  { %vm324_vm8 = vcmp.ge.f32.partialorder %v260_v58, 0.0  ;;  %vm325_vm9 = vcmp.ge.f32.partialorder %v261_v59, 0.0  ;;  %v1156_v5 = vpack.c.bf16 %v451_v4, %v450_v61  ;;  %v388_v6 = vmul.f32 0.2, %v260_v58 }
  0x46   :  { %v389_v8 = vmul.f32 0.2, %v261_v59  ;;  %v192_v9 = vmul.f32 %v1017_v62, %v1306_v1  ;;  %1266 = vst [vmem:[%s1634_s3 + $0x90] sm:$0xff] %v1151_v3   ;;  %v262_v10 = vadd.f32 %v1320_v7, %v191_v63  ;;  %v1020_v11 = vunpack.c.l.bf16 %v1239_v0 }
  0x47   :  { %v1021_v12 = vunpack.c.h.bf16 %v1239_v0  ;;  %v1024_v13 = vunpack.c.l.bf16 %v1240_v2  ;;  %1267 = vst [vmem:[%s1634_s3 + $0x98] sm:$0xff] %v1156_v5   ;;  %v452_v14 = vsel %vm324_vm8, %v260_v58, %v388_v6  ;;  %v1025_v17 = vunpack.c.h.bf16 %v1240_v2 }
  0x48   :  { %v453_v15 = vsel %vm325_vm9, %v261_v59, %v389_v8  ;;  %v263_v16 = vadd.f32 %v1320_v7, %v192_v9  ;;  %vm326_vm10 = vcmp.ge.f32.partialorder %v262_v10, 0.0  ;;  %v390_v20 = vmul.f32 0.2, %v262_v10 }
  0x49   :  { %v1161_v19 = vpack.c.bf16 %v453_v15, %v452_v14  ;;  %v193_v21 = vmul.f32 %v1020_v11, %v1306_v1  ;;  %v194_v23 = vmul.f32 %v1021_v12, %v1306_v1  ;;  %v195_v24 = vmul.f32 %v1024_v13, %v1306_v1  ;;  %v1246_v14 = vld [vmem:[%s1631_s0 + $0xe8] sm:$0xff]  }
  0x4a   :  { %vm327_vm11 = vcmp.ge.f32.partialorder %v263_v16, 0.0  ;;  %v391_v22 = vmul.f32 0.2, %v263_v16  ;;  %v454_v25 = vsel %vm326_vm10, %v262_v10, %v390_v20  ;;  %v196_v27 = vmul.f32 %v1025_v17, %v1306_v1  ;;  %v1245_v10 = vld [vmem:[%s1631_s0 + $0xe0] sm:$0xff]  }
  0x4b   :  { %1268 = vst [vmem:[%s1634_s3 + $0xa0] sm:$0xff] %v1161_v19   ;;  %v264_v26 = vadd.f32 %v1320_v7, %v193_v21  ;;  %v1028_v28 = vunpack.c.l.bf16 %v1241_v18  ;;  %v265_v30 = vadd.f32 %v1320_v7, %v194_v23  ;;  %v266_v31 = vadd.f32 %v1320_v7, %v195_v24 }
  0x4c   :  { %v455_v29 = vsel %vm327_vm11, %v263_v16, %v391_v22  ;;  %v1029_v32 = vunpack.c.h.bf16 %v1241_v18  ;;  %v267_v35 = vadd.f32 %v1320_v7, %v196_v27  ;;  %v1032_v46 = vunpack.c.l.bf16 %v1242_v36 }
  0x4d   :  { %v1166_v33 = vpack.c.bf16 %v455_v29, %v454_v25  ;;  %vm328_vm12 = vcmp.ge.f32.partialorder %v264_v26, 0.0  ;;  %v392_v34 = vmul.f32 0.2, %v264_v26  ;;  %vm329_vm13 = vcmp.ge.f32.partialorder %v265_v30, 0.0 }
  0x4e   :  { %v393_v37 = vmul.f32 0.2, %v265_v30  ;;  %vm330_vm14 = vcmp.ge.f32.partialorder %v266_v31, 0.0  ;;  %v394_v38 = vmul.f32 0.2, %v266_v31  ;;  %vm331_vm15 = vcmp.ge.f32.partialorder %v267_v35, 0.0 }
  0x4f   :  { %1269 = vst [vmem:[%s1634_s3 + $0xa8] sm:$0xff] %v1166_v33   ;;  %v456_v39 = vsel %vm328_vm12, %v264_v26, %v392_v34  ;;  %v395_v40 = vmul.f32 0.2, %v267_v35  ;;  %v197_v41 = vmul.f32 %v1028_v28, %v1306_v1  ;;  %v198_v45 = vmul.f32 %v1029_v32, %v1306_v1 }
  0x50   :  { %v457_v43 = vsel %vm329_vm13, %v265_v30, %v393_v37  ;;  %v458_v44 = vsel %vm330_vm14, %v266_v31, %v394_v38  ;;  %v1033_v50 = vunpack.c.h.bf16 %v1242_v36  ;;  %v199_v53 = vmul.f32 %v1032_v46, %v1306_v1  ;;  %v1247_v30 = vld [vmem:[%s1631_s0 + $0xf0] sm:$0xff]  }
  0x51   :  { %v1171_v47 = vpack.c.bf16 %v457_v43, %v456_v39  ;;  %v459_v48 = vsel %vm331_vm15, %v267_v35, %v395_v40  ;;  %v268_v49 = vadd.f32 %v1320_v7, %v197_v41  ;;  %v269_v52 = vadd.f32 %v1320_v7, %v198_v45 }
  0x52   :  { %v1176_v51 = vpack.c.bf16 %v459_v48, %v458_v44  ;;  %v1036_v54 = vunpack.c.l.bf16 %v1243_v42  ;;  %v200_v57 = vmul.f32 %v1033_v50, %v1306_v1  ;;  %v1037_v58 = vunpack.c.h.bf16 %v1243_v42  ;;  %v1248_v44 = vld [vmem:[%s1631_s0 + $0xf8] sm:$0xff]  }
  0x53   :  { %1270 = vst [vmem:[%s1634_s3 + $0xb0] sm:$0xff] %v1171_v47   ;;  %vm332_vm0 = vcmp.ge.f32.partialorder %v268_v49, 0.0  ;;  %v396_v56 = vmul.f32 0.2, %v268_v49  ;;  %vm333_vm1 = vcmp.ge.f32.partialorder %v269_v52, 0.0  ;;  %v270_v60 = vadd.f32 %v1320_v7, %v199_v53 }
  0x54   :  { %1271 = vst [vmem:[%s1634_s3 + $0xb8] sm:$0xff] %v1176_v51   ;;  %v397_v59 = vmul.f32 0.2, %v269_v52  ;;  %v201_v61 = vmul.f32 %v1036_v54, %v1306_v1  ;;  %v271_v63 = vadd.f32 %v1320_v7, %v200_v57  ;;  %v202_v0 = vmul.f32 %v1037_v58, %v1306_v1 }
  0x55   :  { %v460_v62 = vsel %vm332_vm0, %v268_v49, %v396_v56  ;;  %v1040_v2 = vunpack.c.l.bf16 %v1244_v55  ;;  %vm334_vm2 = vcmp.ge.f32.partialorder %v270_v60, 0.0  ;;  %v398_v4 = vmul.f32 0.2, %v270_v60 }
  0x56   :  { %v461_v3 = vsel %vm333_vm1, %v269_v52, %v397_v59  ;;  %v272_v5 = vadd.f32 %v1320_v7, %v201_v61  ;;  %vm335_vm3 = vcmp.ge.f32.partialorder %v271_v63, 0.0  ;;  %v399_v8 = vmul.f32 0.2, %v271_v63 }
  0x57   :  { %v1181_v6 = vpack.c.bf16 %v461_v3, %v460_v62  ;;  %v273_v9 = vadd.f32 %v1320_v7, %v202_v0  ;;  %v462_v11 = vsel %vm334_vm2, %v270_v60, %v398_v4  ;;  %v1041_v13 = vunpack.c.h.bf16 %v1244_v55 }
  0x58   :  { %vm336_vm4 = vcmp.ge.f32.partialorder %v272_v5, 0.0  ;;  %v400_v12 = vmul.f32 0.2, %v272_v5  ;;  %v463_v15 = vsel %vm335_vm3, %v271_v63, %v399_v8  ;;  %v203_v17 = vmul.f32 %v1040_v2, %v1306_v1 }
  0x59   :  { %1272 = vst [vmem:[%s1634_s3 + $0xc0] sm:$0xff] %v1181_v6   ;;  %vm337_vm5 = vcmp.ge.f32.partialorder %v273_v9, 0.0  ;;  %v401_v16 = vmul.f32 0.2, %v273_v9  ;;  %v1186_v18 = vpack.c.bf16 %v463_v15, %v462_v11  ;;  %v204_v20 = vmul.f32 %v1041_v13, %v1306_v1 }
  0x5a   :  { %v464_v19 = vsel %vm336_vm4, %v272_v5, %v400_v12  ;;  %v1044_v21 = vunpack.c.l.bf16 %v1245_v10  ;;  %v274_v23 = vadd.f32 %v1320_v7, %v203_v17  ;;  %v1045_v24 = vunpack.c.h.bf16 %v1245_v10 }
  0x5b   :  { %v465_v22 = vsel %vm337_vm5, %v273_v9, %v401_v16  ;;  %v1048_v25 = vunpack.c.l.bf16 %v1246_v14  ;;  %1273 = vst [vmem:[%s1634_s3 + $0xc8] sm:$0xff] %v1186_v18   ;;  %v275_v27 = vadd.f32 %v1320_v7, %v204_v20  ;;  %v1049_v29 = vunpack.c.h.bf16 %v1246_v14 }
  0x5c   :  { %v1191_v26 = vpack.c.bf16 %v465_v22, %v464_v19  ;;  %v205_v28 = vmul.f32 %v1044_v21, %v1306_v1  ;;  %vm338_vm6 = vcmp.ge.f32.partialorder %v274_v23, 0.0  ;;  %v402_v31 = vmul.f32 0.2, %v274_v23 }
  0x5d   :  { %v206_v32 = vmul.f32 %v1045_v24, %v1306_v1  ;;  %v207_v33 = vmul.f32 %v1048_v25, %v1306_v1  ;;  %vm339_vm7 = vcmp.ge.f32.partialorder %v275_v27, 0.0  ;;  %v403_v34 = vmul.f32 0.2, %v275_v27 }
  0x5e   :  { %1274 = vst [vmem:[%s1634_s3 + $0xd0] sm:$0xff] %v1191_v26   ;;  %v276_v35 = vadd.f32 %v1320_v7, %v205_v28  ;;  %v208_v36 = vmul.f32 %v1049_v29, %v1306_v1  ;;  %v466_v37 = vsel %vm338_vm6, %v274_v23, %v402_v31  ;;  %v1052_v40 = vunpack.c.l.bf16 %v1247_v30 }
  0x5f   :  { %v277_v38 = vadd.f32 %v1320_v7, %v206_v32  ;;  %v278_v39 = vadd.f32 %v1320_v7, %v207_v33  ;;  %v467_v41 = vsel %vm339_vm7, %v275_v27, %v403_v34  ;;  %v1053_v51 = vunpack.c.h.bf16 %v1247_v30 }
  0x60   :  { %vm340_vm8 = vcmp.ge.f32.partialorder %v276_v35, 0.0  ;;  %v404_v42 = vmul.f32 0.2, %v276_v35  ;;  %v279_v43 = vadd.f32 %v1320_v7, %v208_v36  ;;  %v1196_v45 = vpack.c.bf16 %v467_v41, %v466_v37 }
  0x61   :  { %vm341_vm9 = vcmp.ge.f32.partialorder %v277_v38, 0.0  ;;  %v405_v46 = vmul.f32 0.2, %v277_v38  ;;  %vm342_vm10 = vcmp.ge.f32.partialorder %v278_v39, 0.0  ;;  %v406_v48 = vmul.f32 0.2, %v278_v39 }
  0x62   :  { %v468_v47 = vsel %vm340_vm8, %v276_v35, %v404_v42  ;;  %vm343_vm11 = vcmp.ge.f32.partialorder %v279_v43, 0.0  ;;  %v407_v49 = vmul.f32 0.2, %v279_v43  ;;  %1275 = vst [vmem:[%s1634_s3 + $0xd8] sm:$0xff] %v1196_v45   ;;  %v209_v52 = vmul.f32 %v1052_v40, %v1306_v1 }
  0x63   :  { %v469_v50 = vsel %vm341_vm9, %v277_v38, %v405_v46  ;;  %v1056_v53 = vunpack.c.l.bf16 %v1248_v44  ;;  %v470_v55 = vsel %vm342_vm10, %v278_v39, %v406_v48  ;;  %v1057_v57 = vunpack.c.h.bf16 %v1248_v44 }
  0x64   :  { %v1201_v54 = vpack.c.bf16 %v469_v50, %v468_v47  ;;  %v471_v56 = vsel %vm343_vm11, %v279_v43, %v407_v49  ;;  %v210_v59 = vmul.f32 %v1053_v51, %v1306_v1  ;;  %v280_v60 = vadd.f32 %v1320_v7, %v209_v52 }
  0x65   :  { %v1206_v58 = vpack.c.bf16 %v471_v56, %v470_v55  ;;  %v211_v61 = vmul.f32 %v1056_v53, %v1306_v1  ;;  %v212_v62 = vmul.f32 %v1057_v57, %v1306_v1 }
  0x66   :  { %1276 = vst [vmem:[%s1634_s3 + $0xe0] sm:$0xff] %v1201_v54   ;;  %v281_v63 = vadd.f32 %v1320_v7, %v210_v59  ;;  %vm344_vm12 = vcmp.ge.f32.partialorder %v280_v60, 0.0  ;;  %v408_v0 = vmul.f32 0.2, %v280_v60 }
  0x67   :  { %1277 = vst [vmem:[%s1634_s3 + $0xe8] sm:$0xff] %v1206_v58   ;;  %v282_v2 = vadd.f32 %v1320_v7, %v211_v61  ;;  %v283_v3 = vadd.f32 %v1320_v7, %v212_v62 }
  0x68   :  { %vm345_vm13 = vcmp.ge.f32.partialorder %v281_v63, 0.0  ;;  %v409_v4 = vmul.f32 0.2, %v281_v63  ;;  %v472_v5 = vsel %vm344_vm12, %v280_v60, %v408_v0 }
  0x69   :  { %vm346_vm14 = vcmp.ge.f32.partialorder %v282_v2, 0.0  ;;  %vm347_vm15 = vcmp.ge.f32.partialorder %v283_v3, 0.0  ;;  %v410_v6 = vmul.f32 0.2, %v282_v2  ;;  %v411_v8 = vmul.f32 0.2, %v283_v3 }
  0x6a   :  { %v473_v1 = vsel %vm345_vm13, %v281_v63, %v409_v4 }
  0x6b   :  { %v1211_v9 = vpack.c.bf16 %v473_v1, %v472_v5  ;;  %v474_v10 = vsel %vm346_vm14, %v282_v2, %v410_v6  ;;  %v475_v11 = vsel %vm347_vm15, %v283_v3, %v411_v8 }
  0x6c   :  { %v1216_v12 = vpack.c.bf16 %v475_v11, %v474_v10 }
  0x6d   :  { %1278 = vst [vmem:[%s1634_s3 + $0xf0] sm:$0xff] %v1211_v9  }
  0x6e   :  { %1279 = vst [vmem:[%s1634_s3 + $0xf8] sm:$0xff] %v1216_v12  }

// kernel: discriminator_forward.11
= control target key start
LH: loop header
LB: loop body
LE: loop exit
PB: predicated region body
PF: predicated region fallthrough
CT: control target
= control target key end

     0   :  { %s931_s1 = inlined_call_operand.vmem [shape: bf16[256,128], index: 1, kind: input, shape index: {}]   ;;  %s932_s0 = inlined_call_operand.vmem [shape: bf16[128,256], index: 0, kind: input, shape index: {}]   ;;  %s933_s2 = inlined_call_operand.vmem [shape: f32[1,128], index: 2, kind: input, shape index: {}]   ;;  %s934_s3 = inlined_call_operand.vmem [shape: bf16[128,128], index: 3, kind: output, shape index: {0}]   ;;  %s935_s4 = inlined_call_operand.vmem [shape: f32[1,1,128], index: 4, kind: output, shape index: {1}]   ;;  %s936_s5 = inlined_call_operand.vmem [shape: f32[1,1,128], index: 5, kind: output, shape index: {2}]  }
   0x1   :  { %v690_v0 = vld [vmem:[%s931_s1 + $0x40] sm:$0xff]   ;;  %v692_v2 = vld [vmem:[%s931_s1 + $0x48] sm:$0xff]   ;;  %v694_v4 = vld [vmem:[%s931_s1 + $0x50] sm:$0xff]  }
   0x2   :  { %v691_v1 = vld [vmem:[%s931_s1] sm:$0xff]   ;;  %610 = vmatprep.subr.bf16.mxu0 %v690_v0  ;;  %674 = vmatprep.subr.bf16.mxu1 %v690_v0  ;;  %v693_v3 = vld [vmem:[%s931_s1 + $0x8] sm:$0xff]   ;;  %v695_v5 = vld [vmem:[%s931_s1 + $0x10] sm:$0xff]  }
   0x3   :  { %611 = vmatpush3.bf16.msra.mxu0 %v691_v1  ;;  %682 = vmatpush3.bf16.msra.mxu1 %v691_v1  ;;  %v696_v6 = vld [vmem:[%s931_s1 + $0x58] sm:$0xff]   ;;  %v698_v8 = vld [vmem:[%s931_s1 + $0x60] sm:$0xff]   ;;  %v700_v10 = vld [vmem:[%s931_s1 + $0x68] sm:$0xff]  }
   0x4   :  { %612 = vmatprep.subr.bf16.mxu0 %v692_v2  ;;  %675 = vmatprep.subr.bf16.mxu1 %v692_v2  ;;  %v697_v7 = vld [vmem:[%s931_s1 + $0x18] sm:$0xff]   ;;  %v699_v9 = vld [vmem:[%s931_s1 + $0x20] sm:$0xff]   ;;  %v701_v12 = vld [vmem:[%s931_s1 + $0x28] sm:$0xff]  }
   0x5   :  { %v708_v11 = vld [vmem:[%s932_s0 + $0x4] ss:$8 sps:$4 sm:$0xff]   ;;  %v702_v14 = vld [vmem:[%s931_s1 + $0x70] sm:$0xff]   ;;  %v704_v16 = vld [vmem:[%s931_s1 + $0x78] sm:$0xff]  }
   0x6   :  { %v714_v13 = vld [vmem:[%s932_s0 + $0x44] ss:$8 sps:$4 sm:$0xff]   ;;  %281 = vmatprep.mubr.bf16.mxu0 %v708_v11  ;;  %v703_v15 = vld [vmem:[%s931_s1 + $0x30] sm:$0xff]   ;;  %v705_v17 = vld [vmem:[%s931_s1 + $0x38] sm:$0xff]  }
   0x7   :  { %613 = vmatpush3.bf16.msra.mxu0 %v693_v3  ;;  %683 = vmatpush3.bf16.msra.mxu1 %v693_v3  ;;  %v706_v18 = vld [vmem:[%s932_s0] ss:$8 sps:$4 sm:$0xff]   ;;  %v709_v20 = vld [vmem:[%s932_s0 + $0x14] ss:$8 sps:$4 sm:$0xff]   ;;  %v711_v22 = vld [vmem:[%s932_s0 + $0x10] ss:$8 sps:$4 sm:$0xff]  }
   0x8   :  { %614 = vmatprep.subr.bf16.mxu0 %v694_v4  ;;  %676 = vmatprep.subr.bf16.mxu1 %v694_v4  ;;  %v712_v19 = vld [vmem:[%s932_s0 + $0x40] ss:$8 sps:$4 sm:$0xff]   ;;  %v718_v21 = vld [vmem:[%s932_s0 + $0x54] ss:$8 sps:$4 sm:$0xff]   ;;  %v720_v23 = vld [vmem:[%s932_s0 + $0x50] ss:$8 sps:$4 sm:$0xff]  }
   0x9   :  { %313 = vmatprep.mubr.bf16.mxu1 %v714_v13  ;;  %v715_v24 = vld [vmem:[%s932_s0 + $0x24] ss:$8 sps:$4 sm:$0xff]   ;;  %v717_v26 = vld [vmem:[%s932_s0 + $0x20] ss:$8 sps:$4 sm:$0xff]   ;;  %v721_v28 = vld [vmem:[%s932_s0 + $0x34] ss:$8 sps:$4 sm:$0xff]  }
   0xa   :  { %v724_v25 = vld [vmem:[%s932_s0 + $0x64] ss:$8 sps:$4 sm:$0xff]   ;;  %v726_v27 = vld [vmem:[%s932_s0 + $0x60] ss:$8 sps:$4 sm:$0xff]   ;;  %v727_v29 = vld [vmem:[%s932_s0 + $0x74] ss:$8 sps:$4 sm:$0xff]  }
   0xb   :  { %615 = vmatpush3.bf16.msra.mxu0 %v695_v5  ;;  %684 = vmatpush3.bf16.msra.mxu1 %v695_v5  ;;  %v723_v30 = vld [vmem:[%s932_s0 + $0x30] ss:$8 sps:$4 sm:$0xff]   ;;  %v859_v34 = vld [vmem:[%s933_s2] ss:$0 sm:$0xff] }
   0xc   :  { %616 = vmatprep.subr.bf16.mxu0 %v696_v6  ;;  %677 = vmatprep.subr.bf16.mxu1 %v696_v6  ;;  %v729_v31 = vld [vmem:[%s932_s0 + $0x70] ss:$8 sps:$4 sm:$0xff]  }
   0xf   :  { %617 = vmatpush3.bf16.msra.mxu0 %v697_v7  ;;  %685 = vmatpush3.bf16.msra.mxu1 %v697_v7 }
  0x10   :  { %618 = vmatprep.subr.bf16.mxu0 %v698_v8  ;;  %678 = vmatprep.subr.bf16.mxu1 %v698_v8 }
  0x13   :  { %619 = vmatpush3.bf16.msra.mxu0 %v699_v9  ;;  %686 = vmatpush3.bf16.msra.mxu1 %v699_v9 }
  0x14   :  { %620 = vmatprep.subr.bf16.mxu0 %v700_v10  ;;  %679 = vmatprep.subr.bf16.mxu1 %v700_v10 }
  0x17   :  { %621 = vmatpush3.bf16.msra.mxu0 %v701_v12  ;;  %687 = vmatpush3.bf16.msra.mxu1 %v701_v12 }
  0x18   :  { %622 = vmatprep.subr.bf16.mxu0 %v702_v14  ;;  %680 = vmatprep.subr.bf16.mxu1 %v702_v14 }
  0x1b   :  { %623 = vmatpush3.bf16.msra.mxu0 %v703_v15  ;;  %688 = vmatpush3.bf16.msra.mxu1 %v703_v15 }
  0x1c   :  { %624 = vmatprep.subr.bf16.mxu0 %v704_v16  ;;  %681 = vmatprep.subr.bf16.mxu1 %v704_v16 }
  0x1f   :  { %625 = vmatpush3.bf16.msra.mxu0 %v705_v17  ;;  %689 = vmatpush3.bf16.msra.mxu1 %v705_v17 }
  0x22   :  { %282 = vmatmul.mubr.bf16.vlgmr.msra.gmra.mrb[0].mxu0 %v706_v18  ;;  %314 = vmatmul.mubr.bf16.vlgmr.msra.gmra.mrb[0].mxu1 %v712_v19 }
  0x23   :  { %289 = vmatprep.mubr.bf16.mxu0 %v709_v20  ;;  %321 = vmatprep.mubr.bf16.mxu1 %v718_v21 }
  0x2a   :  { %290 = vmatmul.mubr.bf16.gmra.mrb[4].mxu0 %v711_v22  ;;  %322 = vmatmul.mubr.bf16.gmra.mrb[4].mxu1 %v720_v23 }
  0x2b   :  { %297 = vmatprep.mubr.bf16.mxu0 %v715_v24  ;;  %329 = vmatprep.mubr.bf16.mxu1 %v724_v25 }
  0x32   :  { %298 = vmatmul.mubr.bf16.gmra.mrb[8].mxu0 %v717_v26  ;;  %330 = vmatmul.mubr.bf16.gmra.mrb[8].mxu1 %v726_v27 }
  0x33   :  { %305 = vmatprep.mubr.bf16.mxu0 %v721_v28  ;;  %337 = vmatprep.mubr.bf16.mxu1 %v727_v29 }
  0x3a   :  { %306 = vmatmul.mubr.bf16.gmra.mrb[12].mxu0 %v723_v30  ;;  %338 = vmatmul.mubr.bf16.gmra.mrb[12].mxu1 %v729_v31 }
  0xf5   :  { %v626_v32 = vpop.f32.mrb[0].mxu0  ;;  %v650_v33 = vpop.f32.mrb[0].mxu1 }
  0xf6   :  { %v627_v35 = vpop.f32.mrb[1].mxu0  ;;  %v651_v36 = vpop.f32.mrb[1].mxu1 }
  0xf7   :  { %v628_v37 = vadd.f32 %v627_v35, %v626_v32  ;;  %v629_v38 = vpop.f32.mrb[2].mxu0  ;;  %v652_v39 = vadd.f32 %v651_v36, %v650_v33  ;;  %v653_v40 = vpop.f32.mrb[2].mxu1 }
  0xf8   :  { %v630_v41 = vpop.f32.mrb[3].mxu0  ;;  %v654_v42 = vpop.f32.mrb[3].mxu1 }
  0xf9   :  { %v284_v43 = vadd.f32 %v628_v37, %v859_v34  ;;  %v631_v44 = vadd.f32 %v630_v41, %v629_v38  ;;  %v863_v45 = vadd.f32 %v652_v39, %v859_v34  ;;  %v655_v46 = vadd.f32 %v654_v42, %v653_v40 }
  0xfb   :  { %v287_v47 = vadd.f32 %v631_v44, %v859_v34  ;;  %v867_v48 = vadd.f32 %v655_v46, %v859_v34  ;;  %v448_v49 = vmul.f32 %v284_v43, %v284_v43 }
  0xfd   :  { %v566_v50 = vpack.c.bf16 %v287_v47, %v284_v43  ;;  %v426_v51 = vadd.f32 %v287_v47, %v284_v43  ;;  %v449_v52 = vmul.f32 %v287_v47, %v287_v47  ;;  %v632_v53 = vpop.f32.mrb[4].mxu0  ;;  %v586_v54 = vpack.c.bf16 %v867_v48, %v863_v45  ;;  %v656_v55 = vpop.f32.mrb[4].mxu1 }
  0xfe   :  { %v633_v56 = vpop.f32.mrb[5].mxu0  ;;  %v657_v57 = vpop.f32.mrb[5].mxu1 }
  0xff   :  { %567 = vst [vmem:[%s934_s3] sm:$0xff] %v566_v50   ;;  %v464_v58 = vadd.f32 %v449_v52, %v448_v49  ;;  %v634_v59 = vadd.f32 %v633_v56, %v632_v53  ;;  %v635_v60 = vpop.f32.mrb[6].mxu0  ;;  %606 = vst [vmem:[%s934_s3 + $0x20] sm:$0xff] %v586_v54   ;;  %v658_v61 = vadd.f32 %v657_v57, %v656_v55  ;;  %v659_v62 = vpop.f32.mrb[6].mxu1 }
 0x100   :  { %v636_v63 = vpop.f32.mrb[7].mxu0  ;;  %v660_v0 = vpop.f32.mrb[7].mxu1 }
 0x101   :  { %v292_v1 = vadd.f32 %v634_v59, %v859_v34  ;;  %v637_v2 = vadd.f32 %v636_v63, %v635_v60  ;;  %v661_v3 = vadd.f32 %v660_v0, %v659_v62  ;;  %v879_v4 = vadd.f32 %v658_v61, %v859_v34 }
 0x103   :  { %v427_v5 = vadd.f32 %v426_v51, %v292_v1  ;;  %v450_v6 = vmul.f32 %v292_v1, %v292_v1  ;;  %v295_v7 = vadd.f32 %v637_v2, %v859_v34  ;;  %v883_v8 = vadd.f32 %v661_v3, %v859_v34 }
 0x105   :  { %v465_v9 = vadd.f32 %v464_v58, %v450_v6  ;;  %v571_v10 = vpack.c.bf16 %v295_v7, %v292_v1  ;;  %v428_v11 = vadd.f32 %v427_v5, %v295_v7  ;;  %v451_v12 = vmul.f32 %v295_v7, %v295_v7  ;;  %v638_v13 = vpop.f32.mrb[8].mxu0  ;;  %v662_v14 = vpop.f32.mrb[8].mxu1 }
 0x106   :  { %v639_v15 = vpop.f32.mrb[9].mxu0  ;;  %v591_v16 = vpack.c.bf16 %v883_v8, %v879_v4  ;;  %v663_v17 = vpop.f32.mrb[9].mxu1  ;;  %v456_v1 = vmul.f32 %v863_v45, %v863_v45  ;;  %v458_v7 = vmul.f32 %v879_v4, %v879_v4 }
 0x107   :  { %603 = vst [vmem:[%s934_s3 + $0x8] sm:$0xff] %v571_v10   ;;  %v466_v18 = vadd.f32 %v465_v9, %v451_v12  ;;  %v640_v19 = vadd.f32 %v639_v15, %v638_v13  ;;  %v641_v20 = vpop.f32.mrb[10].mxu0  ;;  %v664_v21 = vadd.f32 %v663_v17, %v662_v14  ;;  %v665_v22 = vpop.f32.mrb[10].mxu1 }
 0x108   :  { %v642_v23 = vpop.f32.mrb[11].mxu0  ;;  %607 = vst [vmem:[%s934_s3 + $0x28] sm:$0xff] %v591_v16   ;;  %v666_v24 = vpop.f32.mrb[11].mxu1 }
 0x109   :  { %v300_v25 = vadd.f32 %v640_v19, %v859_v34  ;;  %v643_v26 = vadd.f32 %v642_v23, %v641_v20  ;;  %v667_v27 = vadd.f32 %v666_v24, %v665_v22  ;;  %v332_v28 = vadd.f32 %v664_v21, %v859_v34 }
 0x10b   :  { %v429_v29 = vadd.f32 %v428_v11, %v300_v25  ;;  %v452_v30 = vmul.f32 %v300_v25, %v300_v25  ;;  %v303_v31 = vadd.f32 %v643_v26, %v859_v34  ;;  %v335_v32 = vadd.f32 %v667_v27, %v859_v34 }
 0x10c   :  { %v460_v14 = vmul.f32 %v332_v28, %v332_v28 }
 0x10d   :  { %v467_v33 = vadd.f32 %v466_v18, %v452_v30  ;;  %v576_v35 = vpack.c.bf16 %v303_v31, %v300_v25  ;;  %v430_v36 = vadd.f32 %v429_v29, %v303_v31  ;;  %v453_v37 = vmul.f32 %v303_v31, %v303_v31  ;;  %v644_v38 = vpop.f32.mrb[12].mxu0  ;;  %v668_v39 = vpop.f32.mrb[12].mxu1 }
 0x10e   :  { %v645_v40 = vpop.f32.mrb[13].mxu0  ;;  %v596_v41 = vpack.c.bf16 %v335_v32, %v332_v28  ;;  %v669_v42 = vpop.f32.mrb[13].mxu1  ;;  %v461_v18 = vmul.f32 %v335_v32, %v335_v32 }
 0x10f   :  { %604 = vst [vmem:[%s934_s3 + $0x10] sm:$0xff] %v576_v35   ;;  %v468_v43 = vadd.f32 %v467_v33, %v453_v37  ;;  %v646_v44 = vadd.f32 %v645_v40, %v644_v38  ;;  %v647_v46 = vpop.f32.mrb[14].mxu0  ;;  %v670_v47 = vadd.f32 %v669_v42, %v668_v39  ;;  %v671_v49 = vpop.f32.mrb[14].mxu1 }
 0x110   :  { %v648_v50 = vpop.f32.mrb[15].mxu0  ;;  %608 = vst [vmem:[%s934_s3 + $0x30] sm:$0xff] %v596_v41   ;;  %v672_v51 = vpop.f32.mrb[15].mxu1 }
 0x111   :  { %v308_v52 = vadd.f32 %v646_v44, %v859_v34  ;;  %v649_v53 = vadd.f32 %v648_v50, %v647_v46  ;;  %v673_v54 = vadd.f32 %v672_v51, %v671_v49  ;;  %v340_v55 = vadd.f32 %v670_v47, %v859_v34 }
 0x113   :  { %v431_v56 = vadd.f32 %v430_v36, %v308_v52  ;;  %v454_v57 = vmul.f32 %v308_v52, %v308_v52  ;;  %v311_v58 = vadd.f32 %v649_v53, %v859_v34  ;;  %v343_v59 = vadd.f32 %v673_v54, %v859_v34 }
 0x114   :  { %v457_v34 = vmul.f32 %v867_v48, %v867_v48 }
 0x115   :  { %v469_v60 = vadd.f32 %v468_v43, %v454_v57  ;;  %v581_v61 = vpack.c.bf16 %v311_v58, %v308_v52  ;;  %v432_v62 = vadd.f32 %v431_v56, %v311_v58  ;;  %v455_v63 = vmul.f32 %v311_v58, %v311_v58 }
 0x116   :  { %v601_v0 = vpack.c.bf16 %v343_v59, %v340_v55  ;;  %v463_v23 = vmul.f32 %v343_v59, %v343_v59 }
 0x117   :  { %605 = vst [vmem:[%s934_s3 + $0x18] sm:$0xff] %v581_v61   ;;  %v433_v2 = vadd.f32 %v432_v62, %v863_v45  ;;  %v470_v3 = vadd.f32 %v469_v60, %v455_v63  ;;  %v459_v45 = vmul.f32 %v883_v8, %v883_v8 }
 0x118   :  { %609 = vst [vmem:[%s934_s3 + $0x38] sm:$0xff] %v601_v0  }
 0x119   :  { %v434_v5 = vadd.f32 %v433_v2, %v867_v48  ;;  %v471_v6 = vadd.f32 %v470_v3, %v456_v1  ;;  %v462_v48 = vmul.f32 %v340_v55, %v340_v55 }
 0x11b   :  { %v472_v9 = vadd.f32 %v471_v6, %v457_v34  ;;  %v435_v10 = vadd.f32 %v434_v5, %v879_v4 }
 0x11d   :  { %v436_v11 = vadd.f32 %v435_v10, %v883_v8  ;;  %v473_v12 = vadd.f32 %v472_v9, %v458_v7 }
 0x11f   :  { %v437_v13 = vadd.f32 %v436_v11, %v332_v28  ;;  %v474_v15 = vadd.f32 %v473_v12, %v459_v45 }
 0x121   :  { %v475_v16 = vadd.f32 %v474_v15, %v460_v14  ;;  %v438_v17 = vadd.f32 %v437_v13, %v335_v32 }
 0x123   :  { %v476_v19 = vadd.f32 %v475_v16, %v461_v18  ;;  %v439_v20 = vadd.f32 %v438_v17, %v340_v55 }
 0x125   :  { %v477_v21 = vadd.f32 %v476_v19, %v462_v48  ;;  %v440_v22 = vadd.f32 %v439_v20, %v343_v59 }
 0x127   :  { %v441_v24 = vrot.slane %v440_v22, 4  ;;  %v478_v4 = vadd.f32 %v477_v21, %v463_v23 }
 0x129   :  { %v442_v25 = vadd.f32 %v441_v24, %v440_v22  ;;  %v479_v26 = vrot.slane %v478_v4, 4 }
 0x12b   :  { %v443_v27 = vrot.slane %v442_v25, 2  ;;  %v480_v29 = vadd.f32 %v479_v26, %v478_v4 }
 0x12d   :  { %v444_v8 = vadd.f32 %v443_v27, %v442_v25  ;;  %v481_v30 = vrot.slane %v480_v29, 2 }
 0x12f   :  { %v445_v31 = vrot.slane %v444_v8, 1  ;;  %v482_v28 = vadd.f32 %v481_v30, %v480_v29 }
 0x131   :  { %v446_v33 = vadd.f32 %v445_v31, %v444_v8  ;;  %v483_v35 = vrot.slane %v482_v28, 1 }
 0x133   :  { %447 = vst [vmem:[%s935_s4] sm:$0x1] %v446_v33  ;;  %v484_v32 = vadd.f32 %v483_v35, %v482_v28 }
 0x135   :  { %485 = vst [vmem:[%s936_s5] sm:$0x1] %v484_v32 }

// kernel: discriminator_forward.12
= control target key start
LH: loop header
LB: loop body
LE: loop exit
PB: predicated region body
PF: predicated region fallthrough
CT: control target
= control target key end

     0   :  { %s455_s0 = inlined_call_operand.vmem [shape: bf16[128,128], index: 0, kind: input, shape index: {}]   ;;  %s456_s1 = inlined_call_operand.vmem [shape: f32[1,128], index: 1, kind: input, shape index: {}]   ;;  %s457_s2 = inlined_call_operand.vmem [shape: f32[1,128], index: 2, kind: input, shape index: {}]   ;;  %s458_s3 = inlined_call_operand.vmem [shape: bf16[128,128], index: 3, kind: output, shape index: {}]  }
   0x1   :  { %v259_v0 = vld [vmem:[%s455_s0] sm:$0xff]   ;;  %v330_v4 = vld [vmem:[%s455_s0 + $0x8] sm:$0xff]   ;;  %v331_v5 = vld [vmem:[%s455_s0 + $0x10] sm:$0xff]  }
   0x2   :  { %v370_v1 = vld [vmem:[%s456_s1] ss:$0 sm:$0xff]  ;;  %v260_v2 = vunpack.c.l.bf16 %v259_v0  ;;  %v261_v3 = vunpack.c.h.bf16 %v259_v0  ;;  %v332_v6 = vld [vmem:[%s455_s0 + $0x18] sm:$0xff]   ;;  %v264_v8 = vunpack.c.l.bf16 %v330_v4  ;;  %v265_v9 = vunpack.c.h.bf16 %v330_v4  ;;  %v334_v35 = vld [vmem:[%s455_s0 + $0x28] sm:$0xff]  }
   0x3   :  { %v384_v7 = vld [vmem:[%s457_s2] ss:$0 sm:$0xff]  ;;  %v268_v10 = vunpack.c.l.bf16 %v331_v5  ;;  %v269_v11 = vunpack.c.h.bf16 %v331_v5  ;;  %v272_v14 = vunpack.c.l.bf16 %v332_v6  ;;  %v273_v15 = vunpack.c.h.bf16 %v332_v6  ;;  %v335_v48 = vld [vmem:[%s455_s0 + $0x30] sm:$0xff]   ;;  %v336_v4 = vld [vmem:[%s455_s0 + $0x38] sm:$0xff]  }
   0x4   :  { %v53_v12 = vmul.f32 %v260_v2, %v370_v1  ;;  %v54_v13 = vmul.f32 %v261_v3, %v370_v1  ;;  %v55_v16 = vmul.f32 %v264_v8, %v370_v1  ;;  %v56_v17 = vmul.f32 %v265_v9, %v370_v1  ;;  %v333_v34 = vld [vmem:[%s455_s0 + $0x20] sm:$0xff]  }
   0x5   :  { %v57_v18 = vmul.f32 %v268_v10, %v370_v1  ;;  %v58_v19 = vmul.f32 %v269_v11, %v370_v1  ;;  %v59_v22 = vmul.f32 %v272_v14, %v370_v1  ;;  %v60_v23 = vmul.f32 %v273_v15, %v370_v1 }
   0x6   :  { %v76_v20 = vadd.f32 %v384_v7, %v53_v12  ;;  %v77_v21 = vadd.f32 %v384_v7, %v54_v13  ;;  %v78_v24 = vadd.f32 %v384_v7, %v55_v16  ;;  %v79_v25 = vadd.f32 %v384_v7, %v56_v17 }
   0x7   :  { %v80_v26 = vadd.f32 %v384_v7, %v57_v18  ;;  %v81_v27 = vadd.f32 %v384_v7, %v58_v19  ;;  %v82_v42 = vadd.f32 %v384_v7, %v59_v22  ;;  %v83_v43 = vadd.f32 %v384_v7, %v60_v23 }
   0x8   :  { %vm92_vm0 = vcmp.ge.f32.partialorder %v76_v20, 0.0  ;;  %vm93_vm1 = vcmp.ge.f32.partialorder %v77_v21, 0.0  ;;  %v108_v28 = vmul.f32 0.2, %v76_v20  ;;  %v109_v29 = vmul.f32 0.2, %v77_v21 }
   0x9   :  { %vm94_vm2 = vcmp.ge.f32.partialorder %v78_v24, 0.0  ;;  %vm95_vm3 = vcmp.ge.f32.partialorder %v79_v25, 0.0  ;;  %v110_v30 = vmul.f32 0.2, %v78_v24  ;;  %v111_v31 = vmul.f32 0.2, %v79_v25 }
   0xa   :  { %v124_v32 = vsel %vm92_vm0, %v76_v20, %v108_v28  ;;  %v125_v33 = vsel %vm93_vm1, %v77_v21, %v109_v29  ;;  %vm96_vm4 = vcmp.ge.f32.partialorder %v80_v26, 0.0  ;;  %vm97_vm5 = vcmp.ge.f32.partialorder %v81_v27, 0.0 }
   0xb   :  { %v293_v36 = vpack.c.bf16 %v125_v33, %v124_v32  ;;  %v126_v37 = vsel %vm94_vm2, %v78_v24, %v110_v30  ;;  %v127_v38 = vsel %vm95_vm3, %v79_v25, %v111_v31  ;;  %v112_v39 = vmul.f32 0.2, %v80_v26 }
   0xc   :  { %v298_v40 = vpack.c.bf16 %v127_v38, %v126_v37  ;;  %v113_v41 = vmul.f32 0.2, %v81_v27  ;;  %v276_v45 = vunpack.c.l.bf16 %v333_v34  ;;  %v277_v46 = vunpack.c.h.bf16 %v333_v34 }
   0xd   :  { %294 = vst [vmem:[%s458_s3] sm:$0xff] %v293_v36   ;;  %v128_v44 = vsel %vm96_vm4, %v80_v26, %v112_v39  ;;  %v280_v47 = vunpack.c.l.bf16 %v334_v35  ;;  %vm98_vm6 = vcmp.ge.f32.partialorder %v82_v42, 0.0  ;;  %vm99_vm7 = vcmp.ge.f32.partialorder %v83_v43, 0.0 }
   0xe   :  { %337 = vst [vmem:[%s458_s3 + $0x8] sm:$0xff] %v298_v40   ;;  %v129_v49 = vsel %vm97_vm5, %v81_v27, %v113_v41  ;;  %v114_v50 = vmul.f32 0.2, %v82_v42  ;;  %v115_v52 = vmul.f32 0.2, %v83_v43  ;;  %v61_v53 = vmul.f32 %v276_v45, %v370_v1 }
   0xf   :  { %v303_v51 = vpack.c.bf16 %v129_v49, %v128_v44  ;;  %v62_v54 = vmul.f32 %v277_v46, %v370_v1  ;;  %v281_v56 = vunpack.c.h.bf16 %v334_v35  ;;  %v63_v57 = vmul.f32 %v280_v47, %v370_v1 }
  0x10   :  { %v130_v55 = vsel %vm98_vm6, %v82_v42, %v114_v50  ;;  %v284_v58 = vunpack.c.l.bf16 %v335_v48  ;;  %v131_v59 = vsel %vm99_vm7, %v83_v43, %v115_v52  ;;  %v84_v60 = vadd.f32 %v384_v7, %v61_v53 }
  0x11   :  { %338 = vst [vmem:[%s458_s3 + $0x10] sm:$0xff] %v303_v51   ;;  %v85_v61 = vadd.f32 %v384_v7, %v62_v54  ;;  %v285_v62 = vunpack.c.h.bf16 %v335_v48  ;;  %v308_v63 = vpack.c.bf16 %v131_v59, %v130_v55  ;;  %v64_v0 = vmul.f32 %v281_v56, %v370_v1 }
  0x12   :  { %v86_v2 = vadd.f32 %v384_v7, %v63_v57  ;;  %v65_v3 = vmul.f32 %v284_v58, %v370_v1  ;;  %vm100_vm8 = vcmp.ge.f32.partialorder %v84_v60, 0.0  ;;  %v116_v5 = vmul.f32 0.2, %v84_v60 }
  0x13   :  { %vm101_vm9 = vcmp.ge.f32.partialorder %v85_v61, 0.0  ;;  %v117_v6 = vmul.f32 0.2, %v85_v61  ;;  %339 = vst [vmem:[%s458_s3 + $0x18] sm:$0xff] %v308_v63   ;;  %v87_v8 = vadd.f32 %v384_v7, %v64_v0  ;;  %v66_v10 = vmul.f32 %v285_v62, %v370_v1 }
  0x14   :  { %vm102_vm10 = vcmp.ge.f32.partialorder %v86_v2, 0.0  ;;  %v118_v9 = vmul.f32 0.2, %v86_v2  ;;  %v132_v11 = vsel %vm100_vm8, %v84_v60, %v116_v5  ;;  %v88_v13 = vadd.f32 %v384_v7, %v65_v3 }
  0x15   :  { %v133_v12 = vsel %vm101_vm9, %v85_v61, %v117_v6  ;;  %v288_v14 = vunpack.c.l.bf16 %v336_v4  ;;  %vm103_vm11 = vcmp.ge.f32.partialorder %v87_v8, 0.0  ;;  %v119_v16 = vmul.f32 0.2, %v87_v8 }
  0x16   :  { %v313_v15 = vpack.c.bf16 %v133_v12, %v132_v11  ;;  %v134_v17 = vsel %vm102_vm10, %v86_v2, %v118_v9  ;;  %v89_v18 = vadd.f32 %v384_v7, %v66_v10  ;;  %vm104_vm12 = vcmp.ge.f32.partialorder %v88_v13, 0.0 }
  0x17   :  { %v120_v19 = vmul.f32 0.2, %v88_v13  ;;  %v289_v20 = vunpack.c.h.bf16 %v336_v4  ;;  %v135_v21 = vsel %vm103_vm11, %v87_v8, %v119_v16  ;;  %v67_v22 = vmul.f32 %v288_v14, %v370_v1 }
  0x18   :  { %340 = vst [vmem:[%s458_s3 + $0x20] sm:$0xff] %v313_v15   ;;  %v318_v23 = vpack.c.bf16 %v135_v21, %v134_v17  ;;  %vm105_vm13 = vcmp.ge.f32.partialorder %v89_v18, 0.0  ;;  %v121_v24 = vmul.f32 0.2, %v89_v18 }
  0x19   :  { %v136_v25 = vsel %vm104_vm12, %v88_v13, %v120_v19  ;;  %v68_v26 = vmul.f32 %v289_v20, %v370_v1  ;;  %v90_v27 = vadd.f32 %v384_v7, %v67_v22 }
  0x1a   :  { %341 = vst [vmem:[%s458_s3 + $0x28] sm:$0xff] %v318_v23   ;;  %v137_v28 = vsel %vm105_vm13, %v89_v18, %v121_v24 }
  0x1b   :  { %v323_v29 = vpack.c.bf16 %v137_v28, %v136_v25  ;;  %v91_v30 = vadd.f32 %v384_v7, %v68_v26  ;;  %vm106_vm14 = vcmp.ge.f32.partialorder %v90_v27, 0.0  ;;  %v122_v31 = vmul.f32 0.2, %v90_v27 }
  0x1d   :  { %342 = vst [vmem:[%s458_s3 + $0x30] sm:$0xff] %v323_v29   ;;  %vm107_vm15 = vcmp.ge.f32.partialorder %v91_v30, 0.0  ;;  %v123_v32 = vmul.f32 0.2, %v91_v30  ;;  %v138_v33 = vsel %vm106_vm14, %v90_v27, %v122_v31 }
  0x1f   :  { %v139_v1 = vsel %vm107_vm15, %v91_v30, %v123_v32 }
  0x20   :  { %v328_v34 = vpack.c.bf16 %v139_v1, %v138_v33 }
  0x22   :  { %343 = vst [vmem:[%s458_s3 + $0x38] sm:$0xff] %v328_v34  }

// kernel: discriminator_forward.13
= control target key start
LH: loop header
LB: loop body
LE: loop exit
PB: predicated region body
PF: predicated region fallthrough
CT: control target
= control target key end

     0   :  { %vm529_vm4 = vcmask 1041409   ;;  %vm532_vm5 = vcmask 1041408   ;;  %vm544_vm6 = vcmask 1024   ;;  %s877_s1 = inlined_call_operand.vmem [shape: bf16[512,128], index: 1, kind: input, shape index: {}]   ;;  %s878_s0 = inlined_call_operand.vmem [shape: bf16[32,512], index: 0, kind: input, shape index: {}]   ;;  %s879_s6 = inlined_call_operand.<no memory space> [shape: f32[1,1], index: 6, kind: input, shape index: {}]   ;;  %s880_s2 = inlined_call_operand.vmem [shape: f32[1,128], index: 2, kind: input, shape index: {}]   ;;  %s881_s3 = inlined_call_operand.vmem [shape: f32[1,128], index: 3, kind: input, shape index: {}]   ;;  %s882_s4 = inlined_call_operand.vmem [shape: f32[1,128], index: 4, kind: input, shape index: {}]   ;;  %s883_s5 = inlined_call_operand.vmem [shape: f32[16,128], index: 5, kind: input, shape index: {}]   ;;  %s884_s7 = inlined_call_operand.vmem [shape: f32[2,1], index: 7, kind: output, shape index: {}]  }
   0x1   :  { %v650_v0 = vld [vmem:[%s877_s1 + $0x40] sm:$0xff]   ;;  %v654_v4 = vld [vmem:[%s877_s1 + $0x48] sm:$0xff]   ;;  %v658_v8 = vld [vmem:[%s877_s1 + $0x50] sm:$0xff]   ;;  %v12_v40 = vstv %s879_s6 }
   0x2   :  { %v651_v1 = vld [vmem:[%s877_s1 + $0xc0] sm:$0xff]   ;;  %594 = vmatprep.subr.bf16.mxu0 %v650_v0  ;;  %v655_v5 = vld [vmem:[%s877_s1 + $0xc8] sm:$0xff]   ;;  %v659_v9 = vld [vmem:[%s877_s1 + $0xd0] sm:$0xff]   ;;  %13 = vst [vmem:[#allocation2] sm:$0x1] %v12_v40 }
   0x3   :  { %v652_v2 = vld [vmem:[%s877_s1] sm:$0xff]   ;;  %622 = vmatprep.subr.bf16.mxu1 %v651_v1  ;;  %v656_v6 = vld [vmem:[%s877_s1 + $0x8] sm:$0xff]   ;;  %v660_v10 = vld [vmem:[%s877_s1 + $0x10] sm:$0xff]  }
   0x4   :  { %v653_v3 = vld [vmem:[%s877_s1 + $0x80] sm:$0xff]   ;;  %595 = vmatpush3.bf16.msra.mxu0 %v652_v2  ;;  %v657_v7 = vld [vmem:[%s877_s1 + $0x88] sm:$0xff]   ;;  %v661_v11 = vld [vmem:[%s877_s1 + $0x90] sm:$0xff]  }
   0x5   :  { %623 = vmatpush3.bf16.msra.mxu1 %v653_v3  ;;  %596 = vmatprep.subr.bf16.mxu0 %v654_v4  ;;  %v662_v12 = vld [vmem:[%s877_s1 + $0x58] sm:$0xff]   ;;  %v666_v16 = vld [vmem:[%s877_s1 + $0x60] sm:$0xff]   ;;  %v670_v20 = vld [vmem:[%s877_s1 + $0x68] sm:$0xff]  }
   0x6   :  { %624 = vmatprep.subr.bf16.mxu1 %v655_v5  ;;  %v663_v13 = vld [vmem:[%s877_s1 + $0xd8] sm:$0xff]   ;;  %v667_v17 = vld [vmem:[%s877_s1 + $0xe0] sm:$0xff]   ;;  %v671_v21 = vld [vmem:[%s877_s1 + $0xe8] sm:$0xff]  }
   0x7   :  { %v664_v14 = vld [vmem:[%s877_s1 + $0x18] sm:$0xff]   ;;  %v668_v18 = vld [vmem:[%s877_s1 + $0x20] sm:$0xff]   ;;  %v672_v22 = vld [vmem:[%s877_s1 + $0x28] sm:$0xff]  }
   0x8   :  { %597 = vmatpush3.bf16.msra.mxu0 %v656_v6  ;;  %v665_v15 = vld [vmem:[%s877_s1 + $0x98] sm:$0xff]   ;;  %v669_v19 = vld [vmem:[%s877_s1 + $0xa0] sm:$0xff]   ;;  %v673_v23 = vld [vmem:[%s877_s1 + $0xa8] sm:$0xff]  }
   0x9   :  { %625 = vmatpush3.bf16.msra.mxu1 %v657_v7  ;;  %598 = vmatprep.subr.bf16.mxu0 %v658_v8  ;;  %v674_v24 = vld [vmem:[%s877_s1 + $0x70] sm:$0xff]   ;;  %v678_v28 = vld [vmem:[%s877_s1 + $0x78] sm:$0xff]   ;;  %v550_v43 = vld [vmem:[%s880_s2] ss:$0 sm:$0xff] }
   0xa   :  { %626 = vmatprep.subr.bf16.mxu1 %v659_v9  ;;  %v675_v25 = vld [vmem:[%s877_s1 + $0xf0] sm:$0xff]   ;;  %v679_v29 = vld [vmem:[%s877_s1 + $0xf8] sm:$0xff]   ;;  %v591_v40 = vld [vmem:[%s881_s3] ss:$0 sm:$0xff] }
   0xb   :  { %v676_v26 = vld [vmem:[%s877_s1 + $0x30] sm:$0xff]   ;;  %v680_v30 = vld [vmem:[%s877_s1 + $0x38] sm:$0xff]  }
   0xc   :  { %599 = vmatpush3.bf16.msra.mxu0 %v660_v10  ;;  %v677_v27 = vld [vmem:[%s877_s1 + $0xb0] sm:$0xff]   ;;  %v681_v31 = vld [vmem:[%s877_s1 + $0xb8] sm:$0xff]  }
   0xd   :  { %627 = vmatpush3.bf16.msra.mxu1 %v661_v11  ;;  %600 = vmatprep.subr.bf16.mxu0 %v662_v12  ;;  %v682_v32 = vld [vmem:[%s878_s0] ss:$16 sps:$4 sm:$0xff]   ;;  %v684_v33 = vld [vmem:[%s878_s0 + $0x4] ss:$16 sps:$4 sm:$0xff]   ;;  %v685_v34 = vld [vmem:[%s878_s0 + $0x8] ss:$16 sps:$4 sm:$0xff]  }
   0xe   :  { %628 = vmatprep.subr.bf16.mxu1 %v663_v13  ;;  %v687_v35 = vld [vmem:[%s878_s0 + $0xc] ss:$16 sps:$4 sm:$0xff]   ;;  %372 = vmatprep.mubr.bf16.mxu0 %v684_v33  ;;  %v688_v36 = vld [vmem:[%s878_s0 + $0x24] ss:$16 sps:$4 sm:$0xff]   ;;  %v692_v38 = vld [vmem:[%s878_s0 + $0x20] ss:$16 sps:$4 sm:$0xff]  }
   0xf   :  { %421 = vmatprep.mubr.bf16.mxu1 %v687_v35  ;;  %v690_v37 = vld [vmem:[%s878_s0 + $0x2c] ss:$16 sps:$4 sm:$0xff]   ;;  %v693_v39 = vld [vmem:[%s878_s0 + $0x28] ss:$16 sps:$4 sm:$0xff]  }
  0x10   :  { %601 = vmatpush3.bf16.msra.mxu0 %v664_v14 }
  0x11   :  { %629 = vmatpush3.bf16.msra.mxu1 %v665_v15  ;;  %602 = vmatprep.subr.bf16.mxu0 %v666_v16 }
  0x12   :  { %630 = vmatprep.subr.bf16.mxu1 %v667_v17 }
  0x14   :  { %603 = vmatpush3.bf16.msra.mxu0 %v668_v18 }
  0x15   :  { %631 = vmatpush3.bf16.msra.mxu1 %v669_v19  ;;  %604 = vmatprep.subr.bf16.mxu0 %v670_v20 }
  0x16   :  { %632 = vmatprep.subr.bf16.mxu1 %v671_v21 }
  0x18   :  { %605 = vmatpush3.bf16.msra.mxu0 %v672_v22 }
  0x19   :  { %633 = vmatpush3.bf16.msra.mxu1 %v673_v23  ;;  %606 = vmatprep.subr.bf16.mxu0 %v674_v24 }
  0x1a   :  { %634 = vmatprep.subr.bf16.mxu1 %v675_v25 }
  0x1c   :  { %607 = vmatpush3.bf16.msra.mxu0 %v676_v26 }
  0x1d   :  { %635 = vmatpush3.bf16.msra.mxu1 %v677_v27  ;;  %608 = vmatprep.subr.bf16.mxu0 %v678_v28 }
  0x1e   :  { %636 = vmatprep.subr.bf16.mxu1 %v679_v29 }
  0x20   :  { %609 = vmatpush3.bf16.msra.mxu0 %v680_v30 }
  0x21   :  { %637 = vmatpush3.bf16.msra.mxu1 %v681_v31 }
  0x23   :  { %373 = vmatmul.mubr.bf16.vlgmr.msra.gmra.mrb[0].mxu0 %v682_v32 }
  0x24   :  { %422 = vmatmul.mubr.bf16.vlgmr.msra.gmra.mrb[0].mxu1 %v685_v34  ;;  %380 = vmatprep.mubr.bf16.mxu0 %v688_v36 }
  0x25   :  { %429 = vmatprep.mubr.bf16.mxu1 %v690_v37 }
  0x2b   :  { %381 = vmatmul.mubr.bf16.gmra.mrb[4].mxu0 %v692_v38 }
  0x2c   :  { %430 = vmatmul.mubr.bf16.gmra.mrb[4].mxu1 %v693_v39 }
  0xf6   :  { %v610_v41 = vpop.f32.mrb[0].mxu0 }
  0xf7   :  { %v638_v42 = vpop.f32.mrb[0].mxu1  ;;  %v611_v44 = vpop.f32.mrb[1].mxu0 }
  0xf8   :  { %v612_v45 = vadd.f32 %v611_v44, %v610_v41  ;;  %v639_v46 = vpop.f32.mrb[1].mxu1  ;;  %v613_v47 = vpop.f32.mrb[2].mxu0 }
  0xf9   :  { %v640_v48 = vadd.f32 %v639_v46, %v638_v42  ;;  %v641_v49 = vpop.f32.mrb[2].mxu1  ;;  %v614_v50 = vpop.f32.mrb[3].mxu0 }
  0xfa   :  { %v375_v51 = vadd.f32 %v612_v45, %v550_v43  ;;  %v615_v52 = vadd.f32 %v614_v50, %v613_v47  ;;  %v642_v53 = vpop.f32.mrb[3].mxu1  ;;  %v592_v45 = vld [vmem:[%s882_s4] ss:$0 sm:$0xff] }
  0xfb   :  { %v643_v54 = vadd.f32 %v642_v53, %v641_v49 }
  0xfc   :  { %v424_v55 = vadd.f32 %v640_v48, %v375_v51  ;;  %v378_v56 = vadd.f32 %v615_v52, %v550_v43 }
  0xfe   :  { %v427_v57 = vadd.f32 %v643_v54, %v378_v56  ;;  %v616_v58 = vpop.f32.mrb[4].mxu0 }
  0xff   :  { %v644_v59 = vpop.f32.mrb[4].mxu1  ;;  %v617_v60 = vpop.f32.mrb[5].mxu0 }
 0x100   :  { %v438_v61 = vadd.f32 %v427_v57, %v424_v55  ;;  %v618_v62 = vadd.f32 %v617_v60, %v616_v58  ;;  %v645_v63 = vpop.f32.mrb[5].mxu1  ;;  %v619_v0 = vpop.f32.mrb[6].mxu0  ;;  %v507_v58 = vld [vmem:[%s883_s5] sm:$0xff] }
 0x101   :  { %v646_v1 = vadd.f32 %v645_v63, %v644_v59  ;;  %v647_v2 = vpop.f32.mrb[6].mxu1  ;;  %v620_v3 = vpop.f32.mrb[7].mxu0 }
 0x102   :  { %v383_v4 = vadd.f32 %v618_v62, %v550_v43  ;;  %v621_v5 = vadd.f32 %v620_v3, %v619_v0  ;;  %v648_v6 = vpop.f32.mrb[7].mxu1 }
 0x103   :  { %v649_v7 = vadd.f32 %v648_v6, %v647_v2 }
 0x104   :  { %v432_v8 = vadd.f32 %v646_v1, %v383_v4  ;;  %v386_v9 = vadd.f32 %v621_v5, %v550_v43 }
 0x106   :  { %v439_v10 = vadd.f32 %v438_v61, %v432_v8  ;;  %v435_v11 = vadd.f32 %v649_v7, %v386_v9 }
 0x108   :  { %v440_v12 = vadd.f32 %v439_v10, %v435_v11 }
 0x10a   :  { %v441_v13 = vrot.slane %v440_v12, 4 }
 0x10c   :  { %v442_v14 = vadd.f32 %v441_v13, %v440_v12 }
 0x10e   :  { %v443_v15 = vrot.slane %v442_v14, 2 }
 0x110   :  { %v444_v16 = vadd.f32 %v443_v15, %v442_v14 }
 0x112   :  { %v445_v17 = vrot.slane %v444_v16, 1 }
 0x114   :  { %v446_v18 = vadd.f32 %v445_v17, %v444_v16 }
 0x116   :  { %v448_v19 = vmul.f32 0.03125, %v446_v18 }
 0x118   :  { %v449_v20 = vsub.f32 %v424_v55, %v448_v19  ;;  %v450_v21 = vsub.f32 %v427_v57, %v448_v19  ;;  %v451_v22 = vsub.f32 %v432_v8, %v448_v19  ;;  %v452_v23 = vsub.f32 %v435_v11, %v448_v19  ;;  %v508_v55 = vld [vmem:[%s883_s5 + $0x8] sm:$0xff] }
 0x11a   :  { %v453_v24 = vmul.f32 %v449_v20, %v449_v20  ;;  %v454_v25 = vmul.f32 %v450_v21, %v450_v21  ;;  %v455_v26 = vmul.f32 %v451_v22, %v451_v22  ;;  %v456_v28 = vmul.f32 %v452_v23, %v452_v23 }
 0x11c   :  { %v457_v27 = vadd.f32 %v454_v25, %v453_v24 }
 0x11e   :  { %v458_v29 = vadd.f32 %v457_v27, %v455_v26 }
 0x120   :  { %v459_v30 = vadd.f32 %v458_v29, %v456_v28 }
 0x122   :  { %v460_v31 = vrot.slane %v459_v30, 4 }
 0x124   :  { %v461_v32 = vadd.f32 %v460_v31, %v459_v30 }
 0x126   :  { %v462_v33 = vrot.slane %v461_v32, 2 }
 0x128   :  { %v463_v34 = vadd.f32 %v462_v33, %v461_v32 }
 0x12a   :  { %v464_v35 = vrot.slane %v463_v34, 1 }
 0x12c   :  { %v465_v36 = vadd.f32 %v464_v35, %v463_v34 }
 0x12e   :  { %v466_v37 = vmul.f32 0.03125, %v465_v36 }
 0x130   :  { %v467_v38 = vadd.f32 1e-05, %v466_v37 }
 0x132   :  { %694 = vrsqrt.f32 %v467_v38 }
 0x13c   :  { %v695_v39 = vpop.eup %694 }
 0x13d   :  { %v469_v41 = vmul.f32 %v695_v39, %v449_v20  ;;  %v470_v42 = vmul.f32 %v695_v39, %v450_v21  ;;  %v471_v43 = vmul.f32 %v695_v39, %v451_v22  ;;  %v472_v44 = vmul.f32 %v695_v39, %v452_v23  ;;  %v593_v20 = vld [vmem:[#allocation2] ss:$0 sm:$0xff] }
 0x13f   :  { %v480_v46 = vmul.f32 %v591_v40, %v469_v41  ;;  %v481_v47 = vmul.f32 %v591_v40, %v470_v42  ;;  %v482_v48 = vmul.f32 %v591_v40, %v471_v43  ;;  %v483_v49 = vmul.f32 %v591_v40, %v472_v44 }
 0x141   :  { %v491_v50 = vadd.f32 %v592_v45, %v480_v46  ;;  %v492_v51 = vadd.f32 %v592_v45, %v481_v47  ;;  %v493_v52 = vadd.f32 %v592_v45, %v482_v48  ;;  %v494_v53 = vadd.f32 %v592_v45, %v483_v49 }
 0x143   :  { %vm498_vm0 = vcmp.ge.f32.partialorder %v494_v53, 0.0  ;;  %v502_v54 = vmul.f32 0.2, %v494_v53  ;;  %vm495_vm1 = vcmp.ge.f32.partialorder %v491_v50, 0.0  ;;  %vm496_vm2 = vcmp.ge.f32.partialorder %v492_v51, 0.0 }
 0x144   :  { %vm497_vm3 = vcmp.ge.f32.partialorder %v493_v52, 0.0  ;;  %v499_v56 = vmul.f32 0.2, %v491_v50  ;;  %v500_v57 = vmul.f32 0.2, %v492_v51 }
 0x145   :  { %v501_v59 = vmul.f32 0.2, %v493_v52  ;;  %v506_v60 = vsel %vm498_vm0, %v494_v53, %v502_v54 }
 0x146   :  { %v503_v61 = vsel %vm495_vm1, %v491_v50, %v499_v56  ;;  %v504_v62 = vsel %vm496_vm2, %v492_v51, %v500_v57  ;;  %v512_v63 = vmul.f32 %v508_v55, %v506_v60 }
 0x147   :  { %v505_v0 = vsel %vm497_vm3, %v493_v52, %v501_v59  ;;  %v509_v1 = vmul.f32 %v507_v58, %v503_v61  ;;  %v510_v2 = vmul.f32 %v508_v55, %v504_v62 }
 0x148   :  { %v511_v3 = vmul.f32 %v507_v58, %v505_v0 }
 0x149   :  { %v513_v4 = vadd.f32 %v510_v2, %v509_v1 }
 0x14a   :  { %v520_v5 = vadd.f32 %v512_v63, %v511_v3 }
 0x14b   :  { %v514_v6 = vrot.slane %v513_v4, 4 }
 0x14c   :  { %v521_v7 = vrot.slane %v520_v5, 4 }
 0x14d   :  { %v515_v8 = vadd.f32 %v514_v6, %v513_v4 }
 0x14e   :  { %v522_v9 = vadd.f32 %v521_v7, %v520_v5 }
 0x14f   :  { %v516_v10 = vrot.slane %v515_v8, 2 }
 0x150   :  { %v523_v11 = vrot.slane %v522_v9, 2 }
 0x151   :  { %v517_v12 = vadd.f32 %v516_v10, %v515_v8 }
 0x152   :  { %v524_v13 = vadd.f32 %v523_v11, %v522_v9 }
 0x153   :  { %v518_v14 = vrot.slane %v517_v12, 1 }
 0x154   :  { %v525_v15 = vrot.slane %v524_v13, 1 }
 0x155   :  { %v519_v16 = vadd.f32 %v518_v14, %v517_v12 }
 0x156   :  { %v526_v17 = vadd.f32 %v525_v15, %v524_v13 }
 0x158   :  { %v530_v18 = vsel %vm529_vm4, %v526_v17, %v519_v16 }
 0x159   :  { %v533_v19 = vsel %vm532_vm5, %v530_v18, 0.0 }
 0x15a   :  { %534 = vadd.xlane.f32.xlu0 %v533_v19 }
 0x1e7   :  { %v535_v21 = vpop.xlane.xlu0 %534 }
 0x1e8   :  { %v543_v22 = vadd.f32 %v593_v20, %v535_v21 }
 0x1ea   :  { %545 = vst.msk [vmem:[%s884_s7] sm:$0x3] %vm544_vm6, %v543_v22 }

</bundles_post_ra>
